<compile_context>
chip_gen: v5e
topology: v5e:2x2
jax: 0.10.0
libtpu: 0.0.40
codegen_flags: <defaults>
</compile_context>

<pallas_src>
import functools

import jax
import jax.numpy as jnp
from jax import lax
from jax.experimental import pallas as pl
from jax.experimental.pallas import tpu as pltpu

LANE = 128


def _round_up(x, m):
    return ((x + m - 1) // m) * m


# ----------------------------------------------------------------------------
# Fused kernel: conv3x3+BN+ReLU -> conv3x3+BN+residual+ReLU (per batch element)
# ----------------------------------------------------------------------------
def basic_block_kernel(x_ref, w1_ref, s1_ref, b1_ref, w2_ref, s2_ref, b2_ref,
                       out_ref, xpad_ref, mpad_ref, patch_ref):
    # x_ref     : (1, H, W, Cp)     channel-padded input tile (f32)
    # w1_ref    : (9*Cp, Cp)        conv1 weight, im2col layout, compute dtype
    # w2_ref    : (9*Cp, Cp)        conv2 weight, im2col layout, compute dtype
    # s*_ref/b*_ref : (1, Cp)       folded BN scale / bias, f32 (zero in pad)
    # out_ref   : (1, H, W, Cp)
    # xpad_ref  : VMEM (H+2, W+2, Cp)  zero-halo input scratch, compute dtype
    # mpad_ref  : VMEM (H+2, W+2, Cp)  zero-halo intermediate scratch
    # patch_ref : VMEM (H*W, 9*Cp)     im2col patch (reused by both convs)
    H, W, Cp = out_ref.shape[1], out_ref.shape[2], out_ref.shape[3]
    cdt = xpad_ref.dtype

    # --- halo-only zeroing (per step; each core has its own scratch copy) ----
    zrow = jnp.zeros((1, W + 2, Cp), cdt)
    zcol = jnp.zeros((H + 2, 1, Cp), cdt)
    for ref in (xpad_ref, mpad_ref):
        ref[0:1, :, :] = zrow
        ref[H + 1:H + 2, :, :] = zrow
        ref[:, 0:1, :] = zcol
        ref[:, W + 1:W + 2, :] = zcol

    x0 = x_ref[0]                                        # (H, W, Cp), f32
    xpad_ref[1:H + 1, 1:W + 1, :] = x0.astype(cdt)

    def conv3x3(src_ref, w_ref):
        # im2col: 9 lane-aligned column writes, then ONE K = 9*Cp matmul.
        for ky in range(3):
            for kx in range(3):
                tap = ky * 3 + kx
                patch_ref[:, tap * Cp:(tap + 1) * Cp] = (
                    src_ref[ky:ky + H, kx:kx + W, :].reshape(H * W, Cp))
        return jnp.dot(patch_ref[...], w_ref[...],
                       preferred_element_type=jnp.float32)   # (H*W, Cp), f32

    # ---- conv1 -> BN1 -> ReLU (intermediate stays in VMEM) ------------------
    y1 = conv3x3(xpad_ref, w1_ref)
    y1 = jnp.maximum(y1 * s1_ref[0] + b1_ref[0], 0.0)
    mpad_ref[1:H + 1, 1:W + 1, :] = y1.reshape(H, W, Cp).astype(cdt)

    # ---- conv2 -> BN2 -> +identity residual (f32) -> ReLU -------------------
    y2 = conv3x3(mpad_ref, w2_ref)
    y2 = y2 * s2_ref[0] + b2_ref[0]
    y2 = y2 + x0.reshape(H * W, Cp).astype(jnp.float32)
    y2 = jnp.maximum(y2, 0.0)
    out_ref[0] = y2.reshape(H, W, Cp).astype(out_ref.dtype)


# ----------------------------------------------------------------------------
# Parameter preparation (do once, outside the per-call path)
# ----------------------------------------------------------------------------
def prepare_params(params, compute_dtype=jnp.bfloat16, eps=1e-5):
    """OIHW -> im2col (9*Cp, Cp) weights (lane-padded, compute dtype) + folded,
    lane-padded BatchNorm scale/bias (f32)."""
    w1 = params["conv1_w"]          # (Cmid, Cin, 3, 3)
    w2 = params["conv2_w"]          # (Cout, Cmid, 3, 3)
    cmid, cin = w1.shape[0], w1.shape[1]
    cout = w2.shape[0]
    assert cin == cout, "identity residual requires inplanes == planes"
    assert w2.shape[1] == cmid
    cp = _round_up(max(cin, cmid, cout), LANE)

    def prep_w(w):
        co, ci = w.shape[0], w.shape[1]
        w_hwio = jnp.transpose(w, (2, 3, 1, 0))                    # (3,3,Ci,Co)
        w_pad = jnp.zeros((3, 3, cp, cp), w.dtype)
        w_pad = w_pad.at[:, :, :ci, :co].set(w_hwio)
        return w_pad.reshape(9 * cp, cp).astype(compute_dtype)     # (9*Cp, Cp)

    def prep_bn(g, b, m, v, c):
        s = (g / jnp.sqrt(v + eps)).astype(jnp.float32)
        bias = (b - m * (g / jnp.sqrt(v + eps))).astype(jnp.float32)
        sp = jnp.zeros((1, cp), jnp.float32).at[0, :c].set(s)
        bp = jnp.zeros((1, cp), jnp.float32).at[0, :c].set(bias)
        return sp, bp

    s1, b1 = prep_bn(params["bn1_gamma"], params["bn1_beta"],
                     params["bn1_mean"], params["bn1_var"], cmid)
    s2, b2 = prep_bn(params["bn2_gamma"], params["bn2_beta"],
                     params["bn2_mean"], params["bn2_var"], cout)
    return {"w1": prep_w(w1), "s1": s1, "b1": b1,
            "w2": prep_w(w2), "s2": s2, "b2": b2}


# ----------------------------------------------------------------------------
# Pallas wrappers
# ----------------------------------------------------------------------------
def basic_block_forward_nhwc(x_nhwc, prep):
    """Fused BasicBlock forward on NHWC activations (preferred fast path)."""
    N, H, W, C = x_nhwc.shape
    Cp = prep["w1"].shape[1]
    compute_dtype = prep["w1"].dtype

    # Lane-dense activations: zero-pad channels once in the wrapper.  Padded
    # weight columns / BN entries are zero, so padded output channels are zero
    # and the identity residual stays correct; they are sliced off below.
    if C < Cp:
        x_p = jnp.pad(x_nhwc, ((0, 0), (0, 0), (0, 0), (0, Cp - C)))
    else:
        x_p = x_nhwc

    out_p = pl.pallas_call(
        basic_block_kernel,
        out_shape=jax.ShapeDtypeStruct((N, H, W, Cp), x_nhwc.dtype),
        grid_spec=pltpu.PrefetchScalarGridSpec(
            num_scalar_prefetch=0,
            grid=(N,),
            in_specs=[
                pl.BlockSpec((1, H, W, Cp), lambda n: (n, 0, 0, 0)),
                pl.BlockSpec((9 * Cp, Cp), lambda n: (0, 0)),
                pl.BlockSpec((1, Cp), lambda n: (0, 0)),
                pl.BlockSpec((1, Cp), lambda n: (0, 0)),
                pl.BlockSpec((9 * Cp, Cp), lambda n: (0, 0)),
                pl.BlockSpec((1, Cp), lambda n: (0, 0)),
                pl.BlockSpec((1, Cp), lambda n: (0, 0)),
            ],
            out_specs=pl.BlockSpec((1, H, W, Cp), lambda n: (n, 0, 0, 0)),
            scratch_shapes=[
                pltpu.VMEM((H + 2, W + 2, Cp), compute_dtype),   # xpad
                pltpu.VMEM((H + 2, W + 2, Cp), compute_dtype),   # mpad
                pltpu.VMEM((H * W, 9 * Cp), compute_dtype),      # im2col patch
            ],
        ),
        compiler_params=pltpu.CompilerParams(
            dimension_semantics=("parallel",),
            # within the v7x 64-MiB budget; re-derive if tiles are enlarged.
            vmem_limit_bytes=48 * 1024 * 1024,
        ),
    )(x_p, prep["w1"], prep["s1"], prep["b1"],
      prep["w2"], prep["s2"], prep["b2"])

    return out_p[..., :C]


def basic_block_forward(x_nchw, params, compute_dtype=jnp.float32):
    """PyTorch-layout (NCHW) compatibility wrapper.  For repeated use, prefer
    prepare_params(...) once + basic_block_forward_nhwc(...) on NHWC."""
    prep = prepare_params(params, compute_dtype)
    x_nhwc = jnp.transpose(x_nchw, (0, 2, 3, 1))
    out = basic_block_forward_nhwc(x_nhwc, prep)
    return jnp.transpose(out, (0, 3, 1, 2))


# ----------------------------------------------------------------------------
# Pure-JAX reference (lax conv), matching the PyTorch module in inference mode
# ----------------------------------------------------------------------------
def basic_block_reference(x_nchw, params, eps=1e-5):
    def conv(x, w):
        return lax.conv_general_dilated(
            x, w, window_strides=(1, 1), padding=((1, 1), (1, 1)),
            dimension_numbers=("NCHW", "OIHW", "NCHW"))

    def bn(x, g, b, m, v):
        g = g.reshape(1, -1, 1, 1); b = b.reshape(1, -1, 1, 1)
        m = m.reshape(1, -1, 1, 1); v = v.reshape(1, -1, 1, 1)
        return (x - m) / jnp.sqrt(v + eps) * g + b

    out = conv(x_nchw, params["conv1_w"])
    out = bn(out, params["bn1_gamma"], params["bn1_beta"],
             params["bn1_mean"], params["bn1_var"])
    out = jnp.maximum(out, 0.0)
    out = conv(out, params["conv2_w"])
    out = bn(out, params["bn2_gamma"], params["bn2_beta"],
             params["bn2_mean"], params["bn2_var"])
    out = out + x_nchw
    return jnp.maximum(out, 0.0)


# ----------------------------------------------------------------------------
if __name__ == "__main__":
    key = jax.random.PRNGKey(0)
    N, C, H, W = 2, 4, 16, 16      # inplanes == planes == 4, stride=1
    planes = C

    keys = jax.random.split(key, 11)
    x = jax.random.normal(keys[0], (N, C, H, W), jnp.float32)

    params = {
        "conv1_w": jax.random.normal(keys[1], (planes, C, 3, 3), jnp.float32) * 0.1,
        "conv2_w": jax.random.normal(keys[2], (planes, planes, 3, 3), jnp.float32) * 0.1,
        "bn1_gamma": 1.0 + 0.1 * jax.random.normal(keys[3], (planes,), jnp.float32),
        "bn1_beta": 0.1 * jax.random.normal(keys[4], (planes,), jnp.float32),
        "bn1_mean": 0.1 * jax.random.normal(keys[5], (planes,), jnp.float32),
        "bn1_var": 1.0 + 0.1 * jax.random.uniform(keys[6], (planes,), jnp.float32),
        "bn2_gamma": 1.0 + 0.1 * jax.random.normal(keys[7], (planes,), jnp.float32),
        "bn2_beta": 0.1 * jax.random.normal(keys[8], (planes,), jnp.float32),
        "bn2_mean": 0.1 * jax.random.normal(keys[9], (planes,), jnp.float32),
        "bn2_var": 1.0 + 0.1 * jax.random.uniform(keys[10], (planes,), jnp.float32),
    }

    ref = basic_block_reference(x, params)

    # --- 1) exact-parity check: fused kernel with f32 compute ----------------
    out_f32 = jax.jit(functools.partial(basic_block_forward,
                                        compute_dtype=jnp.float32))(x, params)
    out_f32 = jax.block_until_ready(out_f32)
    assert out_f32.shape == (N, C, H, W)
    err_f32 = jnp.max(jnp.abs(out_f32 - ref))
    assert jnp.allclose(out_f32, ref, atol=1e-4, rtol=1e-4), \
        f"f32 path max err {err_f32}"

    # --- 2) fast path: NHWC end-to-end, pre-prepared bf16 weights ------------
    # (intermediate activation is bf16 before conv2 -> loose tolerance)
    prep_bf16 = prepare_params(params, compute_dtype=jnp.bfloat16)
    x_nhwc = jnp.transpose(x, (0, 2, 3, 1))
    out_bf16 = jax.jit(basic_block_forward_nhwc)(x_nhwc, prep_bf16)
    out_bf16 = jax.block_until_ready(out_bf16)
    out_bf16_nchw = jnp.transpose(out_bf16, (0, 3, 1, 2))
    err_bf16 = jnp.max(jnp.abs(out_bf16_nchw - ref))
    assert jnp.allclose(out_bf16_nchw, ref, atol=5e-2, rtol=5e-2), \
        f"bf16 path max err {err_bf16}"

    print("KERNEL_OK")
</pallas_src>

<mosaic_0001>
module attributes {stable_mosaic.version = 11 : i64} {
  func.func @basic_block_kernel(%arg0: i32, %arg1: memref<1x16x16x128xf32, #tpu.memory_space<vmem>>, %arg2: memref<1152x128xf32, #tpu.memory_space<vmem>>, %arg3: memref<1x128xf32, #tpu.memory_space<vmem>>, %arg4: memref<1x128xf32, #tpu.memory_space<vmem>>, %arg5: memref<1152x128xf32, #tpu.memory_space<vmem>>, %arg6: memref<1x128xf32, #tpu.memory_space<vmem>>, %arg7: memref<1x128xf32, #tpu.memory_space<vmem>>, %arg8: memref<1x16x16x128xf32, #tpu.memory_space<vmem>>, %arg9: memref<18x18x128xf32, #tpu.memory_space<vmem>>, %arg10: memref<18x18x128xf32, #tpu.memory_space<vmem>>, %arg11: memref<256x1152xf32, #tpu.memory_space<vmem>>) attributes {dimension_semantics = [#tpu.dimension_semantics<parallel>], iteration_bounds = array<i64: 2>, scalar_prefetch = 0 : i64, scratch_operands = 3 : i64, tpu.core_type = #tpu.core_type<tc>, window_params = [{transform_indices = @transform_0, window_bounds = array<i64: 1, 16, 16, 128>}, {pipeline_mode = #tpu.pipeline_mode<synchronous>, transform_indices = @transform_1, window_bounds = array<i64: 1152, 128>}, {pipeline_mode = #tpu.pipeline_mode<synchronous>, transform_indices = @transform_2, window_bounds = array<i64: 1, 128>}, {pipeline_mode = #tpu.pipeline_mode<synchronous>, transform_indices = @transform_3, window_bounds = array<i64: 1, 128>}, {pipeline_mode = #tpu.pipeline_mode<synchronous>, transform_indices = @transform_4, window_bounds = array<i64: 1152, 128>}, {pipeline_mode = #tpu.pipeline_mode<synchronous>, transform_indices = @transform_5, window_bounds = array<i64: 1, 128>}, {pipeline_mode = #tpu.pipeline_mode<synchronous>, transform_indices = @transform_6, window_bounds = array<i64: 1, 128>}, {transform_indices = @transform_7, window_bounds = array<i64: 1, 16, 16, 128>}]} {
    %cst = arith.constant 0.000000e+00 : f32
    %0 = vector.broadcast %cst : f32 to vector<1x18x128xf32>
    %cst_0 = arith.constant 0.000000e+00 : f32
    %1 = vector.broadcast %cst_0 : f32 to vector<18x1x128xf32>
    %c0 = arith.constant 0 : index
    %c0_1 = arith.constant 0 : index
    %c0_2 = arith.constant 0 : index
    %2 = vector.load %arg9[%c0, %c0_1, %c0_2] : memref<18x18x128xf32, #tpu.memory_space<vmem>>, vector<1x18x128xf32>
    tpu.vector_store %arg9[%c0, %c0_1, %c0_2], %0 {strides = array<i32>} : memref<18x18x128xf32, #tpu.memory_space<vmem>>, vector<1x18x128xf32>,
    %c17 = arith.constant 17 : index
    %c0_3 = arith.constant 0 : index
    %c0_4 = arith.constant 0 : index
    %3 = vector.load %arg9[%c17, %c0_3, %c0_4] : memref<18x18x128xf32, #tpu.memory_space<vmem>>, vector<1x18x128xf32>
    tpu.vector_store %arg9[%c17, %c0_3, %c0_4], %0 {strides = array<i32>} : memref<18x18x128xf32, #tpu.memory_space<vmem>>, vector<1x18x128xf32>,
    %c0_5 = arith.constant 0 : index
    %c0_6 = arith.constant 0 : index
    %c0_7 = arith.constant 0 : index
    %4 = vector.load %arg9[%c0_5, %c0_6, %c0_7] : memref<18x18x128xf32, #tpu.memory_space<vmem>>, vector<18x1x128xf32>
    tpu.vector_store %arg9[%c0_5, %c0_6, %c0_7], %1 {strides = array<i32>} : memref<18x18x128xf32, #tpu.memory_space<vmem>>, vector<18x1x128xf32>,
    %c0_8 = arith.constant 0 : index
    %c17_9 = arith.constant 17 : index
    %c0_10 = arith.constant 0 : index
    %5 = vector.load %arg9[%c0_8, %c17_9, %c0_10] : memref<18x18x128xf32, #tpu.memory_space<vmem>>, vector<18x1x128xf32>
    tpu.vector_store %arg9[%c0_8, %c17_9, %c0_10], %1 {strides = array<i32>} : memref<18x18x128xf32, #tpu.memory_space<vmem>>, vector<18x1x128xf32>,
    %c0_11 = arith.constant 0 : index
    %c0_12 = arith.constant 0 : index
    %c0_13 = arith.constant 0 : index
    %6 = vector.load %arg10[%c0_11, %c0_12, %c0_13] : memref<18x18x128xf32, #tpu.memory_space<vmem>>, vector<1x18x128xf32>
    tpu.vector_store %arg10[%c0_11, %c0_12, %c0_13], %0 {strides = array<i32>} : memref<18x18x128xf32, #tpu.memory_space<vmem>>, vector<1x18x128xf32>,
    %c17_14 = arith.constant 17 : index
    %c0_15 = arith.constant 0 : index
    %c0_16 = arith.constant 0 : index
    %7 = vector.load %arg10[%c17_14, %c0_15, %c0_16] : memref<18x18x128xf32, #tpu.memory_space<vmem>>, vector<1x18x128xf32>
    tpu.vector_store %arg10[%c17_14, %c0_15, %c0_16], %0 {strides = array<i32>} : memref<18x18x128xf32, #tpu.memory_space<vmem>>, vector<1x18x128xf32>,
    %c0_17 = arith.constant 0 : index
    %c0_18 = arith.constant 0 : index
    %c0_19 = arith.constant 0 : index
    %8 = vector.load %arg10[%c0_17, %c0_18, %c0_19] : memref<18x18x128xf32, #tpu.memory_space<vmem>>, vector<18x1x128xf32>
    tpu.vector_store %arg10[%c0_17, %c0_18, %c0_19], %1 {strides = array<i32>} : memref<18x18x128xf32, #tpu.memory_space<vmem>>, vector<18x1x128xf32>,
    %c0_20 = arith.constant 0 : index
    %c17_21 = arith.constant 17 : index
    %c0_22 = arith.constant 0 : index
    %9 = vector.load %arg10[%c0_20, %c17_21, %c0_22] : memref<18x18x128xf32, #tpu.memory_space<vmem>>, vector<18x1x128xf32>
    tpu.vector_store %arg10[%c0_20, %c17_21, %c0_22], %1 {strides = array<i32>} : memref<18x18x128xf32, #tpu.memory_space<vmem>>, vector<18x1x128xf32>,
    %c0_23 = arith.constant 0 : index
    %c0_24 = arith.constant 0 : index
    %c0_25 = arith.constant 0 : index
    %c0_26 = arith.constant 0 : index
    %10 = vector.load %arg1[%c0_23, %c0_24, %c0_25, %c0_26] : memref<1x16x16x128xf32, #tpu.memory_space<vmem>>, vector<1x16x16x128xf32>
    %11 = vector.shape_cast %10 : vector<1x16x16x128xf32> to vector<16x16x128xf32>
    %c1 = arith.constant 1 : index
    %c1_27 = arith.constant 1 : index
    %c0_28 = arith.constant 0 : index
    %12 = vector.load %arg9[%c1, %c1_27, %c0_28] : memref<18x18x128xf32, #tpu.memory_space<vmem>>, vector<16x16x128xf32>
    tpu.vector_store %arg9[%c1, %c1_27, %c0_28], %11 {strides = array<i32>} : memref<18x18x128xf32, #tpu.memory_space<vmem>>, vector<16x16x128xf32>,
    %c0_29 = arith.constant 0 : index
    %c0_30 = arith.constant 0 : index
    %c0_31 = arith.constant 0 : index
    %13 = vector.load %arg9[%c0_29, %c0_30, %c0_31] : memref<18x18x128xf32, #tpu.memory_space<vmem>>, vector<16x16x128xf32>
    %14 = vector.shape_cast %13 : vector<16x16x128xf32> to vector<256x128xf32>
    %c0_32 = arith.constant 0 : index
    %c0_33 = arith.constant 0 : index
    %15 = vector.load %arg11[%c0_32, %c0_33] : memref<256x1152xf32, #tpu.memory_space<vmem>>, vector<256x128xf32>
    tpu.vector_store %arg11[%c0_32, %c0_33], %14 {strides = array<i32>} : memref<256x1152xf32, #tpu.memory_space<vmem>>, vector<256x128xf32>,
    %c0_34 = arith.constant 0 : index
    %c1_35 = arith.constant 1 : index
    %c0_36 = arith.constant 0 : index
    %16 = vector.load %arg9[%c0_34, %c1_35, %c0_36] : memref<18x18x128xf32, #tpu.memory_space<vmem>>, vector<16x16x128xf32>
    %17 = vector.shape_cast %16 : vector<16x16x128xf32> to vector<256x128xf32>
    %c0_37 = arith.constant 0 : index
    %c128 = arith.constant 128 : index
    %18 = vector.load %arg11[%c0_37, %c128] : memref<256x1152xf32, #tpu.memory_space<vmem>>, vector<256x128xf32>
    tpu.vector_store %arg11[%c0_37, %c128], %17 {strides = array<i32>} : memref<256x1152xf32, #tpu.memory_space<vmem>>, vector<256x128xf32>,
    %c0_38 = arith.constant 0 : index
    %c2 = arith.constant 2 : index
    %c0_39 = arith.constant 0 : index
    %19 = vector.load %arg9[%c0_38, %c2, %c0_39] : memref<18x18x128xf32, #tpu.memory_space<vmem>>, vector<16x16x128xf32>
    %20 = vector.shape_cast %19 : vector<16x16x128xf32> to vector<256x128xf32>
    %c0_40 = arith.constant 0 : index
    %c256 = arith.constant 256 : index
    %21 = vector.load %arg11[%c0_40, %c256] : memref<256x1152xf32, #tpu.memory_space<vmem>>, vector<256x128xf32>
    tpu.vector_store %arg11[%c0_40, %c256], %20 {strides = array<i32>} : memref<256x1152xf32, #tpu.memory_space<vmem>>, vector<256x128xf32>,
    %c1_41 = arith.constant 1 : index
    %c0_42 = arith.constant 0 : index
    %c0_43 = arith.constant 0 : index
    %22 = vector.load %arg9[%c1_41, %c0_42, %c0_43] : memref<18x18x128xf32, #tpu.memory_space<vmem>>, vector<16x16x128xf32>
    %23 = vector.shape_cast %22 : vector<16x16x128xf32> to vector<256x128xf32>
    %c0_44 = arith.constant 0 : index
    %c384 = arith.constant 384 : index
    %24 = vector.load %arg11[%c0_44, %c384] : memref<256x1152xf32, #tpu.memory_space<vmem>>, vector<256x128xf32>
    tpu.vector_store %arg11[%c0_44, %c384], %23 {strides = array<i32>} : memref<256x1152xf32, #tpu.memory_space<vmem>>, vector<256x128xf32>,
    %c1_45 = arith.constant 1 : index
    %c1_46 = arith.constant 1 : index
    %c0_47 = arith.constant 0 : index
    %25 = vector.load %arg9[%c1_45, %c1_46, %c0_47] : memref<18x18x128xf32, #tpu.memory_space<vmem>>, vector<16x16x128xf32>
    %26 = vector.shape_cast %25 : vector<16x16x128xf32> to vector<256x128xf32>
    %c0_48 = arith.constant 0 : index
    %c512 = arith.constant 512 : index
    %27 = vector.load %arg11[%c0_48, %c512] : memref<256x1152xf32, #tpu.memory_space<vmem>>, vector<256x128xf32>
    tpu.vector_store %arg11[%c0_48, %c512], %26 {strides = array<i32>} : memref<256x1152xf32, #tpu.memory_space<vmem>>, vector<256x128xf32>,
    %c1_49 = arith.constant 1 : index
    %c2_50 = arith.constant 2 : index
    %c0_51 = arith.constant 0 : index
    %28 = vector.load %arg9[%c1_49, %c2_50, %c0_51] : memref<18x18x128xf32, #tpu.memory_space<vmem>>, vector<16x16x128xf32>
    %29 = vector.shape_cast %28 : vector<16x16x128xf32> to vector<256x128xf32>
    %c0_52 = arith.constant 0 : index
    %c640 = arith.constant 640 : index
    %30 = vector.load %arg11[%c0_52, %c640] : memref<256x1152xf32, #tpu.memory_space<vmem>>, vector<256x128xf32>
    tpu.vector_store %arg11[%c0_52, %c640], %29 {strides = array<i32>} : memref<256x1152xf32, #tpu.memory_space<vmem>>, vector<256x128xf32>,
    %c2_53 = arith.constant 2 : index
    %c0_54 = arith.constant 0 : index
    %c0_55 = arith.constant 0 : index
    %31 = vector.load %arg9[%c2_53, %c0_54, %c0_55] : memref<18x18x128xf32, #tpu.memory_space<vmem>>, vector<16x16x128xf32>
    %32 = vector.shape_cast %31 : vector<16x16x128xf32> to vector<256x128xf32>
    %c0_56 = arith.constant 0 : index
    %c768 = arith.constant 768 : index
    %33 = vector.load %arg11[%c0_56, %c768] : memref<256x1152xf32, #tpu.memory_space<vmem>>, vector<256x128xf32>
    tpu.vector_store %arg11[%c0_56, %c768], %32 {strides = array<i32>} : memref<256x1152xf32, #tpu.memory_space<vmem>>, vector<256x128xf32>,
    %c2_57 = arith.constant 2 : index
    %c1_58 = arith.constant 1 : index
    %c0_59 = arith.constant 0 : index
    %34 = vector.load %arg9[%c2_57, %c1_58, %c0_59] : memref<18x18x128xf32, #tpu.memory_space<vmem>>, vector<16x16x128xf32>
    %35 = vector.shape_cast %34 : vector<16x16x128xf32> to vector<256x128xf32>
    %c0_60 = arith.constant 0 : index
    %c896 = arith.constant 896 : index
    %36 = vector.load %arg11[%c0_60, %c896] : memref<256x1152xf32, #tpu.memory_space<vmem>>, vector<256x128xf32>
    tpu.vector_store %arg11[%c0_60, %c896], %35 {strides = array<i32>} : memref<256x1152xf32, #tpu.memory_space<vmem>>, vector<256x128xf32>,
    %c2_61 = arith.constant 2 : index
    %c2_62 = arith.constant 2 : index
    %c0_63 = arith.constant 0 : index
    %37 = vector.load %arg9[%c2_61, %c2_62, %c0_63] : memref<18x18x128xf32, #tpu.memory_space<vmem>>, vector<16x16x128xf32>
    %38 = vector.shape_cast %37 : vector<16x16x128xf32> to vector<256x128xf32>
    %c0_64 = arith.constant 0 : index
    %c1024 = arith.constant 1024 : index
    %39 = vector.load %arg11[%c0_64, %c1024] : memref<256x1152xf32, #tpu.memory_space<vmem>>, vector<256x128xf32>
    tpu.vector_store %arg11[%c0_64, %c1024], %38 {strides = array<i32>} : memref<256x1152xf32, #tpu.memory_space<vmem>>, vector<256x128xf32>,
    %c0_65 = arith.constant 0 : index
    %c0_66 = arith.constant 0 : index
    %40 = vector.load %arg11[%c0_65, %c0_66] : memref<256x1152xf32, #tpu.memory_space<vmem>>, vector<256x1152xf32>
    %c0_67 = arith.constant 0 : index
    %c0_68 = arith.constant 0 : index
    %41 = vector.load %arg2[%c0_67, %c0_68] : memref<1152x128xf32, #tpu.memory_space<vmem>>, vector<1152x128xf32>
    %cst_69 = arith.constant dense<0.000000e+00> : vector<256x128xf32>
    %42 = tpu.matmul %40, %41, %cst_69 {dimension_numbers = #tpu.dot_dimension_numbers<[1], [0], [0], [1], [0, 0, 1, 1], [], []>} : vector<256x1152xf32>, vector<1152x128xf32>, vector<256x128xf32> -> vector<256x128xf32>
    %c0_70 = arith.constant 0 : index
    %c0_71 = arith.constant 0 : index
    %43 = vector.load %arg3[%c0_70, %c0_71] : memref<1x128xf32, #tpu.memory_space<vmem>>, vector<1x128xf32>
    %44 = vector.shape_cast %43 : vector<1x128xf32> to vector<128xf32>
    %45 = vector.shape_cast %44 : vector<128xf32> to vector<1x128xf32>
    %46 = vector.broadcast %45 : vector<1x128xf32> to vector<256x128xf32>
    %47 = arith.mulf %42, %46 : vector<256x128xf32>
    %c0_72 = arith.constant 0 : index
    %c0_73 = arith.constant 0 : index
    %48 = vector.load %arg4[%c0_72, %c0_73] : memref<1x128xf32, #tpu.memory_space<vmem>>, vector<1x128xf32>
    %49 = vector.shape_cast %48 : vector<1x128xf32> to vector<128xf32>
    %50 = vector.shape_cast %49 : vector<128xf32> to vector<1x128xf32>
    %51 = vector.broadcast %50 : vector<1x128xf32> to vector<256x128xf32>
    %52 = arith.addf %47, %51 : vector<256x128xf32>
    %cst_74 = arith.constant 0.000000e+00 : f32
    %53 = vector.broadcast %cst_74 : f32 to vector<256x128xf32>
    %54 = arith.maximumf %52, %53 : vector<256x128xf32>
    %55 = vector.shape_cast %54 : vector<256x128xf32> to vector<16x16x128xf32>
    %c1_75 = arith.constant 1 : index
    %c1_76 = arith.constant 1 : index
    %c0_77 = arith.constant 0 : index
    %56 = vector.load %arg10[%c1_75, %c1_76, %c0_77] : memref<18x18x128xf32, #tpu.memory_space<vmem>>, vector<16x16x128xf32>
    tpu.vector_store %arg10[%c1_75, %c1_76, %c0_77], %55 {strides = array<i32>} : memref<18x18x128xf32, #tpu.memory_space<vmem>>, vector<16x16x128xf32>,
    %c0_78 = arith.constant 0 : index
    %c0_79 = arith.constant 0 : index
    %c0_80 = arith.constant 0 : index
    %57 = vector.load %arg10[%c0_78, %c0_79, %c0_80] : memref<18x18x128xf32, #tpu.memory_space<vmem>>, vector<16x16x128xf32>
    %58 = vector.shape_cast %57 : vector<16x16x128xf32> to vector<256x128xf32>
    %c0_81 = arith.constant 0 : index
    %c0_82 = arith.constant 0 : index
    %59 = vector.load %arg11[%c0_81, %c0_82] : memref<256x1152xf32, #tpu.memory_space<vmem>>, vector<256x128xf32>
    tpu.vector_store %arg11[%c0_81, %c0_82], %58 {strides = array<i32>} : memref<256x1152xf32, #tpu.memory_space<vmem>>, vector<256x128xf32>,
    %c0_83 = arith.constant 0 : index
    %c1_84 = arith.constant 1 : index
    %c0_85 = arith.constant 0 : index
    %60 = vector.load %arg10[%c0_83, %c1_84, %c0_85] : memref<18x18x128xf32, #tpu.memory_space<vmem>>, vector<16x16x128xf32>
    %61 = vector.shape_cast %60 : vector<16x16x128xf32> to vector<256x128xf32>
    %c0_86 = arith.constant 0 : index
    %c128_87 = arith.constant 128 : index
    %62 = vector.load %arg11[%c0_86, %c128_87] : memref<256x1152xf32, #tpu.memory_space<vmem>>, vector<256x128xf32>
    tpu.vector_store %arg11[%c0_86, %c128_87], %61 {strides = array<i32>} : memref<256x1152xf32, #tpu.memory_space<vmem>>, vector<256x128xf32>,
    %c0_88 = arith.constant 0 : index
    %c2_89 = arith.constant 2 : index
    %c0_90 = arith.constant 0 : index
    %63 = vector.load %arg10[%c0_88, %c2_89, %c0_90] : memref<18x18x128xf32, #tpu.memory_space<vmem>>, vector<16x16x128xf32>
    %64 = vector.shape_cast %63 : vector<16x16x128xf32> to vector<256x128xf32>
    %c0_91 = arith.constant 0 : index
    %c256_92 = arith.constant 256 : index
    %65 = vector.load %arg11[%c0_91, %c256_92] : memref<256x1152xf32, #tpu.memory_space<vmem>>, vector<256x128xf32>
    tpu.vector_store %arg11[%c0_91, %c256_92], %64 {strides = array<i32>} : memref<256x1152xf32, #tpu.memory_space<vmem>>, vector<256x128xf32>,
    %c1_93 = arith.constant 1 : index
    %c0_94 = arith.constant 0 : index
    %c0_95 = arith.constant 0 : index
    %66 = vector.load %arg10[%c1_93, %c0_94, %c0_95] : memref<18x18x128xf32, #tpu.memory_space<vmem>>, vector<16x16x128xf32>
    %67 = vector.shape_cast %66 : vector<16x16x128xf32> to vector<256x128xf32>
    %c0_96 = arith.constant 0 : index
    %c384_97 = arith.constant 384 : index
    %68 = vector.load %arg11[%c0_96, %c384_97] : memref<256x1152xf32, #tpu.memory_space<vmem>>, vector<256x128xf32>
    tpu.vector_store %arg11[%c0_96, %c384_97], %67 {strides = array<i32>} : memref<256x1152xf32, #tpu.memory_space<vmem>>, vector<256x128xf32>,
    %c1_98 = arith.constant 1 : index
    %c1_99 = arith.constant 1 : index
    %c0_100 = arith.constant 0 : index
    %69 = vector.load %arg10[%c1_98, %c1_99, %c0_100] : memref<18x18x128xf32, #tpu.memory_space<vmem>>, vector<16x16x128xf32>
    %70 = vector.shape_cast %69 : vector<16x16x128xf32> to vector<256x128xf32>
    %c0_101 = arith.constant 0 : index
    %c512_102 = arith.constant 512 : index
    %71 = vector.load %arg11[%c0_101, %c512_102] : memref<256x1152xf32, #tpu.memory_space<vmem>>, vector<256x128xf32>
    tpu.vector_store %arg11[%c0_101, %c512_102], %70 {strides = array<i32>} : memref<256x1152xf32, #tpu.memory_space<vmem>>, vector<256x128xf32>,
    %c1_103 = arith.constant 1 : index
    %c2_104 = arith.constant 2 : index
    %c0_105 = arith.constant 0 : index
    %72 = vector.load %arg10[%c1_103, %c2_104, %c0_105] : memref<18x18x128xf32, #tpu.memory_space<vmem>>, vector<16x16x128xf32>
    %73 = vector.shape_cast %72 : vector<16x16x128xf32> to vector<256x128xf32>
    %c0_106 = arith.constant 0 : index
    %c640_107 = arith.constant 640 : index
    %74 = vector.load %arg11[%c0_106, %c640_107] : memref<256x1152xf32, #tpu.memory_space<vmem>>, vector<256x128xf32>
    tpu.vector_store %arg11[%c0_106, %c640_107], %73 {strides = array<i32>} : memref<256x1152xf32, #tpu.memory_space<vmem>>, vector<256x128xf32>,
    %c2_108 = arith.constant 2 : index
    %c0_109 = arith.constant 0 : index
    %c0_110 = arith.constant 0 : index
    %75 = vector.load %arg10[%c2_108, %c0_109, %c0_110] : memref<18x18x128xf32, #tpu.memory_space<vmem>>, vector<16x16x128xf32>
    %76 = vector.shape_cast %75 : vector<16x16x128xf32> to vector<256x128xf32>
    %c0_111 = arith.constant 0 : index
    %c768_112 = arith.constant 768 : index
    %77 = vector.load %arg11[%c0_111, %c768_112] : memref<256x1152xf32, #tpu.memory_space<vmem>>, vector<256x128xf32>
    tpu.vector_store %arg11[%c0_111, %c768_112], %76 {strides = array<i32>} : memref<256x1152xf32, #tpu.memory_space<vmem>>, vector<256x128xf32>,
    %c2_113 = arith.constant 2 : index
    %c1_114 = arith.constant 1 : index
    %c0_115 = arith.constant 0 : index
    %78 = vector.load %arg10[%c2_113, %c1_114, %c0_115] : memref<18x18x128xf32, #tpu.memory_space<vmem>>, vector<16x16x128xf32>
    %79 = vector.shape_cast %78 : vector<16x16x128xf32> to vector<256x128xf32>
    %c0_116 = arith.constant 0 : index
    %c896_117 = arith.constant 896 : index
    %80 = vector.load %arg11[%c0_116, %c896_117] : memref<256x1152xf32, #tpu.memory_space<vmem>>, vector<256x128xf32>
    tpu.vector_store %arg11[%c0_116, %c896_117], %79 {strides = array<i32>} : memref<256x1152xf32, #tpu.memory_space<vmem>>, vector<256x128xf32>,
    %c2_118 = arith.constant 2 : index
    %c2_119 = arith.constant 2 : index
    %c0_120 = arith.constant 0 : index
    %81 = vector.load %arg10[%c2_118, %c2_119, %c0_120] : memref<18x18x128xf32, #tpu.memory_space<vmem>>, vector<16x16x128xf32>
    %82 = vector.shape_cast %81 : vector<16x16x128xf32> to vector<256x128xf32>
    %c0_121 = arith.constant 0 : index
    %c1024_122 = arith.constant 1024 : index
    %83 = vector.load %arg11[%c0_121, %c1024_122] : memref<256x1152xf32, #tpu.memory_space<vmem>>, vector<256x128xf32>
    tpu.vector_store %arg11[%c0_121, %c1024_122], %82 {strides = array<i32>} : memref<256x1152xf32, #tpu.memory_space<vmem>>, vector<256x128xf32>,
    %c0_123 = arith.constant 0 : index
    %c0_124 = arith.constant 0 : index
    %84 = vector.load %arg11[%c0_123, %c0_124] : memref<256x1152xf32, #tpu.memory_space<vmem>>, vector<256x1152xf32>
    %c0_125 = arith.constant 0 : index
    %c0_126 = arith.constant 0 : index
    %85 = vector.load %arg5[%c0_125, %c0_126] : memref<1152x128xf32, #tpu.memory_space<vmem>>, vector<1152x128xf32>
    %cst_127 = arith.constant dense<0.000000e+00> : vector<256x128xf32>
    %86 = tpu.matmul %84, %85, %cst_127 {dimension_numbers = #tpu.dot_dimension_numbers<[1], [0], [0], [1], [0, 0, 1, 1], [], []>} : vector<256x1152xf32>, vector<1152x128xf32>, vector<256x128xf32> -> vector<256x128xf32>
    %c0_128 = arith.constant 0 : index
    %c0_129 = arith.constant 0 : index
    %87 = vector.load %arg6[%c0_128, %c0_129] : memref<1x128xf32, #tpu.memory_space<vmem>>, vector<1x128xf32>
    %88 = vector.shape_cast %87 : vector<1x128xf32> to vector<128xf32>
    %89 = vector.shape_cast %88 : vector<128xf32> to vector<1x128xf32>
    %90 = vector.broadcast %89 : vector<1x128xf32> to vector<256x128xf32>
    %91 = arith.mulf %86, %90 : vector<256x128xf32>
    %c0_130 = arith.constant 0 : index
    %c0_131 = arith.constant 0 : index
    %92 = vector.load %arg7[%c0_130, %c0_131] : memref<1x128xf32, #tpu.memory_space<vmem>>, vector<1x128xf32>
    %93 = vector.shape_cast %92 : vector<1x128xf32> to vector<128xf32>
    %94 = vector.shape_cast %93 : vector<128xf32> to vector<1x128xf32>
    %95 = vector.broadcast %94 : vector<1x128xf32> to vector<256x128xf32>
    %96 = arith.addf %91, %95 : vector<256x128xf32>
    %97 = vector.shape_cast %11 : vector<16x16x128xf32> to vector<256x128xf32>
    %98 = arith.addf %96, %97 : vector<256x128xf32>
    %cst_132 = arith.constant 0.000000e+00 : f32
    %99 = vector.broadcast %cst_132 : f32 to vector<256x128xf32>
    %100 = arith.maximumf %98, %99 : vector<256x128xf32>
    %101 = vector.shape_cast %100 : vector<256x128xf32> to vector<16x16x128xf32>
    %c0_133 = arith.constant 0 : index
    %c0_134 = arith.constant 0 : index
    %c0_135 = arith.constant 0 : index
    %c0_136 = arith.constant 0 : index
    %102 = vector.load %arg8[%c0_133, %c0_134, %c0_135, %c0_136] : memref<1x16x16x128xf32, #tpu.memory_space<vmem>>, vector<1x16x16x128xf32>
    %103 = vector.shape_cast %102 : vector<1x16x16x128xf32> to vector<16x16x128xf32>
    %104 = vector.shape_cast %101 : vector<16x16x128xf32> to vector<1x16x16x128xf32>
    tpu.vector_store %arg8[%c0_133, %c0_134, %c0_135, %c0_136], %104 {strides = array<i32>} : memref<1x16x16x128xf32, #tpu.memory_space<vmem>>, vector<1x16x16x128xf32>,
    return
  }
  func.func @transform_0(%arg0: i32) -> (i32, i32, i32, i32) {
    %c0_i32 = arith.constant 0 : i32
    %c0_i32_0 = arith.constant 0 : i32
    %c0_i32_1 = arith.constant 0 : i32
    %c0_i32_2 = arith.constant 0 : i32
    return %arg0, %c0_i32, %c0_i32_0, %c0_i32_1 : i32, i32, i32, i32
  }
  func.func @transform_1(%arg0: i32) -> (i32, i32) {
    %c0_i32 = arith.constant 0 : i32
    %c0_i32_0 = arith.constant 0 : i32
    %c0_i32_1 = arith.constant 0 : i32
    return %c0_i32, %c0_i32_0 : i32, i32
  }
  func.func @transform_2(%arg0: i32) -> (i32, i32) {
    %c0_i32 = arith.constant 0 : i32
    %c0_i32_0 = arith.constant 0 : i32
    %c0_i32_1 = arith.constant 0 : i32
    return %c0_i32, %c0_i32_0 : i32, i32
  }
  func.func @transform_3(%arg0: i32) -> (i32, i32) {
    %c0_i32 = arith.constant 0 : i32
    %c0_i32_0 = arith.constant 0 : i32
    %c0_i32_1 = arith.constant 0 : i32
    return %c0_i32, %c0_i32_0 : i32, i32
  }
  func.func @transform_4(%arg0: i32) -> (i32, i32) {
    %c0_i32 = arith.constant 0 : i32
    %c0_i32_0 = arith.constant 0 : i32
    %c0_i32_1 = arith.constant 0 : i32
    return %c0_i32, %c0_i32_0 : i32, i32
  }
  func.func @transform_5(%arg0: i32) -> (i32, i32) {
    %c0_i32 = arith.constant 0 : i32
    %c0_i32_0 = arith.constant 0 : i32
    %c0_i32_1 = arith.constant 0 : i32
    return %c0_i32, %c0_i32_0 : i32, i32
  }
  func.func @transform_6(%arg0: i32) -> (i32, i32) {
    %c0_i32 = arith.constant 0 : i32
    %c0_i32_0 = arith.constant 0 : i32
    %c0_i32_1 = arith.constant 0 : i32
    return %c0_i32, %c0_i32_0 : i32, i32
  }
  func.func @transform_7(%arg0: i32) -> (i32, i32, i32, i32) {
    %c0_i32 = arith.constant 0 : i32
    %c0_i32_0 = arith.constant 0 : i32
    %c0_i32_1 = arith.constant 0 : i32
    %c0_i32_2 = arith.constant 0 : i32
    return %arg0, %c0_i32, %c0_i32_0, %c0_i32_1 : i32, i32, i32, i32
  }
}

</mosaic_0001>

<bundles_post_ra>
// kernel: basic_block_forward.1
= control target key start
LH: loop header
LB: loop body
LE: loop exit
PB: predicated region body
PF: predicated region fallthrough
CT: control target
= control target key end

     0   :  { %s4985_s24 = smov 0   ;;  %s7887_s0 = inlined_call_operand.vmem [shape: f32[2,16,16,128], index: 0, kind: input, shape index: {}]   ;;  %s7888_s1 = inlined_call_operand.vmem [shape: f32[1152,128], index: 1, kind: input, shape index: {}]   ;;  %s7889_s2 = inlined_call_operand.vmem [shape: f32[1,128], index: 2, kind: input, shape index: {}]   ;;  %s7890_s3 = inlined_call_operand.vmem [shape: f32[1,128], index: 3, kind: input, shape index: {}]   ;;  %s7891_s4 = inlined_call_operand.vmem [shape: f32[1152,128], index: 4, kind: input, shape index: {}]   ;;  %s7892_s5 = inlined_call_operand.vmem [shape: f32[1,128], index: 5, kind: input, shape index: {}]   ;;  %s7893_s6 = inlined_call_operand.vmem [shape: f32[1,128], index: 6, kind: input, shape index: {}]   ;;  %s7894_s7 = inlined_call_operand.vmem [shape: f32[2,16,16,128], index: 7, kind: output, shape index: {}]  }
   0x1 LB: > { %s4842_s25 = sadd.s32 4294967295, %s4942_s24   ;;  %p4846_p0 = scmp.ge.s32.totalorder %s4942_s24, 1  ;;  %s4942_s24 = sphi %s4985_s24, %s17_s24  }
   0x2   : > { %p237_p1 = scmp.lt.s32.totalorder %s4942_s24, 3 }
   0x4   : > { %p238_p2 = pnand %p4846_p0, %p237_p1 }
   0x6   : > { %241 = sbr.rel (%p238_p2) target bundleno = 1514 (0x5ea), region = 48 }
   0xb   : > { %v1310_v0 = vld [vmem:[%s7888_s1 + $0x78] sm:$0xff]  ;;  %v1309_v2 = vld [vmem:[%s7888_s1 + $0x70] sm:$0xff]  ;;  %v4944_v4 = vmov 0.0   ;;  %v1308_v5 = vld [vmem:[%s7888_s1 + $0x68] sm:$0xff]  ;;  %p5076_p3 = scmp.lt.s32.totalorder %s4842_s25, 1 }
   0xc   : > { %v1326_v1 = vld [vmem:[%s7888_s1 + $0xf8] sm:$0xff]  ;;  %1439 = vmatpush.msra.mxu0 %v1310_v0  ;;  %4855 = vmatpush.msra.mxu2 %v1310_v0  ;;  %v1325_v3 = vld [vmem:[%s7888_s1 + $0xf0] sm:$0xff]  ;;  %279 = vst [vmem:[#allocation2] sm:$0xff] %v4944_v4  ;;  %v1324_v6 = vld [vmem:[%s7888_s1 + $0xe8] sm:$0xff] }
   0xd   : > { %4871 = vmatpush.msra.mxu3 %v1326_v1  ;;  %1552 = vmatpush.msra.mxu1 %v1326_v1  ;;  %286 = vst [vmem:[#allocation2] sm:$0x1] %v4944_v4  ;;  %v1307_v7 = vld [vmem:[%s7888_s1 + $0x60] sm:$0xff]  ;;  %v1306_v9 = vld [vmem:[%s7888_s1 + $0x58] sm:$0xff]  ;;  %v1305_v11 = vld [vmem:[%s7888_s1 + $0x50] sm:$0xff]  ;;  %s8075_s25 = smov (!%p5076_p3, %s4842_s25), 1 }
   0xe   : > { %1440 = vmatpush.msra.mxu0 %v1309_v2  ;;  %4856 = vmatpush.msra.mxu2 %v1309_v2  ;;  %280 = vst [vmem:[#allocation2 + $0x8] sm:$0xff] %v4944_v4  ;;  %v1323_v8 = vld [vmem:[%s7888_s1 + $0xe0] sm:$0xff]  ;;  %v1322_v10 = vld [vmem:[%s7888_s1 + $0xd8] sm:$0xff]  ;;  %v1321_v12 = vld [vmem:[%s7888_s1 + $0xd0] sm:$0xff]  ;;  %s4853_s20 = sshll.u32 %s8075_s25, 8 }
   0xf   : > { %4872 = vmatpush.msra.mxu3 %v1325_v3  ;;  %1553 = vmatpush.msra.mxu1 %v1325_v3  ;;  %281 = vst [vmem:[#allocation2 + $0x10] sm:$0x3] %v4944_v4  ;;  %v1304_v13 = vld [vmem:[%s7888_s1 + $0x48] sm:$0xff]  ;;  %v1303_v15 = vld [vmem:[%s7888_s1 + $0x40] sm:$0xff]  ;;  %v1302_v17 = vld [vmem:[%s7888_s1 + $0x38] sm:$0xff]  ;;  %s5136_s8 = scalar_lea.vmem %s7887_s0, %s4853_s20  ;;  %s7644_s29 = scalar_lea.vmem %s7894_s7, %s4853_s20 }
  0x10   : > { %1441 = vmatpush.msra.mxu0 %v1308_v5  ;;  %4857 = vmatpush.msra.mxu2 %v1308_v5  ;;  %283 = vst [vmem:[#allocation2 + $0x198] sm:$0xff] %v4944_v4  ;;  %v1320_v14 = vld [vmem:[%s7888_s1 + $0xc8] sm:$0xff]  ;;  %v1319_v16 = vld [vmem:[%s7888_s1 + $0xc0] sm:$0xff]  ;;  %v1318_v18 = vld [vmem:[%s7888_s1 + $0xb8] sm:$0xff] }
  0x11   : > { %4873 = vmatpush.msra.mxu3 %v1324_v6  ;;  %1554 = vmatpush.msra.mxu1 %v1324_v6  ;;  %284 = vst [vmem:[#allocation2 + $0x1a0] sm:$0xff] %v4944_v4  ;;  %v1301_v19 = vld [vmem:[%s7888_s1 + $0x30] sm:$0xff]  ;;  %v1300_v21 = vld [vmem:[%s7888_s1 + $0x28] sm:$0xff]  ;;  %v1299_v23 = vld [vmem:[%s7888_s1 + $0x20] sm:$0xff] }
  0x12   : > { %1442 = vmatpush.msra.mxu0 %v1307_v7  ;;  %4858 = vmatpush.msra.mxu2 %v1307_v7  ;;  %285 = vst [vmem:[#allocation2 + $0x1a8] sm:$0x3] %v4944_v4  ;;  %v1317_v20 = vld [vmem:[%s7888_s1 + $0xb0] sm:$0xff]  ;;  %v1316_v22 = vld [vmem:[%s7888_s1 + $0xa8] sm:$0xff]  ;;  %v1315_v24 = vld [vmem:[%s7888_s1 + $0xa0] sm:$0xff] }
  0x13   : > { %4874 = vmatpush.msra.mxu3 %v1323_v8  ;;  %1555 = vmatpush.msra.mxu1 %v1323_v8  ;;  %287 = vst [vmem:[#allocation2 + $0x18] sm:$0x1] %v4944_v4  ;;  %v1298_v25 = vld [vmem:[%s7888_s1 + $0x18] sm:$0xff]  ;;  %v1297_v27 = vld [vmem:[%s7888_s1 + $0x10] sm:$0xff]  ;;  %v1296_v29 = vld [vmem:[%s7888_s1 + $0x8] sm:$0xff] }
  0x14   : > { %1443 = vmatpush.msra.mxu0 %v1306_v9  ;;  %4859 = vmatpush.msra.mxu2 %v1306_v9  ;;  %288 = vst [vmem:[#allocation2 + $0x30] sm:$0x1] %v4944_v4  ;;  %v1314_v26 = vld [vmem:[%s7888_s1 + $0x98] sm:$0xff]  ;;  %v1313_v28 = vld [vmem:[%s7888_s1 + $0x90] sm:$0xff]  ;;  %v1312_v30 = vld [vmem:[%s7888_s1 + $0x88] sm:$0xff] }
  0x15   : > { %4875 = vmatpush.msra.mxu3 %v1322_v10  ;;  %1556 = vmatpush.msra.mxu1 %v1322_v10  ;;  %289 = vst [vmem:[#allocation2 + $0x48] sm:$0x1] %v4944_v4  ;;  %v1295_v31 = vld [vmem:[%s7888_s1] sm:$0xff]  ;;  %v5142_v34 = vld [vmem:[%s5136_s8 + $0x70] sm:$0xff]  ;;  %v5168_v35 = vld [vmem:[%s5136_s8 + $0x78] sm:$0xff] }
  0x16   : > { %1444 = vmatpush.msra.mxu0 %v1305_v11  ;;  %4860 = vmatpush.msra.mxu2 %v1305_v11  ;;  %290 = vst [vmem:[#allocation2 + $0x60] sm:$0x1] %v4944_v4  ;;  %v1311_v32 = vld [vmem:[%s7888_s1 + $0x80] sm:$0xff]  ;;  %v1342_v36 = vld [vmem:[%s7888_s1 + $0x178] sm:$0xff]  ;;  %v1341_v39 = vld [vmem:[%s7888_s1 + $0x170] sm:$0xff] }
  0x17   : > { %4876 = vmatpush.msra.mxu3 %v1321_v12  ;;  %1557 = vmatpush.msra.mxu1 %v1321_v12  ;;  %291 = vst [vmem:[#allocation2 + $0x78] sm:$0x1] %v4944_v4  ;;  %v430_v33 = vld [vmem:[#allocation2] sm:$0xff]  ;;  %v1358_v37 = vld [vmem:[%s7888_s1 + $0x1f8] sm:$0xff]  ;;  %v1357_v41 = vld [vmem:[%s7888_s1 + $0x1f0] sm:$0xff] }
  0x18   : > { %1445 = vmatpush.msra.mxu0 %v1304_v13  ;;  %4861 = vmatpush.msra.mxu2 %v1304_v13  ;;  %292 = vst [vmem:[#allocation2 + $0x90] sm:$0x1] %v4944_v4  ;;  %v5186_v38 = vld [vmem:[%s5136_s8 + $0x80] sm:$0xff]  ;;  %v1374_v42 = vld [vmem:[%s7888_s1 + $0x278] sm:$0xff]  ;;  %v382_v43 = vld [vmem:[%s5136_s8 + $0x88] sm:$0xff] }
  0x19   : > { %4877 = vmatpush.msra.mxu3 %v1320_v14  ;;  %1558 = vmatpush.msra.mxu1 %v1320_v14  ;;  %293 = vst [vmem:[#allocation2 + $0xa8] sm:$0x1] %v4944_v4  ;;  %v494_v40 = vld [vmem:[#allocation2 + $0x1] sm:$0xff]  ;;  %v495_v45 = vld [vmem:[#allocation2 + $0x9] sm:$0xff]  ;;  %v384_v55 = vld [vmem:[%s5136_s8 + $0x98] sm:$0xff] }
  0x1a   : > { %1446 = vmatpush.msra.mxu0 %v1303_v15  ;;  %4862 = vmatpush.msra.mxu2 %v1303_v15  ;;  %294 = vst [vmem:[#allocation2 + $0xc0] sm:$0x1] %v4944_v4  ;;  %v1340_v44 = vld [vmem:[%s7888_s1 + $0x168] sm:$0xff]  ;;  %v1373_v47 = vld [vmem:[%s7888_s1 + $0x270] sm:$0xff]  ;;  %v5225_v48 = vld [vmem:[%s5136_s8] sm:$0xff] }
  0x1b   : > { %4878 = vmatpush.msra.mxu3 %v1319_v16  ;;  %1559 = vmatpush.msra.mxu1 %v1319_v16  ;;  %295 = vst [vmem:[#allocation2 + $0xd8] sm:$0x1] %v4944_v4  ;;  %v1356_v46 = vld [vmem:[%s7888_s1 + $0x1e8] sm:$0xff]  ;;  %v383_v49 = vld [vmem:[%s5136_s8 + $0x90] sm:$0xff]  ;;  %v1339_v50 = vld [vmem:[%s7888_s1 + $0x160] sm:$0xff] }
  0x1c   : > { %1447 = vmatpush.msra.mxu0 %v1302_v17  ;;  %4863 = vmatpush.msra.mxu2 %v1302_v17  ;;  %296 = vst [vmem:[#allocation2 + $0xf0] sm:$0x1] %v4944_v4  ;;  %v1355_v51 = vld [vmem:[%s7888_s1 + $0x1e0] sm:$0xff]  ;;  %v1372_v52 = vld [vmem:[%s7888_s1 + $0x268] sm:$0xff]  ;;  %v1338_v56 = vld [vmem:[%s7888_s1 + $0x158] sm:$0xff] }
  0x1d   : > { %4879 = vmatpush.msra.mxu3 %v1318_v18  ;;  %1560 = vmatpush.msra.mxu1 %v1318_v18  ;;  %297 = vst [vmem:[#allocation2 + $0x108] sm:$0x1] %v4944_v4  ;;  %v5247_v54 = vld [vmem:[%s5136_s8 + $0x8] sm:$0xff]  ;;  %v1354_v57 = vld [vmem:[%s7888_s1 + $0x1d8] sm:$0xff]  ;;  %v1371_v58 = vld [vmem:[%s7888_s1 + $0x260] sm:$0xff] }
  0x1e   : > { %1448 = vmatpush.msra.mxu0 %v1301_v19  ;;  %4864 = vmatpush.msra.mxu2 %v1301_v19  ;;  %298 = vst [vmem:[#allocation2 + $0x120] sm:$0x1] %v4944_v4  ;;  %v5264_v59 = vld [vmem:[%s5136_s8 + $0x10] sm:$0xff]  ;;  %v5268_v60 = vld [vmem:[%s5136_s8 + $0x18] sm:$0xff]  ;;  %v5273_v62 = vld [vmem:[%s5136_s8 + $0x20] sm:$0xff] }
  0x1f   : > { %4880 = vmatpush.msra.mxu3 %v1317_v20  ;;  %1561 = vmatpush.msra.mxu1 %v1317_v20  ;;  %299 = vst [vmem:[#allocation2 + $0x138] sm:$0x1] %v4944_v4  ;;  %v385_v63 = vld [vmem:[%s5136_s8 + $0xa0] sm:$0xff]  ;;  %v1337_v1 = vld [vmem:[%s7888_s1 + $0x150] sm:$0xff]  ;;  %v1370_v3 = vld [vmem:[%s7888_s1 + $0x258] sm:$0xff] }
  0x20   : > { %1449 = vmatpush.msra.mxu0 %v1300_v21  ;;  %4865 = vmatpush.msra.mxu2 %v1300_v21  ;;  %300 = vst [vmem:[#allocation2 + $0x150] sm:$0x1] %v4944_v4  ;;  %v1353_v2 = vld [vmem:[%s7888_s1 + $0x1d0] sm:$0xff]  ;;  %v5293_v6 = vld [vmem:[%s5136_s8 + $0x28] sm:$0xff]  ;;  %v1335_v15 = vld [vmem:[%s7888_s1 + $0x140] sm:$0xff] }
  0x21   : > { %4881 = vmatpush.msra.mxu3 %v1316_v22  ;;  %1562 = vmatpush.msra.mxu1 %v1316_v22  ;;  %301 = vst [vmem:[#allocation2 + $0x168] sm:$0x1] %v4944_v4  ;;  %v386_v7 = vld [vmem:[%s5136_s8 + $0xa8] sm:$0xff]  ;;  %v1369_v10 = vld [vmem:[%s7888_s1 + $0x250] sm:$0xff]  ;;  %v1351_v16 = vld [vmem:[%s7888_s1 + $0x1c0] sm:$0xff] }
  0x22   : > { %1450 = vmatpush.msra.mxu0 %v1299_v23  ;;  %4866 = vmatpush.msra.mxu2 %v1299_v23  ;;  %302 = vst [vmem:[#allocation2 + $0x180] sm:$0x1] %v4944_v4  ;;  %v1336_v8 = vld [vmem:[%s7888_s1 + $0x148] sm:$0xff]  ;;  %v5311_v13 = vld [vmem:[%s5136_s8 + $0x30] sm:$0xff]  ;;  %v5329_v20 = vld [vmem:[%s5136_s8 + $0x38] sm:$0xff] }
  0x23   : > { %4882 = vmatpush.msra.mxu3 %v1315_v24  ;;  %305 = vst [vmem:[#allocation2 + $0x29] sm:$0x1] %v4944_v4  ;;  %1563 = vmatpush.msra.mxu1 %v1315_v24  ;;  %v1352_v9 = vld [vmem:[%s7888_s1 + $0x1c8] sm:$0xff]  ;;  %v387_v14 = vld [vmem:[%s5136_s8 + $0xb0] sm:$0xff]  ;;  %v388_v21 = vld [vmem:[%s5136_s8 + $0xb8] sm:$0xff] }
  0x24   : > { %1451 = vmatpush.msra.mxu0 %v1298_v25  ;;  %4867 = vmatpush.msra.mxu2 %v1298_v25  ;;  %306 = vst [vmem:[#allocation2 + $0x41] sm:$0x1] %v4944_v4  ;;  %v1368_v17 = vld [vmem:[%s7888_s1 + $0x248] sm:$0xff]  ;;  %v1334_v22 = vld [vmem:[%s7888_s1 + $0x138] sm:$0xff]  ;;  %v1367_v24 = vld [vmem:[%s7888_s1 + $0x240] sm:$0xff] }
  0x25   : > { %4883 = vmatpush.msra.mxu3 %v1314_v26  ;;  %307 = vst [vmem:[#allocation2 + $0x59] sm:$0x1] %v4944_v4  ;;  %1564 = vmatpush.msra.mxu1 %v1314_v26  ;;  %v1350_v23 = vld [vmem:[%s7888_s1 + $0x1b8] sm:$0xff] }
  0x26   : > { %1452 = vmatpush.msra.mxu0 %v1297_v27  ;;  %4868 = vmatpush.msra.mxu2 %v1297_v27  ;;  %308 = vst [vmem:[#allocation2 + $0x71] sm:$0x1] %v4944_v4  ;;  %v5347_v27 = vld [vmem:[%s5136_s8 + $0x40] sm:$0xff] }
  0x27   : > { %4884 = vmatpush.msra.mxu3 %v1313_v28  ;;  %309 = vst [vmem:[#allocation2 + $0x89] sm:$0x1] %v4944_v4  ;;  %1565 = vmatpush.msra.mxu1 %v1313_v28  ;;  %v389_v28 = vld [vmem:[%s5136_s8 + $0xc0] sm:$0xff] }
  0x28   : > { %1453 = vmatpush.msra.mxu0 %v1296_v29  ;;  %4869 = vmatpush.msra.mxu2 %v1296_v29  ;;  %310 = vst [vmem:[#allocation2 + $0xa1] sm:$0x1] %v4944_v4  ;;  %v1333_v29 = vld [vmem:[%s7888_s1 + $0x130] sm:$0xff] }
  0x29   : > { %4885 = vmatpush.msra.mxu3 %v1312_v30  ;;  %311 = vst [vmem:[#allocation2 + $0xb9] sm:$0x1] %v4944_v4  ;;  %1566 = vmatpush.msra.mxu1 %v1312_v30  ;;  %v1349_v30 = vld [vmem:[%s7888_s1 + $0x1b0] sm:$0xff] }
  0x2a   : > { %1454 = vmatpush.msra.mxu0 %v1295_v31  ;;  %4870 = vmatpush.msra.mxu2 %v1295_v31  ;;  %312 = vst [vmem:[#allocation2 + $0xd1] sm:$0x1] %v4944_v4  ;;  %v1366_v31 = vld [vmem:[%s7888_s1 + $0x238] sm:$0xff] }
  0x2b   : > { %4886 = vmatpush.msra.mxu3 %v1311_v32  ;;  %1455 = vmatmul.f32.vlgmr.msra.gmra.mxu0 %v430_v33  ;;  %313 = vst [vmem:[#allocation2 + $0xe9] sm:$0x1] %v4944_v4 }
  0x2c   : > { %314 = vst [vmem:[#allocation2 + $0x101] sm:$0x1] %v4944_v4  ;;  %1616 = vmatmul.f32.vlgmr.msra.gmra.mxu3 %v5142_v34  ;;  %1567 = vmatpush.msra.mxu1 %v1311_v32 }
  0x2d   : > { %315 = vst [vmem:[#allocation2 + $0x119] sm:$0x1] %v4944_v4  ;;  %1665 = vmatpush.msrb.mxu2 %v1342_v36  ;;  %1778 = vmatpush.msrb.mxu3 %v1358_v37  ;;  %v1332_v36 = vld [vmem:[%s7888_s1 + $0x128] sm:$0xff] }
  0x2e   : > { %316 = vst [vmem:[#allocation2 + $0x131] sm:$0x1] %v4944_v4  ;;  %1568 = vmatmul.f32.vlgmr.msra.gmra.mxu1 %v494_v40  ;;  %1891 = vmatpush.msrb.mxu0 %v1374_v42  ;;  %v1348_v37 = vld [vmem:[%s7888_s1 + $0x1a8] sm:$0xff]  ;;  %v391_v42 = vld [vmem:[%s5136_s8 + $0xd0] sm:$0xff] }
  0x2f   : > { %317 = vst [vmem:[#allocation2 + $0x149] sm:$0x1] %v4944_v4  ;;  %1666 = vmatpush.msrb.mxu2 %v1341_v39  ;;  %1779 = vmatpush.msrb.mxu3 %v1357_v41  ;;  %v5383_v41 = vld [vmem:[%s5136_s8 + $0x50] sm:$0xff] }
  0x30   : > { %318 = vst [vmem:[#allocation2 + $0x161] sm:$0x1] %v4944_v4  ;;  %1892 = vmatpush.msrb.mxu0 %v1373_v47 }
  0x31   : > { %319 = vst [vmem:[#allocation2 + $0x179] sm:$0x1] %v4944_v4  ;;  %1667 = vmatpush.msrb.mxu2 %v1340_v44  ;;  %1780 = vmatpush.msrb.mxu3 %v1356_v46  ;;  %v1347_v44 = vld [vmem:[%s7888_s1 + $0x1a0] sm:$0xff] }
  0x32   : > { %320 = vst [vmem:[#allocation2 + $0x191] sm:$0x1] %v4944_v4  ;;  %1893 = vmatpush.msrb.mxu0 %v1372_v52  ;;  %v1346_v52 = vld [vmem:[%s7888_s1 + $0x198] sm:$0xff] }
  0x33   : > { %322 = vst [vmem:[#allocation3] sm:$0xff] %v4944_v4  ;;  %1458 = vmatmul.f32.gmra.mxu0 %v4944_v4  ;;  %1668 = vmatpush.msrb.mxu2 %v1339_v50  ;;  %v392_v50 = vld [vmem:[%s5136_s8 + $0xd8] sm:$0xff] }
  0x34   : > { %323 = vst [vmem:[#allocation3 + $0x8] sm:$0xff] %v4944_v4  ;;  %1619 = vmatmul.f32.gmra.mxu3 %v5168_v35  ;;  %1894 = vmatpush.msrb.mxu0 %v1371_v58  ;;  %v393_v58 = vld [vmem:[%s5136_s8 + $0xe0] sm:$0xff] }
  0x35   : > { %324 = vst [vmem:[#allocation3 + $0x10] sm:$0x3] %v4944_v4  ;;  %1781 = vmatpush.msrb.mxu3 %v1355_v51  ;;  %1669 = vmatpush.msrb.mxu2 %v1338_v56  ;;  %v1330_v51 = vld [vmem:[%s7888_s1 + $0x118] sm:$0xff] }
  0x36   : > { %326 = vst [vmem:[#allocation3 + $0x198] sm:$0xff] %v4944_v4  ;;  %1571 = vmatmul.f32.gmra.mxu1 %v495_v45  ;;  %1895 = vmatpush.msrb.mxu0 %v1370_v3  ;;  %v1364_v45 = vld [vmem:[%s7888_s1 + $0x228] sm:$0xff]  ;;  %v1389_v3 = vld [vmem:[%s7888_s1 + $0x2f0] sm:$0xff] }
  0x37   : > { %327 = vst [vmem:[#allocation3 + $0x1a0] sm:$0xff] %v4944_v4  ;;  %1782 = vmatpush.msrb.mxu3 %v1354_v57  ;;  %1670 = vmatpush.msrb.mxu2 %v1337_v1  ;;  %v5419_v57 = vld [vmem:[%s5136_s8 + $0x60] sm:$0xff]  ;;  %v1362_v1 = vld [vmem:[%s7888_s1 + $0x218] sm:$0xff] }
  0x38   : > { %328 = vst [vmem:[#allocation3 + $0x1a8] sm:$0x3] %v4944_v4  ;;  %1896 = vmatpush.msrb.mxu0 %v1369_v10  ;;  %v1328_v10 = vld [vmem:[%s7888_s1 + $0x108] sm:$0xff] }
  0x39   : > { %330 = vst [vmem:[#allocation3 + $0x18] sm:$0x1] %v4944_v4  ;;  %1783 = vmatpush.msrb.mxu3 %v1353_v2  ;;  %1671 = vmatpush.msrb.mxu2 %v1336_v8  ;;  %v1390_v2 = vld [vmem:[%s7888_s1 + $0x2f8] sm:$0xff]  ;;  %v5443_v8 = vld [vmem:[%s5136_s8 + $0x68] sm:$0xff] }
  0x3a   : > { %331 = vst [vmem:[#allocation3 + $0x30] sm:$0x1] %v4944_v4  ;;  %1897 = vmatpush.msrb.mxu0 %v1368_v17  ;;  %2004 = vmatpush.msrb.mxu1 %v1390_v2  ;;  %v1386_v17 = vld [vmem:[%s7888_s1 + $0x2d8] sm:$0xff]  ;;  %v1421_v2 = vld [vmem:[%s7888_s1 + $0x3f0] sm:$0xff] }
  0x3b   : > { %332 = vst [vmem:[#allocation3 + $0x48] sm:$0x1] %v4944_v4  ;;  %1784 = vmatpush.msrb.mxu3 %v1352_v9  ;;  %1672 = vmatpush.msrb.mxu2 %v1335_v15  ;;  %v394_v9 = vld [vmem:[%s5136_s8 + $0xe8] sm:$0xff]  ;;  %v1361_v15 = vld [vmem:[%s7888_s1 + $0x210] sm:$0xff] }
  0x3c   : > { %333 = vst [vmem:[#allocation3 + $0x60] sm:$0x1] %v4944_v4  ;;  %1622 = vmatmul.f32.gmra.mxu3 %v5186_v38  ;;  %1898 = vmatpush.msrb.mxu0 %v1367_v24  ;;  %v1384_v24 = vld [vmem:[%s7888_s1 + $0x2c8] sm:$0xff] }
  0x3d   : > { %334 = vst [vmem:[#allocation3 + $0x78] sm:$0x1] %v4944_v4  ;;  %1785 = vmatpush.msrb.mxu3 %v1351_v16  ;;  %1673 = vmatpush.msrb.mxu2 %v1334_v22  ;;  %v1387_v16 = vld [vmem:[%s7888_s1 + $0x2e0] sm:$0xff] }
  0x3e   : > { %335 = vst [vmem:[#allocation3 + $0x90] sm:$0x1] %v4944_v4  ;;  %1574 = vmatmul.f32.gmra.mxu1 %v5225_v48  ;;  %1899 = vmatpush.msrb.mxu0 %v1366_v31  ;;  %v1382_v31 = vld [vmem:[%s7888_s1 + $0x2b8] sm:$0xff] }
  0x3f   : > { %336 = vst [vmem:[#allocation3 + $0xa8] sm:$0x1] %v4944_v4  ;;  %1786 = vmatpush.msrb.mxu3 %v1350_v23  ;;  %1674 = vmatpush.msrb.mxu2 %v1333_v29  ;;  %v1327_v23 = vld [vmem:[%s7888_s1 + $0x100] sm:$0xff] }
  0x40   : > { %337 = vst [vmem:[#allocation3 + $0xc0] sm:$0x1] %v4944_v4  ;;  %2005 = vmatpush.msrb.mxu1 %v1389_v3  ;;  %v1383_v29 = vld [vmem:[%s7888_s1 + $0x2c0] sm:$0xff] }
  0x41   : > { %338 = vst [vmem:[#allocation3 + $0xd8] sm:$0x1] %v4944_v4  ;;  %1787 = vmatpush.msrb.mxu3 %v1349_v30  ;;  %1675 = vmatpush.msrb.mxu2 %v1332_v36  ;;  %v1359_v30 = vld [vmem:[%s7888_s1 + $0x200] sm:$0xff] }
  0x42   : > { %339 = vst [vmem:[#allocation3 + $0xf0] sm:$0x1] %v4944_v4 }
  0x43   : > { %340 = vst [vmem:[#allocation3 + $0x108] sm:$0x1] %v4944_v4  ;;  %1788 = vmatpush.msrb.mxu3 %v1348_v37  ;;  %v1406_v37 = vld [vmem:[%s7888_s1 + $0x378] sm:$0xff] }
  0x44   : > { %341 = vst [vmem:[#allocation3 + $0x120] sm:$0x1] %v4944_v4  ;;  %1625 = vmatmul.f32.gmra.mxu3 %v382_v43 }
  0x45   : > { %342 = vst [vmem:[#allocation3 + $0x138] sm:$0x1] %v4944_v4  ;;  %1789 = vmatpush.msrb.mxu3 %v1347_v44 }
  0x46   : > { %343 = vst [vmem:[#allocation3 + $0x150] sm:$0x1] %v4944_v4  ;;  %1577 = vmatmul.f32.gmra.mxu1 %v5247_v54 }
  0x47   : > { %344 = vst [vmem:[#allocation3 + $0x168] sm:$0x1] %v4944_v4  ;;  %1790 = vmatpush.msrb.mxu3 %v1346_v52  ;;  %v1375_v52 = vld [vmem:[%s7888_s1 + $0x280] sm:$0xff] }
  0x48   : > { %345 = vst [vmem:[#allocation3 + $0x180] sm:$0x1] %v4944_v4 }
  0x49   : > { %348 = vst [vmem:[#allocation3 + $0x29] sm:$0x1] %v4944_v4 }
  0x4a   : > { %349 = vst [vmem:[#allocation3 + $0x41] sm:$0x1] %v4944_v4 }
  0x4b   : > { %350 = vst [vmem:[#allocation3 + $0x59] sm:$0x1] %v4944_v4 }
  0x4c   : > { %351 = vst [vmem:[#allocation3 + $0x71] sm:$0x1] %v4944_v4  ;;  %1628 = vmatmul.f32.gmra.mxu3 %v383_v49 }
  0x4d   : > { %352 = vst [vmem:[#allocation3 + $0x89] sm:$0x1] %v4944_v4 }
  0x4e   : > { %353 = vst [vmem:[#allocation3 + $0xa1] sm:$0x1] %v4944_v4  ;;  %1580 = vmatmul.f32.gmra.mxu1 %v5264_v59 }
  0x4f   : > { %354 = vst [vmem:[#allocation3 + $0xb9] sm:$0x1] %v4944_v4 }
  0x50   : > { %355 = vst [vmem:[#allocation3 + $0xd1] sm:$0x1] %v4944_v4 }
  0x51   : > { %356 = vst [vmem:[#allocation3 + $0xe9] sm:$0x1] %v4944_v4 }
  0x52   : > { %357 = vst [vmem:[#allocation3 + $0x101] sm:$0x1] %v4944_v4 }
  0x53   : > { %358 = vst [vmem:[#allocation3 + $0x119] sm:$0x1] %v4944_v4 }
  0x54   : > { %359 = vst [vmem:[#allocation3 + $0x131] sm:$0x1] %v4944_v4  ;;  %1631 = vmatmul.f32.gmra.mxu3 %v384_v55 }
  0x55   : > { %360 = vst [vmem:[#allocation3 + $0x149] sm:$0x1] %v4944_v4 }
  0x56   : > { %361 = vst [vmem:[#allocation3 + $0x161] sm:$0x1] %v4944_v4  ;;  %1583 = vmatmul.f32.gmra.mxu1 %v5268_v60 }
  0x57   : > { %362 = vst [vmem:[#allocation3 + $0x179] sm:$0x1] %v4944_v4 }
  0x58   : > { %363 = vst [vmem:[#allocation3 + $0x191] sm:$0x1] %v4944_v4 }
  0x59   : > { %412 = vst [vmem:[#allocation2 + $0xc1] sm:$0xff] %v5142_v34  ;;  %v5365_v34 = vld [vmem:[%s5136_s8 + $0x48] sm:$0xff] }
  0x5a   : > { %303 = vst [vmem:[#allocation2 + $0x198] sm:$0x1] %v4944_v4 }
  0x5b   : > { %304 = vst [vmem:[#allocation2 + $0x11] sm:$0x1] %v4944_v4 }
  0x5c   : > { %321 = vst [vmem:[#allocation2 + $0x1a9] sm:$0x1] %v4944_v4  ;;  %1634 = vmatmul.f32.gmra.mxu3 %v385_v63 }
  0x5d   : > { %329 = vst [vmem:[#allocation3] sm:$0x1] %v4944_v4 }
  0x5e   : > { %346 = vst [vmem:[#allocation3 + $0x198] sm:$0x1] %v4944_v4  ;;  %1586 = vmatmul.f32.gmra.mxu1 %v5273_v62 }
  0x5f   : > { %347 = vst [vmem:[#allocation3 + $0x11] sm:$0x1] %v4944_v4 }
  0x60   : > { %v446_v53 = vld [vmem:[#allocation2 + $0xc0] sm:$0xff]  ;;  %364 = vst [vmem:[#allocation3 + $0x1a9] sm:$0x1] %v4944_v4 }
  0x61   : > { %1503 = vmatmul.f32.vlgmr.msra.gmra.mxu2 %v446_v53  ;;  %413 = vst [vmem:[#allocation2 + $0xc9] sm:$0xff] %v5168_v35  ;;  %v390_v35 = vld [vmem:[%s5136_s8 + $0xc8] sm:$0xff]  ;;  %v1363_v53 = vld [vmem:[%s7888_s1 + $0x220] sm:$0xff] }
  0x62   : > { %398 = vst [vmem:[#allocation2 + $0x19] sm:$0xff] %v5225_v48 }
  0x63   : > { %414 = vst [vmem:[#allocation2 + $0xd9] sm:$0xff] %v5186_v38  ;;  %v1365_v38 = vld [vmem:[%s7888_s1 + $0x230] sm:$0xff] }
  0x64   : > { %399 = vst [vmem:[#allocation2 + $0x21] sm:$0xff] %v5247_v54  ;;  %1637 = vmatmul.f32.gmra.mxu3 %v386_v7  ;;  %1900 = vmatpush.msrb.mxu0 %v1365_v38  ;;  %v1380_v38 = vld [vmem:[%s7888_s1 + $0x2a8] sm:$0xff] }
  0x65   : > { %415 = vst [vmem:[#allocation2 + $0xe1] sm:$0xff] %v382_v43  ;;  %v1331_v43 = vld [vmem:[%s7888_s1 + $0x120] sm:$0xff] }
  0x66   : > { %400 = vst [vmem:[#allocation2 + $0x31] sm:$0xff] %v5264_v59  ;;  %1589 = vmatmul.f32.gmra.mxu1 %v5293_v6  ;;  %1676 = vmatpush.msrb.mxu2 %v1331_v43  ;;  %v1378_v43 = vld [vmem:[%s7888_s1 + $0x298] sm:$0xff] }
  0x67   : > { %416 = vst [vmem:[#allocation2 + $0xf1] sm:$0xff] %v383_v49  ;;  %1901 = vmatpush.msrb.mxu0 %v1364_v45  ;;  %v5401_v49 = vld [vmem:[%s5136_s8 + $0x58] sm:$0xff]  ;;  %v1377_v45 = vld [vmem:[%s7888_s1 + $0x290] sm:$0xff] }
  0x68   : > { %v447_v61 = vld [vmem:[#allocation2 + $0xc8] sm:$0xff]  ;;  %401 = vst [vmem:[#allocation2 + $0x39] sm:$0xff] %v5268_v60  ;;  %1677 = vmatpush.msrb.mxu2 %v1330_v51 }
  0x69   : > { %1506 = vmatmul.f32.gmra.mxu2 %v447_v61  ;;  %v5276_v0 = vld [vmem:[#allocation2 + $0x18] sm:$0xff]  ;;  %417 = vst [vmem:[#allocation2 + $0xf9] sm:$0xff] %v384_v55  ;;  %1902 = vmatpush.msrb.mxu0 %v1363_v53  ;;  %v1329_v61 = vld [vmem:[%s7888_s1 + $0x110] sm:$0xff]  ;;  %v1376_v51 = vld [vmem:[%s7888_s1 + $0x288] sm:$0xff] }
  0x6a   : > { %1461 = vmatmul.f32.gmra.mxu0 %v5276_v0  ;;  %402 = vst [vmem:[#allocation2 + $0x49] sm:$0xff] %v5273_v62  ;;  %v448_v4 = vld [vmem:[#allocation2 + $0xd8] sm:$0xff]  ;;  %1678 = vmatpush.msrb.mxu2 %v1329_v61 }
  0x6b   : > { %418 = vst [vmem:[#allocation2 + $0x109] sm:$0xff] %v385_v63  ;;  %v5290_v5 = vld [vmem:[#allocation2 + $0x20] sm:$0xff]  ;;  %v1345_v63 = vld [vmem:[%s7888_s1 + $0x190] sm:$0xff]  ;;  %1903 = vmatpush.msrb.mxu0 %v1362_v1 }
  0x6c   : > { %403 = vst [vmem:[#allocation2 + $0x51] sm:$0xff] %v5293_v6  ;;  %v449_v11 = vld [vmem:[#allocation2 + $0xe0] sm:$0xff]  ;;  %1640 = vmatmul.f32.gmra.mxu3 %v387_v14  ;;  %1679 = vmatpush.msrb.mxu2 %v1328_v10  ;;  %v1405_v1 = vld [vmem:[%s7888_s1 + $0x370] sm:$0xff] }
  0x6d   : > { %419 = vst [vmem:[#allocation2 + $0x111] sm:$0xff] %v386_v7  ;;  %v5308_v12 = vld [vmem:[#allocation2 + $0x30] sm:$0xff]  ;;  %1791 = vmatpush.msrb.mxu3 %v1345_v63  ;;  %1904 = vmatpush.msrb.mxu0 %v1361_v15 }
  0x6e   : > { %404 = vst [vmem:[#allocation2 + $0x61] sm:$0xff] %v5311_v13  ;;  %v450_v18 = vld [vmem:[#allocation2 + $0xf0] sm:$0xff]  ;;  %1592 = vmatmul.f32.gmra.mxu1 %v5311_v13  ;;  %1680 = vmatpush.msrb.mxu2 %v1327_v23 }
  0x6f   : > { %420 = vst [vmem:[#allocation2 + $0x121] sm:$0xff] %v387_v14  ;;  %v5326_v19 = vld [vmem:[#allocation2 + $0x38] sm:$0xff]  ;;  %v1344_v14 = vld [vmem:[%s7888_s1 + $0x188] sm:$0xff] }
  0x70   : > { %405 = vst [vmem:[#allocation2 + $0x69] sm:$0xff] %v5329_v20  ;;  %v451_v25 = vld [vmem:[#allocation2 + $0xf8] sm:$0xff]  ;;  %1792 = vmatpush.msrb.mxu3 %v1344_v14  ;;  %2117 = vmatpush.msra.mxu2 %v1406_v37 }
  0x71   : > { %1509 = vmatmul.f32.gmra.mxu2 %v448_v4  ;;  %421 = vst [vmem:[#allocation2 + $0x129] sm:$0xff] %v388_v21  ;;  %v5344_v26 = vld [vmem:[#allocation2 + $0x48] sm:$0xff]  ;;  %v752_v15 = vld [vmem:[#allocation2 + $0x32] sm:$0xff] }
  0x72   : > { %1464 = vmatmul.f32.gmra.mxu0 %v5290_v5  ;;  %406 = vst [vmem:[#allocation2 + $0x79] sm:$0xff] %v5347_v27  ;;  %v452_v32 = vld [vmem:[#allocation2 + $0x108] sm:$0xff]  ;;  %2118 = vmatpush.msra.mxu2 %v1405_v1 }
  0x73   : > { %422 = vst [vmem:[#allocation2 + $0x139] sm:$0xff] %v389_v28  ;;  %v5362_v33 = vld [vmem:[#allocation2 + $0x50] sm:$0xff] }
  0x74   : > { %1643 = vmatmul.f32.gmra.mxu3 %v388_v21  ;;  %407 = vst [vmem:[#allocation2 + $0x81] sm:$0xff] %v5365_v34  ;;  %v453_v39 = vld [vmem:[#allocation2 + $0x110] sm:$0xff] }
  0x75   : > { %423 = vst [vmem:[#allocation2 + $0x141] sm:$0xff] %v390_v35  ;;  %v5380_v40 = vld [vmem:[#allocation2 + $0x60] sm:$0xff]  ;;  %v1385_v21 = vld [vmem:[%s7888_s1 + $0x2d0] sm:$0xff] }
  0x76   : > { %1595 = vmatmul.f32.gmra.mxu1 %v5329_v20  ;;  %408 = vst [vmem:[#allocation2 + $0x91] sm:$0xff] %v5383_v41  ;;  %v454_v46 = vld [vmem:[#allocation2 + $0x120] sm:$0xff] }
  0x77   : > { %424 = vst [vmem:[#allocation2 + $0x151] sm:$0xff] %v391_v42  ;;  %v5398_v47 = vld [vmem:[#allocation2 + $0x68] sm:$0xff] }
  0x78   : > { %409 = vst [vmem:[#allocation2 + $0x99] sm:$0xff] %v5401_v49  ;;  %v455_v55 = vld [vmem:[#allocation2 + $0x128] sm:$0xff] }
  0x79   : > { %1512 = vmatmul.f32.gmra.mxu2 %v449_v11  ;;  %425 = vst [vmem:[#allocation2 + $0x159] sm:$0xff] %v392_v50  ;;  %v5416_v56 = vld [vmem:[#allocation2 + $0x78] sm:$0xff]  ;;  %v1388_v11 = vld [vmem:[%s7888_s1 + $0x2e8] sm:$0xff] }
  0x7a   : > { %1467 = vmatmul.f32.gmra.mxu0 %v5308_v12  ;;  %410 = vst [vmem:[#allocation2 + $0xa9] sm:$0xff] %v5419_v57  ;;  %v456_v4 = vld [vmem:[#allocation2 + $0x138] sm:$0xff]  ;;  %2006 = vmatpush.msrb.mxu1 %v1388_v11  ;;  %v1437_v11 = vld [vmem:[%s7888_s1 + $0x470] sm:$0xff] }
  0x7b   : > { %426 = vst [vmem:[#allocation2 + $0x169] sm:$0xff] %v393_v58  ;;  %v5440_v7 = vld [vmem:[#allocation2 + $0x80] sm:$0xff]  ;;  %v757_v1 = vld [vmem:[#allocation2 + $0x6a] sm:$0xff] }
  0x7c   : > { %1646 = vmatmul.f32.gmra.mxu3 %v389_v28  ;;  %411 = vst [vmem:[#allocation2 + $0xb1] sm:$0xff] %v5443_v8  ;;  %2007 = vmatpush.msrb.mxu1 %v1387_v16  ;;  %v1360_v28 = vld [vmem:[%s7888_s1 + $0x208] sm:$0xff] }
  0x7d   : > { %427 = vst [vmem:[#allocation2 + $0x171] sm:$0xff] %v394_v9  ;;  %v5470_v22 = vld [vmem:[#allocation2 + $0x90] sm:$0xff]  ;;  %1905 = vmatpush.msrb.mxu0 %v1360_v28 }
  0x7e   : > { %1598 = vmatmul.f32.gmra.mxu1 %v5347_v27 }
  0x7f   : > { %2008 = vmatpush.msrb.mxu1 %v1386_v17  ;;  %1906 = vmatpush.msrb.mxu0 %v1359_v30  ;;  %v5499_v36 = vld [vmem:[#allocation2 + $0x98] sm:$0xff]  ;;  %v558_v17 = vld [vmem:[#allocation2 + $0x2] sm:$0xff] }
  0x80   : > { %v459_v44 = vld [vmem:[#allocation2 + $0x158] sm:$0xff] }
  0x81   : > { %1515 = vmatmul.f32.gmra.mxu2 %v450_v18  ;;  %v457_v18 = vld [vmem:[#allocation2 + $0x140] sm:$0xff]  ;;  %2009 = vmatpush.msrb.mxu1 %v1385_v21 }
  0x82   : > { %1470 = vmatmul.f32.gmra.mxu0 %v5326_v19 }
  0x83   : > { %2010 = vmatpush.msrb.mxu1 %v1384_v24  ;;  %v5537_v61 = vld [vmem:[#allocation2 + $0xb0] sm:$0xff] }
  0x84   : > { %1649 = vmatmul.f32.gmra.mxu3 %v390_v35  ;;  %v1381_v35 = vld [vmem:[%s7888_s1 + $0x2b0] sm:$0xff] }
  0x85   : > { %2011 = vmatpush.msrb.mxu1 %v1383_v29 }
  0x86   : > { %1601 = vmatmul.f32.gmra.mxu1 %v5365_v34 }
  0x87   : > { %2012 = vmatpush.msrb.mxu1 %v1382_v31 }
  0x89   : > { %1518 = vmatmul.f32.gmra.mxu2 %v451_v25  ;;  %v1343_v25 = vld [vmem:[%s7888_s1 + $0x180] sm:$0xff]  ;;  %2013 = vmatpush.msrb.mxu1 %v1381_v35 }
  0x8a   : > { %1473 = vmatmul.f32.gmra.mxu0 %v5344_v26  ;;  %1793 = vmatpush.msrb.mxu3 %v1343_v25  ;;  %v559_v25 = vld [vmem:[#allocation2 + $0xa] sm:$0xff] }
  0x8b   : > { %2014 = vmatpush.msrb.mxu1 %v1380_v38  ;;  %v1403_v38 = vld [vmem:[%s7888_s1 + $0x360] sm:$0xff] }
  0x8c   : > { %1652 = vmatmul.f32.gmra.mxu3 %v391_v42 }
  0x8e   : > { %1604 = vmatmul.f32.gmra.mxu1 %v5383_v41 }
  0x91   : > { %1521 = vmatmul.f32.gmra.mxu2 %v452_v32  ;;  %v458_v32 = vld [vmem:[#allocation2 + $0x150] sm:$0xff] }
  0x92   : > { %1476 = vmatmul.f32.gmra.mxu0 %v5362_v33 }
  0x94   : > { %1655 = vmatmul.f32.gmra.mxu3 %v392_v50 }
  0x96   : > { %1607 = vmatmul.f32.gmra.mxu1 %v5401_v49 }
  0x99   : > { %1524 = vmatmul.f32.gmra.mxu2 %v453_v39  ;;  %v1379_v39 = vld [vmem:[%s7888_s1 + $0x2a0] sm:$0xff] }
  0x9a   : > { %1479 = vmatmul.f32.gmra.mxu0 %v5380_v40  ;;  %2015 = vmatpush.msrb.mxu1 %v1379_v39  ;;  %v755_v39 = vld [vmem:[#allocation2 + $0x52] sm:$0xff] }
  0x9c   : > { %1658 = vmatmul.f32.gmra.mxu3 %v393_v58  ;;  %2016 = vmatpush.msrb.mxu1 %v1378_v43  ;;  %v460_v58 = vld [vmem:[#allocation2 + $0x168] sm:$0xff] }
  0x9e   : > { %1610 = vmatmul.f32.gmra.mxu1 %v5419_v57 }
  0x9f   : > { %2017 = vmatpush.msrb.mxu1 %v1377_v45  ;;  %v1435_v45 = vld [vmem:[%s7888_s1 + $0x460] sm:$0xff] }
  0xa1   : > { %1527 = vmatmul.f32.gmra.mxu2 %v454_v46  ;;  %v5522_v46 = vld [vmem:[#allocation2 + $0xa8] sm:$0xff]  ;;  %2018 = vmatpush.msrb.mxu1 %v1376_v51 }
  0xa2   : > { %1482 = vmatmul.f32.gmra.mxu0 %v5398_v47 }
  0xa3   : > { %2019 = vmatpush.msrb.mxu1 %v1375_v52 }
  0xa4   : > { %1661 = vmatmul.f32.gmra.mxu3 %v394_v9  ;;  %v461_v9 = vld [vmem:[#allocation2 + $0x170] sm:$0xff] }
  0xa6   : > { %1613 = vmatmul.f32.gmra.mxu1 %v5443_v8 }
  0xa8   : > { %v5548_v3 = vpop.f32.mrf.mxu0 }
  0xa9   : > { %1530 = vmatmul.f32.gmra.mxu2 %v455_v55  ;;  %v750_v55 = vld [vmem:[#allocation2 + $0x1a] sm:$0xff] }
  0xaa   : > { %1485 = vmatmul.f32.gmra.mxu0 %v5416_v56 }
  0xab   : > { %v5524_v50 = vpop.f32.mrf.mxu1 }
  0xac   : > { %1794 = vmatmul.f32.vlgmr.msrb.gmra.mxu3 %v5276_v0  ;;  %v1422_v0 = vld [vmem:[%s7888_s1 + $0x3f8] sm:$0xff] }
  0xad   : > { %2230 = vmatpush.msra.mxu3 %v1422_v0 }
  0xae   : > { %2020 = vmatmul.f32.vlgmr.msrb.gmra.mxu1 %v750_v55 }
  0xaf   : > { %v1617_v42 = vpop.f32.mrf.mxu3  ;;  %2231 = vmatpush.msra.mxu3 %v1421_v2 }
  0xb0   : > { %v5557_v16 = vpop.f32.mrf.mxu0 }
  0xb1   : > { %1533 = vmatmul.f32.gmra.mxu2 %v456_v4  ;;  %v751_v4 = vld [vmem:[#allocation2 + $0x22] sm:$0xff] }
  0xb2   : > { %1488 = vmatmul.f32.gmra.mxu0 %v5440_v7 }
  0xb3   : > { %v5539_v63 = vpop.f32.mrf.mxu1 }
  0xb4   : > { %1797 = vmatmul.f32.gmra.mxu3 %v5290_v5  ;;  %v1438_v5 = vld [vmem:[%s7888_s1 + $0x478] sm:$0xff] }
  0xb5   : > { %2343 = vmatpush.msra.mxu0 %v1438_v5  ;;  %v756_v5 = vld [vmem:[#allocation2 + $0x62] sm:$0xff] }
  0xb6   : > { %2023 = vmatmul.f32.gmra.mxu1 %v751_v4 }
  0xb7   : > { %v1620_v53 = vpop.f32.mrf.mxu3  ;;  %2344 = vmatpush.msra.mxu0 %v1437_v11 }
  0xb9   : > { %1536 = vmatmul.f32.gmra.mxu2 %v457_v18  ;;  %v1404_v18 = vld [vmem:[%s7888_s1 + $0x368] sm:$0xff] }
  0xba   : > { %1491 = vmatmul.f32.gmra.mxu0 %v5470_v22  ;;  %2119 = vmatpush.msra.mxu2 %v1404_v18 }
  0xbb   : > { %v5551_v10 = vpop.f32.mrf.mxu1 }
  0xbc   : > { %1800 = vmatmul.f32.gmra.mxu3 %v5308_v12  ;;  %2120 = vmatpush.msra.mxu2 %v1403_v38  ;;  %v1400_v38 = vld [vmem:[%s7888_s1 + $0x348] sm:$0xff] }
  0xbe   : > { %2026 = vmatmul.f32.gmra.mxu1 %v752_v15 }
  0xbf   : > { %v1623_v12 = vpop.f32.mrf.mxu3 }
  0xc1   : > { %1539 = vmatmul.f32.gmra.mxu2 %v458_v32  ;;  %v754_v32 = vld [vmem:[#allocation2 + $0x4a] sm:$0xff] }
  0xc2   : > { %1494 = vmatmul.f32.gmra.mxu0 %v5499_v36 }
  0xc4   : > { %1803 = vmatmul.f32.gmra.mxu3 %v5326_v19  ;;  %v5560_v19 = vpop.f32.mrf.mxu1 }
  0xc7   : > { %v1626_v14 = vpop.f32.mrf.mxu3 }
  0xc9   : > { %1542 = vmatmul.f32.gmra.mxu2 %v459_v44 }
  0xca   : > { %1497 = vmatmul.f32.gmra.mxu0 %v5522_v46 }
  0xcc   : > { %1806 = vmatmul.f32.gmra.mxu3 %v5344_v26  ;;  %v753_v26 = vld [vmem:[#allocation2 + $0x3a] sm:$0xff]  ;;  %v5574_v29 = vpop.f32.mrf.mxu1 }
  0xcd   : > { %2029 = vmatmul.f32.gmra.mxu1 %v753_v26 }
  0xcf   : > { %v1629_v23 = vpop.f32.mrf.mxu3 }
  0xd1   : > { %1545 = vmatmul.f32.gmra.mxu2 %v460_v58 }
  0xd2   : > { %1500 = vmatmul.f32.gmra.mxu0 %v5537_v61 }
  0xd4   : > { %1809 = vmatmul.f32.gmra.mxu3 %v5362_v33  ;;  %v5585_v37 = vpop.f32.mrf.mxu1 }
  0xd5   : > { %2032 = vmatmul.f32.gmra.mxu1 %v754_v32 }
  0xd7   : > { %v1632_v31 = vpop.f32.mrf.mxu3 }
  0xd9   : > { %1548 = vmatmul.f32.gmra.mxu2 %v461_v9 }
  0xda   : > { %1907 = vmatmul.f32.vlgmr.msrb.gmra.mxu0 %v5225_v48  ;;  %v1420_v48 = vld [vmem:[%s7888_s1 + $0x3e8] sm:$0xff] }
  0xdb   : > { %2232 = vmatpush.msra.mxu3 %v1420_v48 }
  0xdc   : > { %1812 = vmatmul.f32.gmra.mxu3 %v5380_v40  ;;  %v5599_v44 = vpop.f32.mrf.mxu1 }
  0xdd   : > { %2035 = vmatmul.f32.gmra.mxu1 %v755_v39 }
  0xdf   : > { %v1635_v40 = vpop.f32.mrf.mxu3 }
  0xe1   : > { %1681 = vmatmul.f32.vlgmr.msrb.gmra.mxu2 %v558_v17  ;;  %v1401_v17 = vld [vmem:[%s7888_s1 + $0x350] sm:$0xff] }
  0xe2   : > { %1910 = vmatmul.f32.gmra.mxu0 %v5247_v54  ;;  %v1436_v54 = vld [vmem:[%s7888_s1 + $0x468] sm:$0xff] }
  0xe3   : > { %2345 = vmatpush.msra.mxu0 %v1436_v54 }
  0xe4   : > { %v1504_v21 = vpop.f32.mrf.mxu2  ;;  %1815 = vmatmul.f32.gmra.mxu3 %v5398_v47 }
  0xe5   : > { %v5569_v24 = vadd.f32 %v1617_v42, %v1504_v21  ;;  %2346 = vmatpush.msra.mxu0 %v1435_v45  ;;  %2038 = vmatmul.f32.gmra.mxu1 %v756_v5  ;;  %v759_v21 = vld [vmem:[#allocation2 + $0x82] sm:$0xff] }
  0xe7   : > { %v5572_v28 = vpop.f32.mrf.mxu0  ;;  %v1638_v51 = vpop.f32.mrf.mxu3 }
  0xe9   : > { %1684 = vmatmul.f32.gmra.mxu2 %v559_v25  ;;  %v1433_v25 = vld [vmem:[%s7888_s1 + $0x450] sm:$0xff] }
  0xea   : > { %1913 = vmatmul.f32.gmra.mxu0 %v5264_v59  ;;  %v1419_v59 = vld [vmem:[%s7888_s1 + $0x3e0] sm:$0xff] }
  0xeb   : > { %2233 = vmatpush.msra.mxu3 %v1419_v59 }
  0xec   : > { %v1507_v30 = vpop.f32.mrf.mxu2  ;;  %1818 = vmatmul.f32.gmra.mxu3 %v5416_v56 }
  0xed   : > { %v5580_v35 = vadd.f32 %v1620_v53, %v1507_v30  ;;  %v5610_v53 = vpop.f32.mrf.mxu1  ;;  %2041 = vmatmul.f32.gmra.mxu1 %v757_v1  ;;  %v760_v30 = vld [vmem:[#allocation2 + $0x92] sm:$0xff] }
  0xef   : > { %v5583_v33 = vpop.f32.mrf.mxu0  ;;  %v1641_v56 = vpop.f32.mrf.mxu3 }
  0xf1   : > { %1687 = vmatmul.f32.gmra.mxu2 %v750_v55  ;;  %v1402_v55 = vld [vmem:[%s7888_s1 + $0x358] sm:$0xff] }
  0xf2   : > { %1916 = vmatmul.f32.gmra.mxu0 %v5268_v60  ;;  %2121 = vmatpush.msra.mxu2 %v1402_v55 }
  0xf4   : > { %v1510_v0 = vpop.f32.mrf.mxu2  ;;  %1821 = vmatmul.f32.gmra.mxu3 %v5440_v7  ;;  %2122 = vmatpush.msra.mxu2 %v1401_v17  ;;  %v637_v17 = vld [vmem:[#allocation2 + $0xc8] sm:$0xff] }
  0xf5   : > { %v5594_v42 = vadd.f32 %v1623_v12, %v1510_v0  ;;  %v761_v0 = vld [vmem:[#allocation2 + $0x9a] sm:$0xff] }
  0xf6   : > { %2123 = vmatpush.msra.mxu2 %v1400_v38  ;;  %v638_v38 = vld [vmem:[#allocation2 + $0xd8] sm:$0xff] }
  0xf7   : > { %v5597_v43 = vpop.f32.mrf.mxu0  ;;  %v1644_v11 = vpop.f32.mrf.mxu3 }
  0xf9   : > { %1690 = vmatmul.f32.gmra.mxu2 %v751_v4  ;;  %v1434_v4 = vld [vmem:[%s7888_s1 + $0x458] sm:$0xff] }
  0xfa   : > { %1919 = vmatmul.f32.gmra.mxu0 %v5273_v62  ;;  %v1418_v62 = vld [vmem:[%s7888_s1 + $0x3d8] sm:$0xff] }
  0xfb   : > { %2234 = vmatpush.msra.mxu3 %v1418_v62  ;;  %2347 = vmatpush.msra.mxu0 %v1434_v4  ;;  %v636_v62 = vld [vmem:[#allocation2 + $0xc0] sm:$0xff] }
  0xfc   : > { %v1513_v60 = vpop.f32.mrf.mxu2  ;;  %1824 = vmatmul.f32.gmra.mxu3 %v5470_v22 }
  0xfd   : > { %v5605_v52 = vadd.f32 %v1626_v14, %v1513_v60  ;;  %v758_v14 = vld [vmem:[#allocation2 + $0x7a] sm:$0xff]  ;;  %2348 = vmatpush.msra.mxu0 %v1433_v25  ;;  %v1432_v60 = vld [vmem:[%s7888_s1 + $0x448] sm:$0xff] }
  0xfe   : > { %2044 = vmatmul.f32.gmra.mxu1 %v758_v14  ;;  %v5707_v25 = vld [vmem:[#allocation2 + $0xc2] sm:$0xff] }
  0xff   : > { %v5608_v47 = vpop.f32.mrf.mxu0  ;;  %v1647_v48 = vpop.f32.mrf.mxu3  ;;  %2349 = vmatpush.msra.mxu0 %v1432_v60  ;;  %7935 = vst [vmem:[#allocation7_spill] sm:$0xff] %v5707_v25  ;;  %v5725_v60 = vld [vmem:[#allocation2 + $0xca] sm:$0xff] }
 0x101   : > { %1693 = vmatmul.f32.gmra.mxu2 %v752_v15 }
 0x102   : > { %1922 = vmatmul.f32.gmra.mxu0 %v5293_v6  ;;  %v5628_v6 = vpop.f32.mrf.mxu1 }
 0x104   : > { %v1516_v58 = vpop.f32.mrf.mxu2  ;;  %1827 = vmatmul.f32.gmra.mxu3 %v5499_v36 }
 0x105   : > { %v5619_v2 = vadd.f32 %v1629_v23, %v1516_v58  ;;  %v1399_v58 = vld [vmem:[%s7888_s1 + $0x340] sm:$0xff] }
 0x106   : > { %2047 = vmatmul.f32.gmra.mxu1 %v759_v21  ;;  %2124 = vmatpush.msra.mxu2 %v1399_v58 }
 0x107   : > { %v5622_v12 = vpop.f32.mrf.mxu0  ;;  %v1650_v54 = vpop.f32.mrf.mxu3 }
 0x109   : > { %1696 = vmatmul.f32.gmra.mxu2 %v753_v26 }
 0x10a   : > { %1925 = vmatmul.f32.gmra.mxu0 %v5311_v13  ;;  %v1417_v13 = vld [vmem:[%s7888_s1 + $0x3d0] sm:$0xff]  ;;  %v5644_v23 = vpop.f32.mrf.mxu1 }
 0x10b   : > { %2235 = vmatpush.msra.mxu3 %v1417_v13 }
 0x10c   : > { %v1519_v9 = vpop.f32.mrf.mxu2  ;;  %1830 = vmatmul.f32.gmra.mxu3 %v5522_v46 }
 0x10d   : > { %v5630_v15 = vadd.f32 %v1632_v31, %v1519_v9  ;;  %v5694_v9 = vld [vmem:[#allocation2 + $0xb2] sm:$0xff] }
 0x10e   : > { %2050 = vmatmul.f32.gmra.mxu1 %v760_v30  ;;  %7933 = vst [vmem:[#allocation5_spill] sm:$0xff] %v5694_v9 }
 0x10f   : > { %v5633_v7 = vpop.f32.mrf.mxu0  ;;  %v1653_v46 = vpop.f32.mrf.mxu3 }
 0x111   : > { %1699 = vmatmul.f32.gmra.mxu2 %v754_v32 }
 0x112   : > { %1928 = vmatmul.f32.gmra.mxu0 %v5329_v20  ;;  %v5658_v32 = vpop.f32.mrf.mxu1 }
 0x114   : > { %v1522_v18 = vpop.f32.mrf.mxu2  ;;  %1833 = vmatmul.f32.gmra.mxu3 %v5537_v61 }
 0x115   : > { %v5642_v22 = vadd.f32 %v1635_v40, %v1522_v18 }
 0x116   : > { %2053 = vmatmul.f32.gmra.mxu1 %v761_v0 }
 0x117   : > { %v5647_v26 = vpop.f32.mrf.mxu0 }
 0x119   : > { %1702 = vmatmul.f32.gmra.mxu2 %v755_v39 }
 0x11a   : > { %1931 = vmatmul.f32.gmra.mxu0 %v5347_v27  ;;  %v1416_v27 = vld [vmem:[%s7888_s1 + $0x3c8] sm:$0xff]  ;;  %v5672_v45 = vpop.f32.mrf.mxu1 }
 0x11b   : > { %2236 = vmatpush.msra.mxu3 %v1416_v27  ;;  %v1414_v27 = vld [vmem:[%s7888_s1 + $0x3b8] sm:$0xff] }
 0x11c   : > { %v1525_v20 = vpop.f32.mrf.mxu2  ;;  %1836 = vmatmul.f32.gmra.mxu3 %v636_v62  ;;  %v700_v62 = vld [vmem:[#allocation2 + $0xc1] sm:$0xff] }
 0x11d   : > { %v5653_v31 = vadd.f32 %v1638_v51, %v1525_v20  ;;  %v1656_v51 = vpop.f32.mrf.mxu3 }
 0x11f   : > { %v5656_v36 = vpop.f32.mrf.mxu0 }
 0x121   : > { %1705 = vmatmul.f32.gmra.mxu2 %v756_v5  ;;  %v5678_v5 = vld [vmem:[#allocation2 + $0xaa] sm:$0xff] }
 0x122   : > { %1934 = vmatmul.f32.gmra.mxu0 %v5365_v34  ;;  %2056 = vmatmul.f32.gmra.mxu1 %v5678_v5 }
 0x124   : > { %v1528_v59 = vpop.f32.mrf.mxu2  ;;  %1839 = vmatmul.f32.gmra.mxu3 %v637_v17 }
 0x125   : > { %v5667_v40 = vadd.f32 %v1641_v56, %v1528_v59  ;;  %v5692_v56 = vpop.f32.mrf.mxu1  ;;  %v1659_v4 = vpop.f32.mrf.mxu3 }
 0x127   : > { %v5670_v39 = vpop.f32.mrf.mxu0 }
 0x129   : > { %1708 = vmatmul.f32.gmra.mxu2 %v757_v1 }
 0x12a   : > { %1937 = vmatmul.f32.gmra.mxu0 %v5383_v41  ;;  %v1415_v41 = vld [vmem:[%s7888_s1 + $0x3c0] sm:$0xff]  ;;  %2059 = vmatmul.f32.gmra.mxu1 %v5694_v9 }
 0x12b   : > { %2237 = vmatpush.msra.mxu3 %v1415_v41  ;;  %v639_v41 = vld [vmem:[#allocation2 + $0xe0] sm:$0xff] }
 0x12c   : > { %v1531_v34 = vpop.f32.mrf.mxu2  ;;  %1842 = vmatmul.f32.gmra.mxu3 %v638_v38  ;;  %v701_v38 = vld [vmem:[#allocation2 + $0xc9] sm:$0xff] }
 0x12d   : > { %v5680_v55 = vadd.f32 %v1644_v11, %v1531_v34  ;;  %v5705_v18 = vpop.f32.mrf.mxu3  ;;  %v5711_v20 = vpop.f32.mrf.mxu1  ;;  %2238 = vmatpush.msra.mxu3 %v1414_v27 }
 0x12f   : > { %v5683_v61 = vpop.f32.mrf.mxu0 }
 0x131   : > { %1711 = vmatmul.f32.gmra.mxu2 %v758_v14 }
 0x132   : > { %1940 = vmatmul.f32.gmra.mxu0 %v5401_v49  ;;  %v1431_v49 = vld [vmem:[%s7888_s1 + $0x440] sm:$0xff]  ;;  %2062 = vmatmul.f32.gmra.mxu1 %v5707_v25 }
 0x133   : > { %2350 = vmatpush.msra.mxu0 %v1431_v49  ;;  %v5742_v49 = vld [vmem:[#allocation2 + $0xda] sm:$0xff] }
 0x134   : > { %v1534_v1 = vpop.f32.mrf.mxu2  ;;  %1845 = vmatmul.f32.gmra.mxu3 %v639_v41 }
 0x135   : > { %v5696_v11 = vadd.f32 %v1647_v48, %v1534_v1  ;;  %v5723_v59 = vpop.f32.mrf.mxu3  ;;  %v5732_v58 = vpop.f32.mrf.mxu1 }
 0x137   : > { %7934 = vst [vmem:[#allocation6_spill] sm:$0xff] %v5696_v11  ;;  %v5699_v14 = vpop.f32.mrf.mxu0  ;;  %v704_v11 = vld [vmem:[#allocation2 + $0xf1] sm:$0xff] }
 0x139   : > { %1714 = vmatmul.f32.gmra.mxu2 %v759_v21 }
 0x13a   : > { %1943 = vmatmul.f32.gmra.mxu0 %v5419_v57  ;;  %v1398_v57 = vld [vmem:[%s7888_s1 + $0x338] sm:$0xff]  ;;  %2065 = vmatmul.f32.gmra.mxu1 %v5725_v60 }
 0x13b   : > { %2125 = vmatpush.msra.mxu2 %v1398_v57  ;;  %v640_v57 = vld [vmem:[#allocation2 + $0xf0] sm:$0xff] }
 0x13c   : > { %v1537_v13 = vpop.f32.mrf.mxu2  ;;  %1848 = vmatmul.f32.gmra.mxu3 %v640_v57  ;;  %v641_v57 = vld [vmem:[#allocation2 + $0xf8] sm:$0xff] }
 0x13d   : > { %v5709_v48 = vadd.f32 %v1650_v54, %v1537_v13  ;;  %v5740_v17 = vpop.f32.mrf.mxu3  ;;  %v5750_v27 = vpop.f32.mrf.mxu1 }
 0x13f   : > { %7936 = vst [vmem:[#allocation8_spill] sm:$0xff] %v5709_v48  ;;  %v5714_v21 = vpop.f32.mrf.mxu0  ;;  %v642_v48 = vld [vmem:[#allocation2 + $0x108] sm:$0xff] }
 0x141   : > { %1717 = vmatmul.f32.gmra.mxu2 %v760_v30 }
 0x142   : > { %1946 = vmatmul.f32.gmra.mxu0 %v5443_v8  ;;  %v3473_v8 = vld [vmem:[%s7891_s4 + $0x78] sm:$0xff]  ;;  %2068 = vmatmul.f32.gmra.mxu1 %v5742_v49 }
 0x143   : > { %3602 = vmatpush.msra.mxu1 %v3473_v8  ;;  %v5760_v8 = vld [vmem:[#allocation2 + $0xe2] sm:$0xff] }
 0x144   : > { %v1540_v54 = vpop.f32.mrf.mxu2  ;;  %1851 = vmatmul.f32.gmra.mxu3 %v641_v57 }
 0x145   : > { %v5727_v34 = vadd.f32 %v1653_v46, %v1540_v54  ;;  %v1430_v46 = vld [vmem:[%s7888_s1 + $0x438] sm:$0xff]  ;;  %v1397_v54 = vld [vmem:[%s7888_s1 + $0x330] sm:$0xff]  ;;  %v5758_v41 = vpop.f32.mrf.mxu3 }
 0x146   : > { %2351 = vmatpush.msra.mxu0 %v1430_v46  ;;  %2126 = vmatpush.msra.mxu2 %v1397_v54  ;;  %v3472_v54 = vld [vmem:[%s7891_s4 + $0x70] sm:$0xff] }
 0x147   : > { %7937 = vst [vmem:[#allocation9_spill] sm:$0xff] %v5727_v34  ;;  %v5730_v30 = vpop.f32.mrf.mxu0  ;;  %3603 = vmatpush.msra.mxu1 %v3472_v54  ;;  %v703_v34 = vld [vmem:[#allocation2 + $0xe1] sm:$0xff]  ;;  %v1570_v54 = vadd.f32 %v5524_v50, %v5548_v3 }
 0x148   : > { %v3471_v3 = vld [vmem:[%s7891_s4 + $0x68] sm:$0xff] }
 0x149   : > { %1720 = vmatmul.f32.gmra.mxu2 %v761_v0  ;;  %3604 = vmatpush.msra.mxu1 %v3471_v3 }
 0x14a   : > { %1949 = vmatmul.f32.gmra.mxu0 %v700_v62  ;;  %2071 = vmatmul.f32.gmra.mxu1 %v5760_v8 }
 0x14c   : > { %v1543_v1 = vpop.f32.mrf.mxu2  ;;  %1854 = vmatmul.f32.gmra.mxu3 %v642_v48 }
 0x14d   : > { %v5744_v13 = vadd.f32 %v1656_v51, %v1543_v1  ;;  %v1413_v51 = vld [vmem:[%s7888_s1 + $0x3b0] sm:$0xff]  ;;  %v702_v1 = vld [vmem:[#allocation2 + $0xd9] sm:$0xff] }
 0x14e   : > { %2239 = vmatpush.msra.mxu3 %v1413_v51 }
 0x14f   : > { %7938 = vst [vmem:[#allocation10_spill] sm:$0xff] %v5744_v13  ;;  %v5747_v0 = vpop.f32.mrf.mxu0 }
 0x151   : > { %1723 = vmatmul.f32.gmra.mxu2 %v5678_v5 }
 0x152   : > { %1952 = vmatmul.f32.gmra.mxu0 %v701_v38  ;;  %v2021_v38 = vpop.f32.mrf.mxu1 }
 0x154   : > { %v1546_v62 = vpop.f32.mrf.mxu2 }
 0x155   : > { %v5762_v5 = vadd.f32 %v1659_v4, %v1546_v62  ;;  %v1429_v4 = vld [vmem:[%s7888_s1 + $0x430] sm:$0xff]  ;;  %v5772_v62 = vpop.f32.mrf.mxu3 }
 0x156   : > { %2352 = vmatpush.msra.mxu0 %v1429_v4 }
 0x157   : > { %7939 = vst [vmem:[#allocation11_spill] sm:$0xff] %v5762_v5  ;;  %v1908_v46 = vpop.f32.mrf.mxu0  ;;  %v5774_v5 = vld [vmem:[#allocation2 + $0xf2] sm:$0xff] }
 0x158   : > { %2074 = vmatmul.f32.gmra.mxu1 %v5774_v5 }
 0x159   : > { %1726 = vmatmul.f32.gmra.mxu2 %v5694_v9  ;;  %v643_v9 = vld [vmem:[#allocation2 + $0x110] sm:$0xff] }
 0x15a   : > { %1955 = vmatmul.f32.gmra.mxu0 %v702_v1  ;;  %v1396_v1 = vld [vmem:[%s7888_s1 + $0x328] sm:$0xff]  ;;  %v2024_v4 = vpop.f32.mrf.mxu1  ;;  %1857 = vmatmul.f32.gmra.mxu3 %v643_v9 }
 0x15b   : > { %2127 = vmatpush.msra.mxu2 %v1396_v1  ;;  %v5808_v9 = vld [vmem:[#allocation2 + $0x10a] sm:$0xff] }
 0x15c   : > { %v1549_v51 = vpop.f32.mrf.mxu2 }
 0x15d   : > { %v5777_v13 = vadd.f32 %v5705_v18, %v1549_v51  ;;  %v1412_v18 = vld [vmem:[%s7888_s1 + $0x3a8] sm:$0xff] }
 0x15e   : > { %2240 = vmatpush.msra.mxu3 %v1412_v18 }
 0x15f   : > { %7940 = vst [vmem:[#allocation12_spill] sm:$0xff] %v5777_v13  ;;  %v1911_v57 = vpop.f32.mrf.mxu0  ;;  %v5789_v13 = vpop.f32.mrf.mxu3 }
 0x161   : > { %1729 = vmatmul.f32.gmra.mxu2 %v5707_v25  ;;  %v5791_v25 = vld [vmem:[#allocation2 + $0xfa] sm:$0xff] }
 0x162   : > { %1958 = vmatmul.f32.gmra.mxu0 %v703_v34  ;;  %2077 = vmatmul.f32.gmra.mxu1 %v5791_v25 }
 0x164   : > { %v1682_v51 = vpop.f32.mrf.mxu2 }
 0x165   : > { %v1683_v48 = vadd.f32 %v1682_v51, %v1570_v54  ;;  %v1573_v54 = vadd.f32 %v5539_v63, %v5557_v16  ;;  %v705_v63 = vld [vmem:[#allocation2 + $0xf9] sm:$0xff] }
 0x166   : > { %v644_v16 = vld [vmem:[#allocation2 + $0x120] sm:$0xff] }
 0x167   : > { %v1796_v34 = vadd.f32 %v5723_v59, %v1683_v48  ;;  %v1914_v1 = vpop.f32.mrf.mxu0  ;;  %v1428_v59 = vld [vmem:[%s7888_s1 + $0x428] sm:$0xff]  ;;  %v5806_v48 = vpop.f32.mrf.mxu3  ;;  %1860 = vmatmul.f32.gmra.mxu3 %v644_v16 }
 0x168   : > { %2353 = vmatpush.msra.mxu0 %v1428_v59 }
 0x169   : > { %1732 = vmatmul.f32.gmra.mxu2 %v5725_v60  ;;  %v1909_v50 = vadd.f32 %v1908_v46, %v1796_v34  ;;  %v2027_v34 = vpop.f32.mrf.mxu1 }
 0x16a   : > { %1961 = vmatmul.f32.gmra.mxu0 %v704_v11  ;;  %2080 = vmatmul.f32.gmra.mxu1 %v5808_v9 }
 0x16b   : > { %v5801_v18 = vadd.f32 %v2021_v38, %v1909_v50  ;;  %v1395_v50 = vld [vmem:[%s7888_s1 + $0x320] sm:$0xff] }
 0x16c   : > { %v1685_v51 = vpop.f32.mrf.mxu2  ;;  %2128 = vmatpush.msra.mxu2 %v1395_v50  ;;  %v706_v50 = vld [vmem:[#allocation2 + $0x109] sm:$0xff] }
 0x16d   : > { %v1686_v46 = vadd.f32 %v1685_v51, %v1573_v54  ;;  %v1576_v54 = vadd.f32 %v5551_v10, %v5572_v28  ;;  %v645_v28 = vld [vmem:[#allocation2 + $0x128] sm:$0xff] }
 0x16f   : > { %v1799_v11 = vadd.f32 %v5740_v17, %v1686_v46  ;;  %v1917_v3 = vpop.f32.mrf.mxu0  ;;  %v1411_v17 = vld [vmem:[%s7888_s1 + $0x3a0] sm:$0xff]  ;;  %v5823_v46 = vpop.f32.mrf.mxu3  ;;  %1863 = vmatmul.f32.gmra.mxu3 %v645_v28 }
 0x170   : > { %2241 = vmatpush.msra.mxu3 %v1411_v17 }
 0x171   : > { %1735 = vmatmul.f32.gmra.mxu2 %v5742_v49  ;;  %v1912_v38 = vadd.f32 %v1911_v57, %v1799_v11  ;;  %v5825_v57 = vld [vmem:[#allocation2 + $0x112] sm:$0xff]  ;;  %v2030_v10 = vpop.f32.mrf.mxu1 }
 0x172   : > { %1964 = vmatmul.f32.gmra.mxu0 %v705_v63  ;;  %2083 = vmatmul.f32.gmra.mxu1 %v5825_v57 }
 0x173   : > { %v5818_v59 = vadd.f32 %v2024_v4, %v1912_v38  ;;  %v3470_v38 = vld [vmem:[%s7891_s4 + $0x60] sm:$0xff] }
 0x174   : > { %v1688_v51 = vpop.f32.mrf.mxu2  ;;  %3605 = vmatpush.msra.mxu1 %v3470_v38  ;;  %v707_v38 = vld [vmem:[#allocation2 + $0x111] sm:$0xff] }
 0x175   : > { %v1689_v11 = vadd.f32 %v1688_v51, %v1576_v54  ;;  %v1579_v54 = vadd.f32 %v5560_v19, %v5583_v33  ;;  %v646_v19 = vld [vmem:[#allocation2 + $0x138] sm:$0xff] }
 0x177   : > { %v1802_v63 = vadd.f32 %v5758_v41, %v1689_v11  ;;  %v1920_v16 = vpop.f32.mrf.mxu0  ;;  %v1427_v41 = vld [vmem:[%s7888_s1 + $0x420] sm:$0xff]  ;;  %v5840_v11 = vpop.f32.mrf.mxu3  ;;  %1866 = vmatmul.f32.gmra.mxu3 %v646_v19 }
 0x178   : > { %2354 = vmatpush.msra.mxu0 %v1427_v41 }
 0x179   : > { %1738 = vmatmul.f32.gmra.mxu2 %v5760_v8  ;;  %v1915_v4 = vadd.f32 %v1914_v1, %v1802_v63  ;;  %v5842_v1 = vld [vmem:[#allocation2 + $0x122] sm:$0xff] }
 0x17a   : > { %1967 = vmatmul.f32.gmra.mxu0 %v706_v50  ;;  %2086 = vmatmul.f32.gmra.mxu1 %v5842_v1 }
 0x17b   : > { %v5835_v17 = vadd.f32 %v2027_v34, %v1915_v4  ;;  %v2033_v34 = vpop.f32.mrf.mxu1  ;;  %v1394_v4 = vld [vmem:[%s7888_s1 + $0x318] sm:$0xff] }
 0x17c   : > { %v1691_v51 = vpop.f32.mrf.mxu2  ;;  %2129 = vmatpush.msra.mxu2 %v1394_v4  ;;  %v708_v4 = vld [vmem:[#allocation2 + $0x121] sm:$0xff] }
 0x17d   : > { %v1692_v63 = vadd.f32 %v1691_v51, %v1579_v54  ;;  %v1582_v54 = vadd.f32 %v5574_v29, %v5597_v43  ;;  %v647_v29 = vld [vmem:[#allocation2 + $0x140] sm:$0xff] }
 0x17f   : > { %v1805_v50 = vadd.f32 %v5772_v62, %v1692_v63  ;;  %v1923_v28 = vpop.f32.mrf.mxu0  ;;  %v1410_v62 = vld [vmem:[%s7888_s1 + $0x398] sm:$0xff]  ;;  %v5859_v63 = vld [vmem:[#allocation2 + $0x12a] sm:$0xff]  ;;  %1869 = vmatmul.f32.gmra.mxu3 %v647_v29 }
 0x180   : > { %2242 = vmatpush.msra.mxu3 %v1410_v62 }
 0x181   : > { %1741 = vmatmul.f32.gmra.mxu2 %v5774_v5  ;;  %v1918_v33 = vadd.f32 %v1917_v3, %v1805_v50  ;;  %v5857_v3 = vpop.f32.mrf.mxu3 }
 0x182   : > { %1970 = vmatmul.f32.gmra.mxu0 %v707_v38  ;;  %2089 = vmatmul.f32.gmra.mxu1 %v5859_v63 }
 0x183   : > { %v5852_v41 = vadd.f32 %v2030_v10, %v1918_v33  ;;  %v3469_v10 = vld [vmem:[%s7891_s4 + $0x58] sm:$0xff]  ;;  %v1585_v33 = vadd.f32 %v5585_v37, %v5608_v47  ;;  %v2036_v62 = vpop.f32.mrf.mxu1  ;;  %v709_v37 = vld [vmem:[#allocation2 + $0x129] sm:$0xff] }
 0x184   : > { %v1694_v51 = vpop.f32.mrf.mxu2  ;;  %3606 = vmatpush.msra.mxu1 %v3469_v10  ;;  %v648_v47 = vld [vmem:[#allocation2 + $0x150] sm:$0xff]  ;;  %v1588_v10 = vadd.f32 %v5599_v44, %v5622_v12  ;;  %v710_v44 = vld [vmem:[#allocation2 + $0x139] sm:$0xff] }
 0x185   : > { %v1695_v50 = vadd.f32 %v1694_v51, %v1582_v54  ;;  %v649_v12 = vld [vmem:[#allocation2 + $0x158] sm:$0xff] }
 0x187   : > { %v1808_v38 = vadd.f32 %v5789_v13, %v1695_v50  ;;  %v1926_v19 = vpop.f32.mrf.mxu0  ;;  %v1426_v13 = vld [vmem:[%s7888_s1 + $0x418] sm:$0xff]  ;;  %1872 = vmatmul.f32.gmra.mxu3 %v648_v47 }
 0x188   : > { %2355 = vmatpush.msra.mxu0 %v1426_v13  ;;  %v5876_v50 = vld [vmem:[#allocation2 + $0x13a] sm:$0xff] }
 0x189   : > { %1744 = vmatmul.f32.gmra.mxu2 %v5791_v25  ;;  %v1921_v43 = vadd.f32 %v1920_v16, %v1808_v38  ;;  %v5874_v16 = vpop.f32.mrf.mxu3 }
 0x18a   : > { %1973 = vmatmul.f32.gmra.mxu0 %v708_v4  ;;  %2092 = vmatmul.f32.gmra.mxu1 %v5876_v50 }
 0x18b   : > { %v5869_v54 = vadd.f32 %v2033_v34, %v1921_v43  ;;  %v1393_v43 = vld [vmem:[%s7888_s1 + $0x310] sm:$0xff] }
 0x18c   : > { %v1697_v51 = vpop.f32.mrf.mxu2  ;;  %2130 = vmatpush.msra.mxu2 %v1393_v43  ;;  %v1591_v43 = vadd.f32 %v5610_v53, %v5633_v7  ;;  %v650_v7 = vld [vmem:[#allocation2 + $0x168] sm:$0xff] }
 0x18d   : > { %v1698_v38 = vadd.f32 %v1697_v51, %v1585_v33 }
 0x18f   : > { %v1811_v4 = vadd.f32 %v5806_v48, %v1698_v38  ;;  %v1929_v29 = vpop.f32.mrf.mxu0  ;;  %v1409_v48 = vld [vmem:[%s7888_s1 + $0x390] sm:$0xff]  ;;  %1875 = vmatmul.f32.gmra.mxu3 %v649_v12  ;;  %v711_v12 = vld [vmem:[#allocation2 + $0x141] sm:$0xff] }
 0x190   : > { %2243 = vmatpush.msra.mxu3 %v1409_v48 }
 0x191   : > { %1747 = vmatmul.f32.gmra.mxu2 %v5808_v9  ;;  %v1924_v34 = vadd.f32 %v1923_v28, %v1811_v4  ;;  %v5891_v51 = vpop.f32.mrf.mxu3  ;;  %v5893_v28 = vld [vmem:[#allocation2 + $0x142] sm:$0xff]  ;;  %v2039_v4 = vpop.f32.mrf.mxu1 }
 0x192   : > { %1976 = vmatmul.f32.gmra.mxu0 %v709_v37  ;;  %2095 = vmatmul.f32.gmra.mxu1 %v5893_v28 }
 0x193   : > { %v5886_v33 = vadd.f32 %v2036_v62, %v1924_v34  ;;  %v3468_v34 = vld [vmem:[%s7891_s4 + $0x50] sm:$0xff] }
 0x194   : > { %v1700_v13 = vpop.f32.mrf.mxu2  ;;  %3607 = vmatpush.msra.mxu1 %v3468_v34  ;;  %v1594_v34 = vadd.f32 %v5628_v6, %v5647_v26  ;;  %v651_v6 = vld [vmem:[#allocation2 + $0x170] sm:$0xff] }
 0x195   : > { %v1701_v38 = vadd.f32 %v1700_v13, %v1588_v10  ;;  %v5932_v26 = vld [vmem:[%s5136_s8 + $0xf0] sm:$0xff] }
 0x196   : > { %428 = vst [vmem:[#allocation2 + $0x181] sm:$0xff] %v5932_v26 }
 0x197   : > { %v1814_v37 = vadd.f32 %v5823_v46, %v1701_v38  ;;  %v1932_v47 = vpop.f32.mrf.mxu0  ;;  %v1425_v46 = vld [vmem:[%s7888_s1 + $0x410] sm:$0xff]  ;;  %1878 = vmatmul.f32.gmra.mxu3 %v650_v7 }
 0x198   : > { %2356 = vmatpush.msra.mxu0 %v1425_v46  ;;  %v712_v7 = vld [vmem:[#allocation2 + $0x151] sm:$0xff] }
 0x199   : > { %1750 = vmatmul.f32.gmra.mxu2 %v5825_v57  ;;  %v1927_v62 = vadd.f32 %v1926_v19, %v1814_v37  ;;  %v5908_v13 = vpop.f32.mrf.mxu3  ;;  %v5910_v19 = vld [vmem:[#allocation2 + $0x152] sm:$0xff]  ;;  %v2042_v53 = vpop.f32.mrf.mxu1 }
 0x19a   : > { %1979 = vmatmul.f32.gmra.mxu0 %v710_v44  ;;  %2098 = vmatmul.f32.gmra.mxu1 %v5910_v19 }
 0x19b   : > { %v5903_v10 = vadd.f32 %v2039_v4, %v1927_v62  ;;  %v1392_v62 = vld [vmem:[%s7888_s1 + $0x308] sm:$0xff] }
 0x19c   : > { %v1703_v48 = vpop.f32.mrf.mxu2  ;;  %2131 = vmatpush.msra.mxu2 %v1392_v62  ;;  %v1424_v62 = vld [vmem:[%s7888_s1 + $0x408] sm:$0xff] }
 0x19d   : > { %v1704_v38 = vadd.f32 %v1703_v48, %v1591_v43  ;;  %v5927_v48 = vld [vmem:[#allocation2 + $0x15a] sm:$0xff]  ;;  %2357 = vmatpush.msra.mxu0 %v1424_v62 }
 0x19f   : > { %v1817_v37 = vadd.f32 %v5840_v11, %v1704_v38  ;;  %v1935_v44 = vpop.f32.mrf.mxu0  ;;  %v1408_v11 = vld [vmem:[%s7888_s1 + $0x388] sm:$0xff]  ;;  %1881 = vmatmul.f32.gmra.mxu3 %v651_v6  ;;  %v652_v6 = vld [vmem:[#allocation2 + $0x180] sm:$0xff] }
 0x1a0   : > { %2244 = vmatpush.msra.mxu3 %v1408_v11  ;;  %v5948_v11 = vld [vmem:[#allocation2 + $0x16a] sm:$0xff] }
 0x1a1   : > { %1753 = vmatmul.f32.gmra.mxu2 %v5842_v1  ;;  %v1930_v4 = vadd.f32 %v1929_v29, %v1817_v37  ;;  %v5925_v29 = vpop.f32.mrf.mxu3 }
 0x1a2   : > { %1982 = vmatmul.f32.gmra.mxu0 %v711_v12  ;;  %2101 = vmatmul.f32.gmra.mxu1 %v5927_v48 }
 0x1a3   : > { %v5920_v43 = vadd.f32 %v2042_v53, %v1930_v4  ;;  %v3467_v4 = vld [vmem:[%s7891_s4 + $0x48] sm:$0xff] }
 0x1a4   : > { %v1706_v46 = vpop.f32.mrf.mxu2  ;;  %3608 = vmatpush.msra.mxu1 %v3467_v4  ;;  %v5953_v4 = vld [vmem:[%s5136_s8 + $0xf8] sm:$0xff] }
 0x1a5   : > { %v1707_v38 = vadd.f32 %v1706_v46, %v1594_v34  ;;  %429 = vst [vmem:[#allocation2 + $0x189] sm:$0xff] %v5953_v4 }
 0x1a7   : > { %v1820_v37 = vadd.f32 %v5857_v3, %v1707_v38  ;;  %v1938_v12 = vpop.f32.mrf.mxu0  ;;  %v1597_v3 = vadd.f32 %v5644_v23, %v5656_v36  ;;  %1884 = vmatmul.f32.gmra.mxu3 %v652_v6  ;;  %v1391_v36 = vld [vmem:[%s7888_s1 + $0x300] sm:$0xff]  ;;  %v714_v6 = vld [vmem:[#allocation2 + $0x169] sm:$0xff] }
 0x1a8   : > { %2132 = vmatpush.msra.mxu2 %v1391_v36 }
 0x1a9   : > { %1756 = vmatmul.f32.gmra.mxu2 %v5859_v63  ;;  %v5935_v53 = vadd.f32 %v1932_v47, %v1820_v37  ;;  %v5946_v47 = vpop.f32.mrf.mxu3 }
 0x1aa   : > { %1985 = vmatmul.f32.gmra.mxu0 %v712_v7  ;;  %2104 = vmatmul.f32.gmra.mxu1 %v5948_v11  ;;  %v713_v7 = vld [vmem:[#allocation2 + $0x159] sm:$0xff] }
 0x1ac   : > { %v1709_v34 = vpop.f32.mrf.mxu2 }
 0x1ad   : > { %v1710_v46 = vadd.f32 %v1709_v34, %v1597_v3  ;;  %v1407_v3 = vld [vmem:[%s7888_s1 + $0x380] sm:$0xff] }
 0x1ae   : > { %2245 = vmatpush.msra.mxu3 %v1407_v3 }
 0x1af   : > { %v1823_v38 = vadd.f32 %v5874_v16, %v1710_v46  ;;  %v1941_v37 = vpop.f32.mrf.mxu0  ;;  %v1600_v16 = vadd.f32 %v5658_v32, %v5670_v39  ;;  %v3466_v32 = vld [vmem:[%s7891_s4 + $0x40] sm:$0xff]  ;;  %v1603_v39 = vadd.f32 %v5672_v45, %v5683_v61  ;;  %v1606_v45 = vadd.f32 %v5692_v56, %v5699_v14 }
 0x1b0   : > { %3609 = vmatpush.msra.mxu1 %v3466_v32  ;;  %v781_v32 = vld [vmem:[#allocation2 + $0x18a] sm:$0xff]  ;;  %v1609_v56 = vadd.f32 %v5711_v20, %v5714_v21 }
 0x1b1   : > { %1759 = vmatmul.f32.gmra.mxu2 %v5876_v50  ;;  %v5956_v23 = vadd.f32 %v1935_v44, %v1823_v38  ;;  %v1837_v50 = vpop.f32.mrf.mxu3  ;;  %v779_v44 = vld [vmem:[#allocation2 + $0x172] sm:$0xff] }
 0x1b2   : > { %1988 = vmatmul.f32.gmra.mxu0 %v713_v7  ;;  %2107 = vmatmul.f32.gmra.mxu1 %v779_v44 }
 0x1b3   : > { %7941 = vst [vmem:[#allocation13_spill] sm:$0xff] %v5956_v23  ;;  %v653_v23 = vld [vmem:[#allocation2 + $0x188] sm:$0xff] }
 0x1b4   : > { %v1712_v62 = vpop.f32.mrf.mxu2  ;;  %1887 = vmatmul.f32.gmra.mxu3 %v653_v23 }
 0x1b5   : > { %v1713_v34 = vadd.f32 %v1712_v62, %v1600_v16  ;;  %v715_v62 = vld [vmem:[#allocation2 + $0x171] sm:$0xff] }
 0x1b7   : > { %v1826_v46 = vadd.f32 %v5891_v51, %v1713_v34  ;;  %v1944_v38 = vpop.f32.mrf.mxu0  ;;  %v1423_v51 = vld [vmem:[%s7888_s1 + $0x400] sm:$0xff]  ;;  %v879_v34 = vld [vmem:[#allocation2 + $0x31] sm:$0xff] }
 0x1b8   : > { %2358 = vmatpush.msra.mxu0 %v1423_v51 }
 0x1b9   : > { %1762 = vmatmul.f32.gmra.mxu2 %v5893_v28  ;;  %v5969_v7 = vadd.f32 %v1938_v12, %v1826_v46  ;;  %v1840_v16 = vpop.f32.mrf.mxu3  ;;  %v780_v28 = vld [vmem:[#allocation2 + $0x182] sm:$0xff] }
 0x1ba   : > { %1991 = vmatmul.f32.gmra.mxu0 %v714_v6  ;;  %2110 = vmatmul.f32.gmra.mxu1 %v780_v28 }
 0x1bc   : > { %v1715_v36 = vpop.f32.mrf.mxu2  ;;  %2246 = vmatmul.f32.vlgmr.msra.gmra.mxu3 %v879_v34 }
 0x1bd   : > { %v1716_v12 = vadd.f32 %v1715_v36, %v1603_v39  ;;  %v880_v36 = vld [vmem:[#allocation2 + $0x39] sm:$0xff] }
 0x1bf   : > { %v1829_v23 = vadd.f32 %v5908_v13, %v1716_v12  ;;  %v1947_v3 = vpop.f32.mrf.mxu0 }
 0x1c1   : > { %1765 = vmatmul.f32.gmra.mxu2 %v5910_v19  ;;  %v5981_v46 = vadd.f32 %v1941_v37, %v1829_v23  ;;  %v1843_v6 = vpop.f32.mrf.mxu3  ;;  %v3465_v19 = vld [vmem:[%s7891_s4 + $0x38] sm:$0xff] }
 0x1c2   : > { %1994 = vmatmul.f32.gmra.mxu0 %v715_v62  ;;  %2113 = vmatmul.f32.gmra.mxu1 %v781_v32  ;;  %v882_v32 = vld [vmem:[#allocation2 + $0x51] sm:$0xff] }
 0x1c3   : > { %3610 = vmatpush.msra.mxu1 %v3465_v19 }
 0x1c4   : > { %v1718_v61 = vpop.f32.mrf.mxu2  ;;  %2249 = vmatmul.f32.gmra.mxu3 %v880_v36  ;;  %v944_v36 = vld [vmem:[#allocation2 + $0x3a] sm:$0xff] }
 0x1c5   : > { %v1719_v51 = vadd.f32 %v1718_v61, %v1606_v45  ;;  %v943_v61 = vld [vmem:[#allocation2 + $0x32] sm:$0xff] }
 0x1c7   : > { %v1832_v39 = vadd.f32 %v5925_v29, %v1719_v51  ;;  %v1950_v13 = vpop.f32.mrf.mxu0 }
 0x1c9   : > { %1768 = vmatmul.f32.gmra.mxu2 %v5927_v48  ;;  %v5987_v28 = vadd.f32 %v1944_v38, %v1832_v39  ;;  %v1846_v37 = vpop.f32.mrf.mxu3  ;;  %v881_v48 = vld [vmem:[#allocation2 + $0x49] sm:$0xff] }
 0x1ca   : > { %1997 = vmatmul.f32.gmra.mxu0 %v5932_v26  ;;  %v1612_v26 = vadd.f32 %v5732_v58, %v5730_v30  ;;  %v1615_v30 = vadd.f32 %v5750_v27, %v5747_v0  ;;  %v945_v27 = vld [vmem:[#allocation2 + $0x4a] sm:$0xff] }
 0x1cc   : > { %v1721_v14 = vpop.f32.mrf.mxu2  ;;  %2252 = vmatmul.f32.gmra.mxu3 %v881_v48  ;;  %v884_v48 = vld [vmem:[#allocation2 + $0x69] sm:$0xff] }
 0x1cd   : > { %v1722_v29 = vadd.f32 %v1721_v14, %v1609_v56 }
 0x1cf   : > { %v1835_v12 = vadd.f32 %v5946_v47, %v1722_v29  ;;  %v1953_v23 = vpop.f32.mrf.mxu0  ;;  %v816_v29 = vld [vmem:[#allocation2 + $0x38] sm:$0xff] }
 0x1d1   : > { %1771 = vmatmul.f32.gmra.mxu2 %v5948_v11  ;;  %v5997_v38 = vadd.f32 %v1947_v3, %v1835_v12  ;;  %v1849_v34 = vpop.f32.mrf.mxu3  ;;  %v3464_v11 = vld [vmem:[%s7891_s4 + $0x30] sm:$0xff] }
 0x1d2   : > { %2000 = vmatmul.f32.gmra.mxu0 %v5953_v4  ;;  %3611 = vmatpush.msra.mxu1 %v3464_v11 }
 0x1d4   : > { %v1724_v62 = vpop.f32.mrf.mxu2  ;;  %2255 = vmatmul.f32.gmra.mxu3 %v882_v32  ;;  %v885_v32 = vld [vmem:[#allocation2 + $0x79] sm:$0xff] }
 0x1d5   : > { %v1725_v20 = vadd.f32 %v1724_v62, %v1612_v26 }
 0x1d7   : > { %v1838_v21 = vadd.f32 %v1837_v50, %v1725_v20  ;;  %v1956_v45 = vpop.f32.mrf.mxu0  ;;  %v815_v50 = vld [vmem:[#allocation2 + $0x30] sm:$0xff] }
 0x1d9   : > { %1774 = vmatmul.f32.gmra.mxu2 %v779_v44  ;;  %v6002_v47 = vadd.f32 %v1950_v13, %v1838_v21  ;;  %v1852_v4 = vpop.f32.mrf.mxu3  ;;  %v883_v44 = vld [vmem:[#allocation2 + $0x61] sm:$0xff] }
 0x1da   : > { %2359 = vmatmul.f32.vlgmr.msra.gmra.mxu0 %v943_v61  ;;  %v946_v61 = vld [vmem:[#allocation2 + $0x52] sm:$0xff] }
 0x1dc   : > { %v1727_v58 = vpop.f32.mrf.mxu2  ;;  %2258 = vmatmul.f32.gmra.mxu3 %v883_v44  ;;  %v886_v44 = vld [vmem:[#allocation2 + $0x81] sm:$0xff] }
 0x1dd   : > { %v1728_v3 = vadd.f32 %v1727_v58, %v1615_v30 }
 0x1df   : > { %v1841_v51 = vadd.f32 %v1840_v16, %v1728_v3  ;;  %v1959_v39 = vpop.f32.mrf.mxu0  ;;  %v3463_v16 = vld [vmem:[%s7891_s4 + $0x28] sm:$0xff] }
 0x1e0   : > { %3612 = vmatpush.msra.mxu1 %v3463_v16  ;;  %v887_v16 = vld [vmem:[#allocation2 + $0x91] sm:$0xff] }
 0x1e1   : > { %2133 = vmatmul.f32.vlgmr.msra.gmra.mxu2 %v815_v50  ;;  %v6009_v13 = vadd.f32 %v1953_v23, %v1841_v51  ;;  %v1855_v56 = vpop.f32.mrf.mxu3  ;;  %v818_v50 = vld [vmem:[#allocation2 + $0x50] sm:$0xff] }
 0x1e2   : > { %2362 = vmatmul.f32.gmra.mxu0 %v944_v36 }
 0x1e4   : > { %v1730_v19 = vpop.f32.mrf.mxu2  ;;  %2261 = vmatmul.f32.gmra.mxu3 %v884_v48  ;;  %v948_v48 = vld [vmem:[#allocation2 + $0x6a] sm:$0xff] }
 0x1e5   : > { %v1731_v14 = vadd.f32 %v1730_v19, %v5569_v24  ;;  %v817_v24 = vld [vmem:[#allocation2 + $0x48] sm:$0xff] }
 0x1e7   : > { %v1844_v12 = vadd.f32 %v1843_v6, %v1731_v14  ;;  %v1962_v0 = vpop.f32.mrf.mxu0 }
 0x1e9   : > { %2136 = vmatmul.f32.gmra.mxu2 %v816_v29  ;;  %v6012_v26 = vadd.f32 %v1956_v45, %v1844_v12  ;;  %v1858_v62 = vpop.f32.mrf.mxu3  ;;  %v6020_v45 = vpop.f32.mrf.mxu1 }
 0x1ea   : > { %2365 = vmatmul.f32.gmra.mxu0 %v945_v27 }
 0x1ec   : > { %v1733_v23 = vpop.f32.mrf.mxu2  ;;  %2264 = vmatmul.f32.gmra.mxu3 %v885_v32 }
 0x1ed   : > { %v1734_v20 = vadd.f32 %v1733_v23, %v5580_v35  ;;  %v947_v35 = vld [vmem:[#allocation2 + $0x62] sm:$0xff] }
 0x1ef   : > { %v1847_v21 = vadd.f32 %v1846_v37, %v1734_v20  ;;  %v1965_v6 = vpop.f32.mrf.mxu0 }
 0x1f1   : > { %2139 = vmatmul.f32.gmra.mxu2 %v817_v24  ;;  %v6018_v11 = vadd.f32 %v1959_v39, %v1847_v21  ;;  %v1861_v58 = vpop.f32.mrf.mxu3  ;;  %v3462_v39 = vld [vmem:[%s7891_s4 + $0x20] sm:$0xff]  ;;  %v6028_v29 = vpop.f32.mrf.mxu1  ;;  %v820_v21 = vld [vmem:[#allocation2 + $0x68] sm:$0xff] }
 0x1f2   : > { %2368 = vmatmul.f32.gmra.mxu0 %v946_v61  ;;  %3613 = vmatpush.msra.mxu1 %v3462_v39  ;;  %v950_v39 = vld [vmem:[#allocation2 + $0x82] sm:$0xff] }
 0x1f4   : > { %v1736_v30 = vpop.f32.mrf.mxu2  ;;  %2267 = vmatmul.f32.gmra.mxu3 %v886_v44 }
 0x1f5   : > { %v1737_v3 = vadd.f32 %v1736_v30, %v5594_v42 }
 0x1f7   : > { %v1850_v51 = vadd.f32 %v1849_v34, %v1737_v3  ;;  %v1968_v36 = vpop.f32.mrf.mxu0  ;;  %v819_v34 = vld [vmem:[#allocation2 + $0x60] sm:$0xff] }
 0x1f8   : > { %v888_v3 = vld [vmem:[#allocation2 + $0x99] sm:$0xff] }
 0x1f9   : > { %2142 = vmatmul.f32.gmra.mxu2 %v818_v50  ;;  %v6023_v37 = vadd.f32 %v1962_v0, %v1850_v51  ;;  %v1864_v14 = vpop.f32.mrf.mxu3  ;;  %v6034_v61 = vpop.f32.mrf.mxu1 }
 0x1fa   : > { %2371 = vmatmul.f32.gmra.mxu0 %v947_v35  ;;  %v821_v35 = vld [vmem:[#allocation2 + $0x78] sm:$0xff] }
 0x1fc   : > { %v1739_v19 = vpop.f32.mrf.mxu2  ;;  %2270 = vmatmul.f32.gmra.mxu3 %v887_v16  ;;  %v822_v16 = vld [vmem:[#allocation2 + $0x80] sm:$0xff] }
 0x1fd   : > { %v1740_v42 = vadd.f32 %v1739_v19, %v5605_v52  ;;  %v949_v52 = vld [vmem:[#allocation2 + $0x7a] sm:$0xff]  ;;  %v889_v19 = vld [vmem:[#allocation2 + $0xa9] sm:$0xff] }
 0x1ff   : > { %v1853_v12 = vadd.f32 %v1852_v4, %v1740_v42  ;;  %v1971_v27 = vpop.f32.mrf.mxu0 }
 0x201   : > { %2145 = vmatmul.f32.gmra.mxu2 %v819_v34  ;;  %v6031_v0 = vadd.f32 %v1965_v6, %v1853_v12  ;;  %v1867_v20 = vpop.f32.mrf.mxu3  ;;  %v3461_v6 = vld [vmem:[%s7891_s4 + $0x18] sm:$0xff]  ;;  %v6042_v42 = vpop.f32.mrf.mxu1 }
 0x202   : > { %2374 = vmatmul.f32.gmra.mxu0 %v948_v48  ;;  %3614 = vmatpush.msra.mxu1 %v3461_v6 }
 0x204   : > { %v1742_v23 = vpop.f32.mrf.mxu2  ;;  %2273 = vmatmul.f32.gmra.mxu3 %v888_v3 }
 0x205   : > { %v1743_v24 = vadd.f32 %v1742_v23, %v5619_v2 }
 0x207   : > { %v1856_v32 = vadd.f32 %v1855_v56, %v1743_v24  ;;  %v1974_v30 = vpop.f32.mrf.mxu0 }
 0x209   : > { %2148 = vmatmul.f32.gmra.mxu2 %v820_v21  ;;  %v6036_v4 = vadd.f32 %v1968_v36, %v1856_v32  ;;  %v1870_v51 = vpop.f32.mrf.mxu3  ;;  %v890_v21 = vld [vmem:[#allocation2 + $0xb1] sm:$0xff]  ;;  %v6052_v32 = vpop.f32.mrf.mxu1 }
 0x20a   : > { %2377 = vmatmul.f32.gmra.mxu0 %v949_v52 }
 0x20c   : > { %v1745_v50 = vpop.f32.mrf.mxu2  ;;  %2276 = vmatmul.f32.gmra.mxu3 %v889_v19 }
 0x20d   : > { %v1746_v2 = vadd.f32 %v1745_v50, %v5630_v15  ;;  %v951_v15 = vld [vmem:[#allocation2 + $0x92] sm:$0xff] }
 0x20f   : > { %v1859_v44 = vadd.f32 %v1858_v62, %v1746_v2  ;;  %v1977_v56 = vpop.f32.mrf.mxu0  ;;  %v952_v2 = vld [vmem:[#allocation2 + $0x9a] sm:$0xff] }
 0x211   : > { %2151 = vmatmul.f32.gmra.mxu2 %v821_v35  ;;  %v6044_v36 = vadd.f32 %v1971_v27, %v1859_v44  ;;  %v1873_v12 = vpop.f32.mrf.mxu3  ;;  %v3460_v27 = vld [vmem:[%s7891_s4 + $0x10] sm:$0xff]  ;;  %v891_v35 = vld [vmem:[#allocation2 + $0xc1] sm:$0xff]  ;;  %v6057_v19 = vpop.f32.mrf.mxu1 }
 0x212   : > { %2380 = vmatmul.f32.gmra.mxu0 %v950_v39  ;;  %3615 = vmatpush.msra.mxu1 %v3460_v27 }
 0x214   : > { %v1748_v34 = vpop.f32.mrf.mxu2  ;;  %2279 = vmatmul.f32.gmra.mxu3 %v890_v21 }
 0x215   : > { %v1749_v48 = vadd.f32 %v1748_v34, %v5642_v22 }
 0x217   : > { %v1862_v23 = vadd.f32 %v1861_v58, %v1749_v48  ;;  %v1980_v24 = vpop.f32.mrf.mxu0  ;;  %v823_v58 = vld [vmem:[#allocation2 + $0x90] sm:$0xff]  ;;  %v824_v48 = vld [vmem:[#allocation2 + $0x98] sm:$0xff] }
 0x219   : > { %2154 = vmatmul.f32.gmra.mxu2 %v822_v16  ;;  %v6047_v62 = vadd.f32 %v1974_v30, %v1862_v23  ;;  %v1876_v3 = vpop.f32.mrf.mxu3 }
 0x21a   : > { %2383 = vmatmul.f32.gmra.mxu0 %v951_v15  ;;  %v892_v15 = vld [vmem:[#allocation2 + $0xc9] sm:$0xff] }
 0x21c   : > { %v1751_v52 = vpop.f32.mrf.mxu2  ;;  %2282 = vmatmul.f32.gmra.mxu3 %v891_v35 }
 0x21d   : > { %v1752_v22 = vadd.f32 %v1751_v52, %v5653_v31  ;;  %v953_v31 = vld [vmem:[#allocation2 + $0xaa] sm:$0xff] }
 0x21f   : > { %v1865_v6 = vadd.f32 %v1864_v14, %v1752_v22  ;;  %v1983_v50 = vpop.f32.mrf.mxu0  ;;  %v6066_v22 = vpop.f32.mrf.mxu1 }
 0x221   : > { %2157 = vmatmul.f32.gmra.mxu2 %v823_v58  ;;  %v6055_v30 = vadd.f32 %v1977_v56, %v1865_v6  ;;  %v1879_v39 = vpop.f32.mrf.mxu3  ;;  %v3459_v56 = vld [vmem:[%s7891_s4 + $0x8] sm:$0xff]  ;;  %v893_v6 = vld [vmem:[#allocation2 + $0xd9] sm:$0xff] }
 0x222   : > { %2386 = vmatmul.f32.gmra.mxu0 %v952_v2  ;;  %3616 = vmatpush.msra.mxu1 %v3459_v56  ;;  %v7945_v2 = vld [vmem:[#allocation5_spill] sm:$0xff] }
 0x223   : > { %7942 = vst [vmem:[#allocation14_spill] sm:$0xff] %v6055_v30  ;;  %v968_v30 = vld [vmem:[#allocation2 + $0x15a] sm:$0xff] }
 0x224   : > { %v1754_v44 = vpop.f32.mrf.mxu2  ;;  %2285 = vmatmul.f32.gmra.mxu3 %v892_v15  ;;  %v894_v15 = vld [vmem:[#allocation2 + $0xe1] sm:$0xff] }
 0x225   : > { %v1755_v34 = vadd.f32 %v1754_v44, %v5667_v40  ;;  %v825_v40 = vld [vmem:[#allocation2 + $0xa8] sm:$0xff] }
 0x227   : > { %v1868_v16 = vadd.f32 %v1867_v20, %v1755_v34  ;;  %v1986_v23 = vpop.f32.mrf.mxu0  ;;  %v7946_v34 = vld [vmem:[#allocation6_spill] sm:$0xff]  ;;  %v6074_v56 = vpop.f32.mrf.mxu1 }
 0x229   : > { %2160 = vmatmul.f32.gmra.mxu2 %v824_v48  ;;  %v6060_v14 = vadd.f32 %v1980_v24, %v1868_v16  ;;  %v1882_v27 = vpop.f32.mrf.mxu3  ;;  %v826_v16 = vld [vmem:[#allocation2 + $0xb0] sm:$0xff] }
 0x22a   : > { %2389 = vmatmul.f32.gmra.mxu0 %v953_v31 }
 0x22b   : > { %7943 = vst [vmem:[#allocation15_spill] sm:$0xff] %v6060_v14 }
 0x22c   : > { %v1757_v21 = vpop.f32.mrf.mxu2  ;;  %2288 = vmatmul.f32.gmra.mxu3 %v893_v6  ;;  %v827_v6 = vld [vmem:[#allocation2 + $0xc0] sm:$0xff] }
 0x22d   : > { %v1758_v52 = vadd.f32 %v1757_v21, %v5680_v55  ;;  %v7948_v21 = vld [vmem:[#allocation7_spill] sm:$0xff] }
 0x22f   : > { %v1871_v20 = vadd.f32 %v1870_v51, %v1758_v52  ;;  %v1989_v58 = vpop.f32.mrf.mxu0 }
 0x231   : > { %2163 = vmatmul.f32.gmra.mxu2 %v825_v40  ;;  %v6068_v24 = vadd.f32 %v1983_v50, %v1871_v20  ;;  %v6071_v44 = vpop.f32.mrf.mxu3  ;;  %v3458_v50 = vld [vmem:[%s7891_s4] sm:$0xff]  ;;  %v7949_v20 = vld [vmem:[#allocation8_spill] sm:$0xff] }
 0x232   : > { %2392 = vmatmul.f32.gmra.mxu0 %v7945_v2  ;;  %3617 = vmatpush.msra.mxu1 %v3458_v50  ;;  %v7951_v50 = vld [vmem:[#allocation9_spill] sm:$0xff] }
 0x233   : > { %7944 = vst [vmem:[#allocation16_spill] sm:$0xff] %v6068_v24 }
 0x234   : > { %v1760_v35 = vpop.f32.mrf.mxu2  ;;  %2291 = vmatmul.f32.gmra.mxu3 %v894_v15 }
 0x235   : > { %v1761_v48 = vadd.f32 %v1760_v35, %v7946_v34  ;;  %v3505_v34 = vld [vmem:[%s7891_s4 + $0x178] sm:$0xff] }
 0x236   : > { %3828 = vmatpush.msrb.mxu3 %v3505_v34 }
 0x237   : > { %v1874_v31 = vadd.f32 %v1873_v12, %v1761_v48  ;;  %v1992_v55 = vpop.f32.mrf.mxu0  ;;  %v895_v48 = vld [vmem:[#allocation2 + $0xf1] sm:$0xff] }
 0x239   : > { %2166 = vmatmul.f32.gmra.mxu2 %v826_v16  ;;  %v6076_v51 = vadd.f32 %v1986_v23, %v1874_v31  ;;  %v6082_v40 = vpop.f32.mrf.mxu3  ;;  %v3489_v23 = vld [vmem:[%s7891_s4 + $0xf8] sm:$0xff]  ;;  %v6094_v31 = vpop.f32.mrf.mxu1 }
 0x23a   : > { %2395 = vmatmul.f32.gmra.mxu0 %v7948_v21  ;;  %3715 = vmatpush.msrb.mxu2 %v3489_v23  ;;  %v2593_v23 = vld [vmem:[#allocation3] sm:$0xff] }
 0x23b   : > { %7947 = vst [vmem:[#allocation5_spill] sm:$0xff] %v6076_v51  ;;  %v896_v51 = vld [vmem:[#allocation2 + $0xf9] sm:$0xff]  ;;  %3618 = vmatmul.f32.vlgmr.msra.gmra.mxu1 %v2593_v23 }
 0x23c   : > { %v1763_v52 = vpop.f32.mrf.mxu2  ;;  %2294 = vmatmul.f32.gmra.mxu3 %v895_v48  ;;  %v830_v23 = vld [vmem:[#allocation2 + $0xe0] sm:$0xff] }
 0x23d   : > { %v1764_v12 = vadd.f32 %v1763_v52, %v7949_v20  ;;  %v828_v52 = vld [vmem:[#allocation2 + $0xc8] sm:$0xff] }
 0x23f   : > { %v1877_v2 = vadd.f32 %v1876_v3, %v1764_v12  ;;  %v1995_v35 = vpop.f32.mrf.mxu0 }
 0x241   : > { %2169 = vmatmul.f32.gmra.mxu2 %v827_v6  ;;  %v6091_v16 = vadd.f32 %v1989_v58, %v1877_v2  ;;  %v6096_v15 = vpop.f32.mrf.mxu3  ;;  %v6104_v6 = vpop.f32.mrf.mxu1  ;;  %v7953_v2 = vld [vmem:[#allocation10_spill] sm:$0xff] }
 0x242   : > { %2398 = vmatmul.f32.gmra.mxu0 %v5725_v60 }
 0x243   : > { %7950 = vst [vmem:[#allocation6_spill] sm:$0xff] %v6091_v16 }
 0x244   : > { %v1766_v3 = vpop.f32.mrf.mxu2  ;;  %2297 = vmatmul.f32.gmra.mxu3 %v896_v51  ;;  %v6116_v51 = vld [vmem:[#allocation2 + $0x8] sm:$0xff] }
 0x245   : > { %v1767_v21 = vadd.f32 %v1766_v3, %v7951_v50  ;;  %v829_v3 = vld [vmem:[#allocation2 + $0xd8] sm:$0xff]  ;;  %3621 = vmatmul.f32.gmra.mxu1 %v6116_v51 }
 0x247   : > { %v1880_v20 = vadd.f32 %v1879_v39, %v1767_v21  ;;  %v1998_v12 = vpop.f32.mrf.mxu0  ;;  %v897_v21 = vld [vmem:[#allocation2 + $0x109] sm:$0xff] }
 0x249   : > { %2172 = vmatmul.f32.gmra.mxu2 %v828_v52  ;;  %v6099_v34 = vadd.f32 %v1992_v55, %v1880_v20  ;;  %v6102_v58 = vpop.f32.mrf.mxu3  ;;  %v3521_v55 = vld [vmem:[%s7891_s4 + $0x1f8] sm:$0xff]  ;;  %v7955_v52 = vld [vmem:[#allocation11_spill] sm:$0xff] }
 0x24a   : > { %2401 = vmatmul.f32.gmra.mxu0 %v5742_v49  ;;  %v3537_v49 = vld [vmem:[%s7891_s4 + $0x278] sm:$0xff] }
 0x24b   : > { %7952 = vst [vmem:[#allocation7_spill] sm:$0xff] %v6099_v34  ;;  %4054 = vmatpush.msrb.mxu1 %v3537_v49  ;;  %3941 = vmatpush.msrb.mxu0 %v3521_v55  ;;  %v7957_v49 = vld [vmem:[#allocation12_spill] sm:$0xff] }
 0x24c   : > { %v1769_v60 = vpop.f32.mrf.mxu2  ;;  %2300 = vmatmul.f32.gmra.mxu3 %v897_v21  ;;  %v3504_v21 = vld [vmem:[%s7891_s4 + $0x170] sm:$0xff] }
 0x24d   : > { %v1770_v48 = vadd.f32 %v1769_v60, %v7953_v2  ;;  %v6122_v60 = vpop.f32.mrf.mxu1  ;;  %3829 = vmatpush.msrb.mxu3 %v3504_v21 }
 0x24f   : > { %v1883_v50 = vadd.f32 %v1882_v27, %v1770_v48  ;;  %v2001_v39 = vpop.f32.mrf.mxu0 }
 0x251   : > { %2175 = vmatmul.f32.gmra.mxu2 %v829_v3  ;;  %v6107_v16 = vadd.f32 %v1995_v35, %v1883_v50  ;;  %v6119_v35 = vpop.f32.mrf.mxu3  ;;  %v898_v3 = vld [vmem:[#allocation2 + $0x111] sm:$0xff] }
 0x252   : > { %2404 = vmatmul.f32.gmra.mxu0 %v5760_v8  ;;  %v3488_v50 = vld [vmem:[%s7891_s4 + $0xf0] sm:$0xff] }
 0x253   : > { %7954 = vst [vmem:[#allocation8_spill] sm:$0xff] %v6107_v16  ;;  %3716 = vmatpush.msrb.mxu2 %v3488_v50 }
 0x254   : > { %v1772_v27 = vpop.f32.mrf.mxu2  ;;  %2303 = vmatmul.f32.gmra.mxu3 %v898_v3  ;;  %v3536_v3 = vld [vmem:[%s7891_s4 + $0x270] sm:$0xff] }
 0x255   : > { %v1773_v20 = vadd.f32 %v1772_v27, %v7955_v52  ;;  %4055 = vmatpush.msrb.mxu1 %v3536_v3 }
 0x257   : > { %v1886_v2 = vadd.f32 %v6071_v44, %v1773_v20  ;;  %v2360_v48 = vpop.f32.mrf.mxu0 }
 0x259   : > { %2178 = vmatmul.f32.gmra.mxu2 %v830_v23  ;;  %v6125_v8 = vadd.f32 %v1998_v12, %v1886_v2  ;;  %v6134_v44 = vpop.f32.mrf.mxu3  ;;  %v831_v12 = vld [vmem:[#allocation2 + $0xf0] sm:$0xff]  ;;  %v899_v23 = vld [vmem:[#allocation2 + $0x121] sm:$0xff]  ;;  %v6138_v2 = vpop.f32.mrf.mxu1 }
 0x25a   : > { %2407 = vmatmul.f32.gmra.mxu0 %v5774_v5  ;;  %v3520_v5 = vld [vmem:[%s7891_s4 + $0x1f0] sm:$0xff] }
 0x25b   : > { %7956 = vst [vmem:[#allocation9_spill] sm:$0xff] %v6125_v8  ;;  %3942 = vmatpush.msrb.mxu0 %v3520_v5 }
 0x25c   : > { %v1775_v55 = vpop.f32.mrf.mxu2  ;;  %2306 = vmatmul.f32.gmra.mxu3 %v899_v23 }
 0x25d   : > { %v1776_v27 = vadd.f32 %v1775_v55, %v7957_v49  ;;  %v6156_v49 = vld [vmem:[%s7889_s2] ss:$0 sm:$0xff] }
 0x25f   : > { %v1889_v52 = vadd.f32 %v6082_v40, %v1776_v27  ;;  %v2363_v20 = vpop.f32.mrf.mxu0 }
 0x261   : > { %2181 = vmatmul.f32.gmra.mxu2 %v831_v12  ;;  %v6140_v8 = vadd.f32 %v2001_v39, %v1889_v52  ;;  %v6149_v50 = vpop.f32.mrf.mxu3  ;;  %v832_v39 = vld [vmem:[#allocation2 + $0xf8] sm:$0xff]  ;;  %v900_v12 = vld [vmem:[#allocation2 + $0x129] sm:$0xff]  ;;  %v6170_v23 = vpop.f32.mrf.mxu1 }
 0x262   : > { %2410 = vmatmul.f32.gmra.mxu0 %v5791_v25  ;;  %v6161_v25 = vld [vmem:[%s7890_s3] ss:$0 sm:$0xff] }
 0x263   : > { %7958 = vst [vmem:[#allocation10_spill] sm:$0xff] %v6140_v8 }
 0x264   : > { %v2134_v40 = vpop.f32.mrf.mxu2  ;;  %2309 = vmatmul.f32.gmra.mxu3 %v900_v12 }
 0x265   : > { %v2135_v21 = vadd.f32 %v2134_v40, %v5801_v18  ;;  %v3487_v18 = vld [vmem:[%s7891_s4 + $0xe8] sm:$0xff] }
 0x266   : > { %3717 = vmatpush.msrb.mxu2 %v3487_v18  ;;  %v901_v18 = vld [vmem:[#allocation2 + $0x139] sm:$0xff] }
 0x267   : > { %v2248_v55 = vadd.f32 %v6096_v15, %v2135_v21  ;;  %v2366_v27 = vpop.f32.mrf.mxu0  ;;  %v3503_v15 = vld [vmem:[%s7891_s4 + $0x168] sm:$0xff] }
 0x268   : > { %3830 = vmatpush.msrb.mxu3 %v3503_v15  ;;  %v3519_v15 = vld [vmem:[%s7891_s4 + $0x1e8] sm:$0xff] }
 0x269   : > { %v2361_v52 = vadd.f32 %v2360_v48, %v2248_v55  ;;  %2184 = vmatmul.f32.gmra.mxu2 %v832_v39  ;;  %v6173_v3 = vpop.f32.mrf.mxu3  ;;  %v833_v39 = vld [vmem:[#allocation2 + $0x108] sm:$0xff]  ;;  %3943 = vmatpush.msrb.mxu0 %v3519_v15  ;;  %v3486_v15 = vld [vmem:[%s7891_s4 + $0xe0] sm:$0xff] }
 0x26a   : > { %2413 = vmatmul.f32.gmra.mxu0 %v5808_v9  ;;  %3718 = vmatpush.msrb.mxu2 %v3486_v15 }
 0x26b   : > { %v2460_v48 = vmul.f32 %v6156_v49, %v2361_v52 }
 0x26c   : > { %v2137_v5 = vpop.f32.mrf.mxu2  ;;  %2312 = vmatmul.f32.gmra.mxu3 %v901_v18 }
 0x26d   : > { %v6176_v40 = vadd.f32 %v6161_v25, %v2460_v48  ;;  %v2138_v21 = vadd.f32 %v2137_v5, %v5818_v59  ;;  %v3535_v59 = vld [vmem:[%s7891_s4 + $0x268] sm:$0xff] }
 0x26e   : > { %4056 = vmatpush.msrb.mxu1 %v3535_v59 }
 0x26f   : > { %v7897_v55 = vmax.f32 %v6176_v40, 0.0  ;;  %v2251_v12 = vadd.f32 %v6102_v58, %v2138_v21  ;;  %v2369_v9 = vpop.f32.mrf.mxu0 }
 0x271   : > { %2561 = vst [vmem:[#allocation3 + $0x19] sm:$0xff] %v7897_v55  ;;  %v2364_v52 = vadd.f32 %v2363_v20, %v2251_v12  ;;  %2187 = vmatmul.f32.gmra.mxu2 %v833_v39  ;;  %v6191_v5 = vpop.f32.mrf.mxu3  ;;  %v6193_v20 = vpop.f32.mrf.mxu1  ;;  %v834_v12 = vld [vmem:[#allocation2 + $0x110] sm:$0xff] }
 0x272   : > { %2416 = vmatmul.f32.gmra.mxu0 %v5825_v57 }
 0x273   : > { %v2461_v58 = vmul.f32 %v6156_v49, %v2364_v52 }
 0x274   : > { %v2140_v48 = vpop.f32.mrf.mxu2 }
 0x275   : > { %v6196_v21 = vadd.f32 %v6161_v25, %v2461_v58  ;;  %v2141_v39 = vadd.f32 %v2140_v48, %v5835_v17  ;;  %v3502_v17 = vld [vmem:[%s7891_s4 + $0x160] sm:$0xff] }
 0x276   : > { %v902_v58 = vld [vmem:[#allocation2 + $0x141] sm:$0xff]  ;;  %3831 = vmatpush.msrb.mxu3 %v3502_v17 }
 0x277   : > { %v7898_v55 = vmax.f32 %v6196_v21, 0.0  ;;  %v2254_v18 = vadd.f32 %v6119_v35, %v2141_v39  ;;  %v2372_v57 = vpop.f32.mrf.mxu0  ;;  %2315 = vmatmul.f32.gmra.mxu3 %v902_v58  ;;  %v3534_v17 = vld [vmem:[%s7891_s4 + $0x260] sm:$0xff]  ;;  %v903_v58 = vld [vmem:[#allocation2 + $0x151] sm:$0xff] }
 0x278   : > { %v6201_v59 = vld [vmem:[#allocation3 + $0x18] sm:$0xff]  ;;  %4057 = vmatpush.msrb.mxu1 %v3534_v17 }
 0x279   : > { %2562 = vst [vmem:[#allocation3 + $0x21] sm:$0xff] %v7898_v55  ;;  %v2367_v52 = vadd.f32 %v2366_v27, %v2254_v18  ;;  %2190 = vmatmul.f32.gmra.mxu2 %v834_v12  ;;  %3624 = vmatmul.f32.gmra.mxu1 %v6201_v59  ;;  %v6214_v27 = vpop.f32.mrf.mxu3  ;;  %v835_v18 = vld [vmem:[#allocation2 + $0x120] sm:$0xff]  ;;  %v6220_v55 = vpop.f32.mrf.mxu1 }
 0x27a   : > { %2419 = vmatmul.f32.gmra.mxu0 %v5842_v1 }
 0x27b   : > { %v2462_v35 = vmul.f32 %v6156_v49, %v2367_v52 }
 0x27c   : > { %v2143_v48 = vpop.f32.mrf.mxu2 }
 0x27d   : > { %v6217_v39 = vadd.f32 %v6161_v25, %v2462_v35  ;;  %v2144_v12 = vadd.f32 %v2143_v48, %v5852_v41  ;;  %v3518_v41 = vld [vmem:[%s7891_s4 + $0x1e0] sm:$0xff] }
 0x27e   : > { %3944 = vmatpush.msrb.mxu0 %v3518_v41 }
 0x27f   : > { %v7899_v8 = vmax.f32 %v6217_v39, 0.0  ;;  %v2257_v1 = vadd.f32 %v6134_v44, %v2144_v12  ;;  %v2375_v15 = vpop.f32.mrf.mxu0  ;;  %2318 = vmatmul.f32.gmra.mxu3 %v903_v58  ;;  %v904_v58 = vld [vmem:[#allocation2 + $0x159] sm:$0xff] }
 0x280   : > { %v6224_v16 = vld [vmem:[#allocation3 + $0x20] sm:$0xff] }
 0x281   : > { %2563 = vst [vmem:[#allocation3 + $0x31] sm:$0xff] %v7899_v8  ;;  %v2370_v52 = vadd.f32 %v2369_v9, %v2257_v1  ;;  %2193 = vmatmul.f32.gmra.mxu2 %v835_v18  ;;  %3627 = vmatmul.f32.gmra.mxu1 %v6224_v16  ;;  %v6237_v9 = vpop.f32.mrf.mxu3  ;;  %v836_v18 = vld [vmem:[#allocation2 + $0x128] sm:$0xff] }
 0x282   : > { %2422 = vmatmul.f32.gmra.mxu0 %v5859_v63  ;;  %v965_v63 = vld [vmem:[#allocation2 + $0x13a] sm:$0xff] }
 0x283   : > { %v2463_v44 = vmul.f32 %v6156_v49, %v2370_v52  ;;  %v6247_v52 = vpop.f32.mrf.mxu1 }
 0x284   : > { %v2146_v35 = vpop.f32.mrf.mxu2  ;;  %7959 = vst [vmem:[#allocation11_spill] sm:$0xff] %v6247_v52  ;;  %v967_v52 = vld [vmem:[#allocation2 + $0x152] sm:$0xff] }
 0x285   : > { %v6240_v48 = vadd.f32 %v6161_v25, %v2463_v44  ;;  %v2147_v12 = vadd.f32 %v2146_v35, %v5869_v54  ;;  %v3485_v54 = vld [vmem:[%s7891_s4 + $0xd8] sm:$0xff] }
 0x286   : > { %3719 = vmatpush.msrb.mxu2 %v3485_v54 }
 0x287   : > { %v7900_v1 = vmax.f32 %v6240_v48, 0.0  ;;  %v2260_v8 = vadd.f32 %v6149_v50, %v2147_v12  ;;  %v2378_v34 = vpop.f32.mrf.mxu0  ;;  %v3501_v50 = vld [vmem:[%s7891_s4 + $0x158] sm:$0xff]  ;;  %2321 = vmatmul.f32.gmra.mxu3 %v904_v58 }
 0x288   : > { %v6245_v17 = vld [vmem:[#allocation3 + $0x30] sm:$0xff]  ;;  %3832 = vmatpush.msrb.mxu3 %v3501_v50  ;;  %v3533_v50 = vld [vmem:[%s7891_s4 + $0x258] sm:$0xff] }
 0x289   : > { %2564 = vst [vmem:[#allocation3 + $0x39] sm:$0xff] %v7900_v1  ;;  %v2373_v41 = vadd.f32 %v2372_v57, %v2260_v8  ;;  %2196 = vmatmul.f32.gmra.mxu2 %v836_v18  ;;  %3630 = vmatmul.f32.gmra.mxu1 %v6245_v17  ;;  %v6259_v8 = vpop.f32.mrf.mxu3  ;;  %v837_v18 = vld [vmem:[#allocation2 + $0x138] sm:$0xff] }
 0x28a   : > { %2425 = vmatmul.f32.gmra.mxu0 %v965_v63  ;;  %v966_v63 = vld [vmem:[#allocation2 + $0x142] sm:$0xff]  ;;  %4058 = vmatpush.msrb.mxu1 %v3533_v50 }
 0x28b   : > { %v2464_v44 = vmul.f32 %v6156_v49, %v2373_v41  ;;  %v6278_v58 = vpop.f32.mrf.mxu1 }
 0x28c   : > { %v2149_v35 = vpop.f32.mrf.mxu2  ;;  %7960 = vst [vmem:[#allocation12_spill] sm:$0xff] %v6278_v58 }
 0x28d   : > { %v6262_v57 = vadd.f32 %v6161_v25, %v2464_v44  ;;  %v2150_v12 = vadd.f32 %v2149_v35, %v5886_v33  ;;  %v3517_v33 = vld [vmem:[%s7891_s4 + $0x1d8] sm:$0xff] }
 0x28e   : > { %3945 = vmatpush.msrb.mxu0 %v3517_v33  ;;  %v3500_v33 = vld [vmem:[%s7891_s4 + $0x150] sm:$0xff] }
 0x28f   : > { %v7901_v1 = vmax.f32 %v6262_v57, 0.0  ;;  %v2263_v24 = vadd.f32 %v6173_v3, %v2150_v12  ;;  %v2381_v14 = vpop.f32.mrf.mxu0  ;;  %v905_v3 = vld [vmem:[#allocation2 + $0x169] sm:$0xff]  ;;  %3833 = vmatpush.msrb.mxu3 %v3500_v33 }
 0x290   : > { %v6267_v54 = vld [vmem:[#allocation3 + $0x38] sm:$0xff]  ;;  %2324 = vmatmul.f32.gmra.mxu3 %v905_v3 }
 0x291   : > { %2565 = vst [vmem:[#allocation3 + $0x49] sm:$0xff] %v7901_v1  ;;  %v2376_v41 = vadd.f32 %v2375_v15, %v2263_v24  ;;  %2199 = vmatmul.f32.gmra.mxu2 %v837_v18  ;;  %3633 = vmatmul.f32.gmra.mxu1 %v6267_v54  ;;  %v6281_v15 = vpop.f32.mrf.mxu3  ;;  %v838_v18 = vld [vmem:[#allocation2 + $0x140] sm:$0xff] }
 0x292   : > { %2428 = vmatmul.f32.gmra.mxu0 %v966_v63 }
 0x293   : > { %v2465_v44 = vmul.f32 %v6156_v49, %v2376_v41 }
 0x294   : > { %v2152_v24 = vpop.f32.mrf.mxu2 }
 0x295   : > { %v6284_v35 = vadd.f32 %v6161_v25, %v2465_v44  ;;  %v2153_v12 = vadd.f32 %v2152_v24, %v5903_v10  ;;  %v3484_v10 = vld [vmem:[%s7891_s4 + $0xd0] sm:$0xff]  ;;  %v6303_v24 = vpop.f32.mrf.mxu1 }
 0x296   : > { %3720 = vmatpush.msrb.mxu2 %v3484_v10  ;;  %7961 = vst [vmem:[#allocation17_spill] sm:$0xff] %v6303_v24 }
 0x297   : > { %v7902_v1 = vmax.f32 %v6284_v35, 0.0  ;;  %v2266_v63 = vadd.f32 %v6191_v5, %v2153_v12  ;;  %v2384_v50 = vpop.f32.mrf.mxu0  ;;  %v906_v5 = vld [vmem:[#allocation2 + $0x171] sm:$0xff] }
 0x298   : > { %v6289_v58 = vld [vmem:[#allocation3 + $0x48] sm:$0xff]  ;;  %2327 = vmatmul.f32.gmra.mxu3 %v906_v5  ;;  %v3532_v5 = vld [vmem:[%s7891_s4 + $0x250] sm:$0xff] }
 0x299   : > { %2566 = vst [vmem:[#allocation3 + $0x51] sm:$0xff] %v7902_v1  ;;  %v2379_v41 = vadd.f32 %v2378_v34, %v2266_v63  ;;  %2202 = vmatmul.f32.gmra.mxu2 %v838_v18  ;;  %3636 = vmatmul.f32.gmra.mxu1 %v6289_v58  ;;  %v6301_v34 = vpop.f32.mrf.mxu3  ;;  %v839_v63 = vld [vmem:[#allocation2 + $0x150] sm:$0xff] }
 0x29a   : > { %2431 = vmatmul.f32.gmra.mxu0 %v967_v52  ;;  %4059 = vmatpush.msrb.mxu1 %v3532_v5 }
 0x29b   : > { %v2466_v3 = vmul.f32 %v6156_v49, %v2379_v41 }
 0x29c   : > { %v2155_v44 = vpop.f32.mrf.mxu2 }
 0x29d   : > { %v6306_v12 = vadd.f32 %v6161_v25, %v2466_v3  ;;  %v2156_v18 = vadd.f32 %v2155_v44, %v5920_v43  ;;  %v3516_v43 = vld [vmem:[%s7891_s4 + $0x1d0] sm:$0xff]  ;;  %v2046_v3 = vadd.f32 %v6020_v45, %v5935_v53  ;;  %v6330_v24 = vpop.f32.mrf.mxu1 }
 0x29e   : > { %3946 = vmatpush.msrb.mxu0 %v3516_v43  ;;  %7964 = vst [vmem:[#allocation20_spill] sm:$0xff] %v6330_v24  ;;  %v969_v53 = vld [vmem:[#allocation2 + $0x16a] sm:$0xff] }
 0x29f   : > { %7962 = vst [vmem:[#allocation18_spill] sm:$0xff] %v6306_v12  ;;  %v7903_v1 = vmax.f32 %v6306_v12, 0.0  ;;  %v2269_v52 = vadd.f32 %v6214_v27, %v2156_v18  ;;  %v2387_v10 = vpop.f32.mrf.mxu0  ;;  %v907_v27 = vld [vmem:[#allocation2 + $0x181] sm:$0xff] }
 0x2a0   : > { %v6311_v41 = vld [vmem:[#allocation3 + $0x50] sm:$0xff]  ;;  %2330 = vmatmul.f32.gmra.mxu3 %v907_v27  ;;  %v3483_v43 = vld [vmem:[%s7891_s4 + $0xc8] sm:$0xff] }
 0x2a1   : > { %2567 = vst [vmem:[#allocation3 + $0x61] sm:$0xff] %v7903_v1  ;;  %v2382_v33 = vadd.f32 %v2381_v14, %v2269_v52  ;;  %2205 = vmatmul.f32.gmra.mxu2 %v839_v63  ;;  %3639 = vmatmul.f32.gmra.mxu1 %v6311_v41  ;;  %v6325_v18 = vpop.f32.mrf.mxu3  ;;  %v840_v1 = vld [vmem:[#allocation2 + $0x158] sm:$0xff]  ;;  %v908_v27 = vld [vmem:[#allocation2 + $0x189] sm:$0xff] }
 0x2a2   : > { %2434 = vmatmul.f32.gmra.mxu0 %v968_v30  ;;  %3721 = vmatpush.msrb.mxu2 %v3483_v43 }
 0x2a3   : > { %v2467_v44 = vmul.f32 %v6156_v49, %v2382_v33 }
 0x2a4   : > { %v2158_v14 = vpop.f32.mrf.mxu2 }
 0x2a5   : > { %v6328_v63 = vadd.f32 %v6161_v25, %v2467_v44  ;;  %v2159_v52 = vadd.f32 %v2158_v14, %v2046_v3  ;;  %v7965_v3 = vld [vmem:[#allocation13_spill] sm:$0xff] }
 0x2a6   : > { %v2049_v44 = vadd.f32 %v6028_v29, %v7965_v3  ;;  %v3498_v3 = vld [vmem:[%s7891_s4 + $0x140] sm:$0xff] }
 0x2a7   : > { %7963 = vst [vmem:[#allocation19_spill] sm:$0xff] %v6328_v63  ;;  %v7905_v30 = vmax.f32 %v6328_v63, 0.0  ;;  %v2272_v5 = vadd.f32 %v6237_v9, %v2159_v52  ;;  %v6334_v12 = vpop.f32.mrf.mxu0  ;;  %v3499_v9 = vld [vmem:[%s7891_s4 + $0x148] sm:$0xff] }
 0x2a8   : > { %v6336_v45 = vld [vmem:[#allocation3 + $0x60] sm:$0xff]  ;;  %3834 = vmatpush.msrb.mxu3 %v3499_v9  ;;  %v971_v63 = vld [vmem:[#allocation2 + $0x182] sm:$0xff] }
 0x2a9   : > { %2568 = vst [vmem:[#allocation3 + $0x69] sm:$0xff] %v7905_v30  ;;  %v2385_v33 = vadd.f32 %v2384_v50, %v2272_v5  ;;  %2208 = vmatmul.f32.gmra.mxu2 %v840_v1  ;;  %3642 = vmatmul.f32.gmra.mxu1 %v6336_v45  ;;  %v6350_v50 = vpop.f32.mrf.mxu3  ;;  %v3515_v30 = vld [vmem:[%s7891_s4 + $0x1c8] sm:$0xff]  ;;  %v970_v9 = vld [vmem:[#allocation2 + $0x172] sm:$0xff] }
 0x2aa   : > { %2437 = vmatmul.f32.gmra.mxu0 %v969_v53  ;;  %2333 = vmatmul.f32.gmra.mxu3 %v908_v27  ;;  %v841_v53 = vld [vmem:[#allocation2 + $0x168] sm:$0xff]  ;;  %v3482_v27 = vld [vmem:[%s7891_s4 + $0xc0] sm:$0xff] }
 0x2ab   : > { %v2468_v14 = vmul.f32 %v6156_v49, %v2385_v33  ;;  %3947 = vmatpush.msrb.mxu0 %v3515_v30  ;;  %3722 = vmatpush.msrb.mxu2 %v3482_v27  ;;  %v3514_v30 = vld [vmem:[%s7891_s4 + $0x1c0] sm:$0xff]  ;;  %v3481_v27 = vld [vmem:[%s7891_s4 + $0xb8] sm:$0xff] }
 0x2ac   : > { %v2161_v1 = vpop.f32.mrf.mxu2  ;;  %3835 = vmatpush.msrb.mxu3 %v3498_v3  ;;  %v3497_v3 = vld [vmem:[%s7891_s4 + $0x138] sm:$0xff] }
 0x2ad   : > { %v6353_v52 = vadd.f32 %v6161_v25, %v2468_v14  ;;  %v2162_v5 = vadd.f32 %v2161_v1, %v2049_v44  ;;  %v3531_v1 = vld [vmem:[%s7891_s4 + $0x248] sm:$0xff]  ;;  %3948 = vmatpush.msrb.mxu0 %v3514_v30  ;;  %3723 = vmatpush.msrb.mxu2 %v3481_v27 }
 0x2ae   : > { %4060 = vmatpush.msrb.mxu1 %v3531_v1  ;;  %3836 = vmatpush.msrb.mxu3 %v3497_v3  ;;  %v3495_v3 = vld [vmem:[%s7891_s4 + $0x128] sm:$0xff] }
 0x2af   : > { %7966 = vst [vmem:[#allocation13_spill] sm:$0xff] %v6353_v52  ;;  %v7906_v43 = vmax.f32 %v6353_v52, 0.0  ;;  %v2275_v29 = vadd.f32 %v6259_v8, %v2162_v5  ;;  %v6360_v33 = vpop.f32.mrf.mxu0  ;;  %v6373_v8 = vpop.f32.mrf.mxu1  ;;  %v909_v5 = vld [vmem:[#allocation2 + $0x199] sm:$0xff] }
 0x2b0   : > { %v6368_v44 = vld [vmem:[#allocation3 + $0x68] sm:$0xff]  ;;  %7967 = vst [vmem:[#allocation21_spill] sm:$0xff] %v6373_v8  ;;  %v3496_v8 = vld [vmem:[%s7891_s4 + $0x130] sm:$0xff] }
 0x2b1   : > { %2569 = vst [vmem:[#allocation3 + $0x79] sm:$0xff] %v7906_v43  ;;  %v2388_v14 = vadd.f32 %v2387_v10, %v2275_v29  ;;  %2211 = vmatmul.f32.gmra.mxu2 %v841_v53  ;;  %3645 = vmatmul.f32.gmra.mxu1 %v6368_v44  ;;  %v3513_v10 = vld [vmem:[%s7891_s4 + $0x1b8] sm:$0xff]  ;;  %v2052_v53 = vadd.f32 %v6034_v61, %v5969_v7  ;;  %v6396_v43 = vpop.f32.mrf.mxu3  ;;  %v3512_v7 = vld [vmem:[%s7891_s4 + $0x1b0] sm:$0xff] }
 0x2b2   : > { %2440 = vmatmul.f32.gmra.mxu0 %v970_v9  ;;  %v3480_v9 = vld [vmem:[%s7891_s4 + $0xb0] sm:$0xff]  ;;  %2336 = vmatmul.f32.gmra.mxu3 %v909_v5 }
 0x2b3   : > { %v2469_v29 = vmul.f32 %v6156_v49, %v2388_v14  ;;  %3949 = vmatpush.msrb.mxu0 %v3513_v10  ;;  %v3479_v14 = vld [vmem:[%s7891_s4 + $0xa8] sm:$0xff]  ;;  %v842_v5 = vld [vmem:[#allocation2 + $0x170] sm:$0xff]  ;;  %3724 = vmatpush.msrb.mxu2 %v3480_v9  ;;  %v3510_v9 = vld [vmem:[%s7891_s4 + $0x1a0] sm:$0xff] }
 0x2b4   : > { %v2164_v1 = vpop.f32.mrf.mxu2  ;;  %3837 = vmatpush.msrb.mxu3 %v3496_v8 }
 0x2b5   : > { %v6405_v61 = vadd.f32 %v6161_v25, %v2469_v29  ;;  %v2165_v30 = vadd.f32 %v2164_v1, %v2052_v53  ;;  %3950 = vmatpush.msrb.mxu0 %v3512_v7  ;;  %3725 = vmatpush.msrb.mxu2 %v3479_v14  ;;  %v3511_v53 = vld [vmem:[%s7891_s4 + $0x1a8] sm:$0xff]  ;;  %v3494_v29 = vld [vmem:[%s7891_s4 + $0x120] sm:$0xff]  ;;  %v2055_v7 = vadd.f32 %v6042_v42, %v5981_v46  ;;  %v3509_v46 = vld [vmem:[%s7891_s4 + $0x198] sm:$0xff] }
 0x2b6   : > { %3838 = vmatpush.msrb.mxu3 %v3495_v3  ;;  %v910_v1 = vld [vmem:[#allocation2 + $0x1a1] sm:$0xff] }
 0x2b7   : > { %v7909_v27 = vmax.f32 %v6405_v61, 0.0  ;;  %v2278_v24 = vadd.f32 %v6281_v15, %v2165_v30  ;;  %v6412_v52 = vpop.f32.mrf.mxu0  ;;  %v3478_v15 = vld [vmem:[%s7891_s4 + $0xa0] sm:$0xff]  ;;  %v6437_v30 = vpop.f32.mrf.mxu1  ;;  %3951 = vmatpush.msrb.mxu0 %v3511_v53  ;;  %v3476_v53 = vld [vmem:[%s7891_s4 + $0x90] sm:$0xff] }
 0x2b8   : > { %v6417_v10 = vld [vmem:[#allocation3 + $0x78] sm:$0xff]  ;;  %7968 = vst [vmem:[#allocation22_spill] sm:$0xff] %v6437_v30  ;;  %3726 = vmatpush.msrb.mxu2 %v3478_v15  ;;  %3839 = vmatpush.msrb.mxu3 %v3494_v29  ;;  %v3492_v15 = vld [vmem:[%s7891_s4 + $0x110] sm:$0xff]  ;;  %v973_v30 = vld [vmem:[#allocation2 + $0x19a] sm:$0xff] }
 0x2b9   : > { %2570 = vst [vmem:[#allocation3 + $0x81] sm:$0xff] %v7909_v27  ;;  %v2391_v8 = vadd.f32 %v6334_v12, %v2278_v24  ;;  %2214 = vmatmul.f32.gmra.mxu2 %v842_v5  ;;  %3648 = vmatmul.f32.gmra.mxu1 %v6417_v10  ;;  %v3477_v12 = vld [vmem:[%s7891_s4 + $0x98] sm:$0xff]  ;;  %v6449_v42 = vpop.f32.mrf.mxu3 }
 0x2ba   : > { %2443 = vmatmul.f32.gmra.mxu0 %v971_v63  ;;  %v3493_v63 = vld [vmem:[%s7891_s4 + $0x118] sm:$0xff]  ;;  %2339 = vmatmul.f32.gmra.mxu3 %v910_v1  ;;  %v3508_v1 = vld [vmem:[%s7891_s4 + $0x190] sm:$0xff] }
 0x2bb   : > { %v2470_v24 = vmul.f32 %v6156_v49, %v2391_v8  ;;  %3952 = vmatpush.msrb.mxu0 %v3510_v9  ;;  %v843_v8 = vld [vmem:[#allocation2 + $0x180] sm:$0xff]  ;;  %3727 = vmatpush.msrb.mxu2 %v3477_v12  ;;  %v3475_v12 = vld [vmem:[%s7891_s4 + $0x88] sm:$0xff] }
 0x2bc   : > { %v2167_v14 = vpop.f32.mrf.mxu2  ;;  %3840 = vmatpush.msrb.mxu3 %v3493_v63  ;;  %v3530_v63 = vld [vmem:[%s7891_s4 + $0x240] sm:$0xff] }
 0x2bd   : > { %v6452_v5 = vadd.f32 %v6161_v25, %v2470_v24  ;;  %v2168_v3 = vadd.f32 %v2167_v14, %v2055_v7  ;;  %v972_v7 = vld [vmem:[#allocation2 + $0x18a] sm:$0xff]  ;;  %3953 = vmatpush.msrb.mxu0 %v3509_v46  ;;  %3728 = vmatpush.msrb.mxu2 %v3476_v53  ;;  %v3490_v53 = vld [vmem:[%s7891_s4 + $0x100] sm:$0xff] }
 0x2be   : > { %3841 = vmatpush.msrb.mxu3 %v3492_v15  ;;  %v3491_v14 = vld [vmem:[%s7891_s4 + $0x108] sm:$0xff]  ;;  %4061 = vmatpush.msrb.mxu1 %v3530_v63 }
 0x2bf   : > { %7969 = vst [vmem:[#allocation23_spill] sm:$0xff] %v6452_v5  ;;  %v7910_v29 = vmax.f32 %v6452_v5, 0.0  ;;  %v2281_v27 = vadd.f32 %v6301_v34, %v2168_v3  ;;  %v6462_v24 = vpop.f32.mrf.mxu0  ;;  %v3507_v46 = vld [vmem:[%s7891_s4 + $0x188] sm:$0xff]  ;;  %3954 = vmatpush.msrb.mxu0 %v3508_v1  ;;  %3729 = vmatpush.msrb.mxu2 %v3475_v12 }
 0x2c0   : > { %v6464_v9 = vld [vmem:[#allocation3 + $0x80] sm:$0xff]  ;;  %3842 = vmatpush.msrb.mxu3 %v3491_v14  ;;  %v844_v1 = vld [vmem:[#allocation2 + $0x188] sm:$0xff] }
 0x2c1   : > { %2571 = vst [vmem:[#allocation3 + $0x91] sm:$0xff] %v7910_v29  ;;  %v2394_v34 = vadd.f32 %v6360_v33, %v2281_v27  ;;  %2217 = vmatmul.f32.gmra.mxu2 %v843_v8  ;;  %3651 = vmatmul.f32.gmra.mxu1 %v6464_v9  ;;  %v3474_v33 = vld [vmem:[%s7891_s4 + $0x80] sm:$0xff]  ;;  %v2058_v27 = vadd.f32 %v6052_v32, %v5987_v28  ;;  %v6497_v63 = vpop.f32.mrf.mxu3  ;;  %v6502_v32 = vpop.f32.mrf.mxu1 }
 0x2c2   : > { %2446 = vmatmul.f32.gmra.mxu0 %v972_v7  ;;  %v3506_v8 = vld [vmem:[%s7891_s4 + $0x180] sm:$0xff]  ;;  %v2721_v7 = vld [vmem:[#allocation3 + $0x2] sm:$0xff]  ;;  %3730 = vmatpush.msrb.mxu2 %v3474_v33  ;;  %v2061_v33 = vadd.f32 %v6057_v19, %v5997_v38 }
 0x2c3   : > { %v2471_v3 = vmul.f32 %v6156_v49, %v2394_v34  ;;  %3955 = vmatpush.msrb.mxu0 %v3507_v46  ;;  %3843 = vmatpush.msrb.mxu3 %v3490_v53 }
 0x2c4   : > { %v2170_v15 = vpop.f32.mrf.mxu2  ;;  %3844 = vmatmul.f32.vlgmr.msrb.gmra.mxu3 %v2721_v7  ;;  %v845_v7 = vld [vmem:[#allocation2 + $0x198] sm:$0xff] }
 0x2c5   : > { %v6500_v29 = vadd.f32 %v6161_v25, %v2471_v3  ;;  %v2171_v28 = vadd.f32 %v2170_v15, %v2058_v27  ;;  %3956 = vmatpush.msrb.mxu0 %v3506_v8  ;;  %v2722_v3 = vld [vmem:[#allocation3 + $0xa] sm:$0xff] }
 0x2c7   : > { %v7925_v12 = vmax.f32 %v6500_v29, 0.0  ;;  %v2284_v34 = vadd.f32 %v6325_v18, %v2171_v28  ;;  %v2402_v14 = vpop.f32.mrf.mxu0 }
 0x2c8   : > { %v6506_v5 = vld [vmem:[#allocation3 + $0x90] sm:$0xff] }
 0x2c9   : > { %2572 = vst [vmem:[#allocation3 + $0x99] sm:$0xff] %v7925_v12  ;;  %v2397_v46 = vadd.f32 %v6412_v52, %v2284_v34  ;;  %2220 = vmatmul.f32.gmra.mxu2 %v844_v1  ;;  %3654 = vmatmul.f32.gmra.mxu1 %v6506_v5  ;;  %v6515_v53 = vpop.f32.mrf.mxu3  ;;  %v6522_v34 = vpop.f32.mrf.mxu1 }
 0x2ca   : > { %2449 = vmatmul.f32.gmra.mxu0 %v973_v30  ;;  %v974_v30 = vld [vmem:[#allocation2 + $0x1a2] sm:$0xff] }
 0x2cb   : > { %v2472_v18 = vmul.f32 %v6156_v49, %v2397_v46  ;;  %v3529_v46 = vld [vmem:[%s7891_s4 + $0x238] sm:$0xff] }
 0x2cc   : > { %v2173_v27 = vpop.f32.mrf.mxu2  ;;  %3847 = vmatmul.f32.gmra.mxu3 %v2722_v3  ;;  %4062 = vmatpush.msrb.mxu1 %v3529_v46 }
 0x2cd   : > { %v6518_v15 = vadd.f32 %v6161_v25, %v2472_v18  ;;  %v2174_v8 = vadd.f32 %v2173_v27, %v2061_v33 }
 0x2cf   : > { %v7912_v52 = vmax.f32 %v6518_v15, 0.0  ;;  %v2287_v28 = vadd.f32 %v6350_v50, %v2174_v8  ;;  %v2405_v1 = vpop.f32.mrf.mxu0  ;;  %v2064_v50 = vadd.f32 %v6066_v22, %v6002_v47 }
 0x2d0   : > { %v6524_v38 = vld [vmem:[#allocation3 + $0x98] sm:$0xff] }
 0x2d1   : > { %2573 = vst [vmem:[#allocation3 + $0xa9] sm:$0xff] %v7912_v52  ;;  %v2400_v19 = vadd.f32 %v6462_v24, %v2287_v28  ;;  %2223 = vmatmul.f32.gmra.mxu2 %v845_v7  ;;  %3657 = vmatmul.f32.gmra.mxu1 %v6524_v38  ;;  %v2723_v24 = vld [vmem:[#allocation3 + $0x1a] sm:$0xff]  ;;  %v6539_v8 = vpop.f32.mrf.mxu3  ;;  %v6549_v22 = vpop.f32.mrf.mxu1 }
 0x2d2   : > { %2452 = vmatmul.f32.gmra.mxu0 %v974_v30 }
 0x2d3   : > { %v2473_v33 = vmul.f32 %v6156_v49, %v2400_v19  ;;  %v2067_v19 = vadd.f32 %v6074_v56, %v6009_v13  ;;  %v3528_v56 = vld [vmem:[%s7891_s4 + $0x230] sm:$0xff] }
 0x2d4   : > { %v2176_v18 = vpop.f32.mrf.mxu2  ;;  %3850 = vmatmul.f32.gmra.mxu3 %v2723_v24  ;;  %4063 = vmatpush.msrb.mxu1 %v3528_v56 }
 0x2d5   : > { %v6537_v27 = vadd.f32 %v6161_v25, %v2473_v33  ;;  %v2177_v3 = vadd.f32 %v2176_v18, %v2064_v50  ;;  %v2657_v18 = vld [vmem:[#allocation3 + $0x1] sm:$0xff] }
 0x2d7   : > { %v7924_v7 = vmax.f32 %v6537_v27, 0.0  ;;  %v2290_v28 = vadd.f32 %v6396_v43, %v2177_v3  ;;  %v2408_v52 = vpop.f32.mrf.mxu0 }
 0x2d8   : > { %v6543_v30 = vld [vmem:[#allocation3 + $0xa8] sm:$0xff] }
 0x2d9   : > { %2574 = vst [vmem:[#allocation3 + $0xb1] sm:$0xff] %v7924_v7  ;;  %v2403_v47 = vadd.f32 %v2402_v14, %v2290_v28  ;;  %2226 = vmatmul.f32.gmra.mxu2 %v6116_v51  ;;  %3660 = vmatmul.f32.gmra.mxu1 %v6543_v30  ;;  %v2724_v14 = vld [vmem:[#allocation3 + $0x22] sm:$0xff]  ;;  %v6558_v3 = vpop.f32.mrf.mxu3 }
 0x2da   : > { %3957 = vmatmul.f32.vlgmr.msrb.gmra.mxu0 %v6201_v59 }
 0x2db   : > { %v2474_v43 = vmul.f32 %v6156_v49, %v2403_v47  ;;  %v6570_v47 = vpop.f32.mrf.mxu1 }
 0x2dc   : > { %v2179_v46 = vpop.f32.mrf.mxu2  ;;  %3853 = vmatmul.f32.gmra.mxu3 %v2724_v14 }
 0x2dd   : > { %v6556_v50 = vadd.f32 %v6161_v25, %v2474_v43  ;;  %v2180_v33 = vadd.f32 %v2179_v46, %v2067_v19 }
 0x2df   : > { %v7913_v51 = vmax.f32 %v6556_v50, 0.0  ;;  %v2293_v24 = vadd.f32 %v6449_v42, %v2180_v33  ;;  %v2411_v28 = vpop.f32.mrf.mxu0  ;;  %v2070_v42 = vadd.f32 %v6094_v31, %v6012_v26  ;;  %v2658_v33 = vld [vmem:[#allocation3 + $0x9] sm:$0xff]  ;;  %v2073_v31 = vadd.f32 %v6104_v6, %v6018_v11 }
 0x2e0   : > { %v6562_v59 = vld [vmem:[#allocation3 + $0xb0] sm:$0xff]  ;;  %v7970_v6 = vmax.f32 %v6176_v40, 0.0 }
 0x2e1   : > { %2575 = vst [vmem:[#allocation3 + $0xc1] sm:$0xff] %v7913_v51  ;;  %v2406_v13 = vadd.f32 %v2405_v1, %v2293_v24  ;;  %3663 = vmatmul.f32.gmra.mxu1 %v6562_v59  ;;  %3731 = vmatmul.f32.vlgmr.msrb.gmra.mxu2 %v2657_v18  ;;  %v2725_v18 = vld [vmem:[#allocation3 + $0x32] sm:$0xff]  ;;  %v6579_v14 = vpop.f32.mrf.mxu3  ;;  %v2727_v40 = vld [vmem:[#allocation3 + $0x4a] sm:$0xff] }
 0x2e2   : > { %3960 = vmatmul.f32.gmra.mxu0 %v6224_v16 }
 0x2e3   : > { %v2475_v19 = vmul.f32 %v6156_v49, %v2406_v13 }
 0x2e4   : > { %v2182_v43 = vpop.f32.mrf.mxu2  ;;  %3856 = vmatmul.f32.gmra.mxu3 %v2725_v18 }
 0x2e5   : > { %v6577_v1 = vadd.f32 %v6161_v25, %v2475_v19  ;;  %v2183_v46 = vadd.f32 %v2182_v43, %v2070_v42 }
 0x2e7   : > { %v7923_v24 = vmax.f32 %v6577_v1, 0.0  ;;  %v2296_v51 = vadd.f32 %v6497_v63, %v2183_v46  ;;  %v2414_v16 = vpop.f32.mrf.mxu0  ;;  %v6592_v63 = vpop.f32.mrf.mxu1  ;;  %v2726_v46 = vld [vmem:[#allocation3 + $0x3a] sm:$0xff] }
 0x2e8   : > { %v6583_v56 = vld [vmem:[#allocation3 + $0xc0] sm:$0xff] }
 0x2e9   : > { %2576 = vst [vmem:[#allocation3 + $0xc9] sm:$0xff] %v7923_v24  ;;  %v2409_v26 = vadd.f32 %v2408_v52, %v2296_v51  ;;  %3666 = vmatmul.f32.gmra.mxu1 %v6583_v56  ;;  %3734 = vmatmul.f32.gmra.mxu2 %v2658_v33  ;;  %v6597_v18 = vpop.f32.mrf.mxu3 }
 0x2ea   : > { %3963 = vmatmul.f32.gmra.mxu0 %v6245_v17 }
 0x2eb   : > { %v2476_v13 = vmul.f32 %v6156_v49, %v2409_v26  ;;  %v3527_v26 = vld [vmem:[%s7891_s4 + $0x228] sm:$0xff] }
 0x2ec   : > { %v2185_v42 = vpop.f32.mrf.mxu2  ;;  %3859 = vmatmul.f32.gmra.mxu3 %v2726_v46  ;;  %4064 = vmatpush.msrb.mxu1 %v3527_v26 }
 0x2ed   : > { %v6595_v19 = vadd.f32 %v6161_v25, %v2476_v13  ;;  %v2186_v43 = vadd.f32 %v2185_v42, %v2073_v31 }
 0x2ef   : > { %v7920_v52 = vmax.f32 %v6595_v19, 0.0  ;;  %v2299_v51 = vadd.f32 %v6515_v53, %v2186_v43  ;;  %v2417_v17 = vpop.f32.mrf.mxu0  ;;  %v2076_v53 = vadd.f32 %v6122_v60, %v6023_v37  ;;  %v7971_v60 = vmax.f32 %v6196_v21, 0.0 }
 0x2f0   : > { %v6601_v33 = vld [vmem:[#allocation3 + $0xc8] sm:$0xff] }
 0x2f1   : > { %2577 = vst [vmem:[#allocation3 + $0xd9] sm:$0xff] %v7920_v52  ;;  %v2412_v11 = vadd.f32 %v2411_v28, %v2299_v51  ;;  %3669 = vmatmul.f32.gmra.mxu1 %v6601_v33  ;;  %3737 = vmatmul.f32.gmra.mxu2 %v7970_v6  ;;  %v6620_v46 = vpop.f32.mrf.mxu3 }
 0x2f2   : > { %3966 = vmatmul.f32.gmra.mxu0 %v6267_v54 }
 0x2f3   : > { %v2477_v31 = vmul.f32 %v6156_v49, %v2412_v11  ;;  %v2079_v11 = vadd.f32 %v6138_v2, %v6031_v0  ;;  %v7972_v2 = vmax.f32 %v6217_v39, 0.0  ;;  %v2729_v39 = vld [vmem:[#allocation3 + $0x62] sm:$0xff] }
 0x2f4   : > { %v2188_v13 = vpop.f32.mrf.mxu2  ;;  %3862 = vmatmul.f32.gmra.mxu3 %v2727_v40 }
 0x2f5   : > { %v6616_v28 = vadd.f32 %v6161_v25, %v2477_v31  ;;  %v2189_v42 = vadd.f32 %v2188_v13, %v2076_v53 }
 0x2f6   : > { %v6618_v43 = vpop.f32.mrf.mxu1 }
 0x2f7   : > { %v7919_v51 = vmax.f32 %v6616_v28, 0.0  ;;  %v2302_v54 = vadd.f32 %v6539_v8, %v2189_v42  ;;  %v2420_v6 = vpop.f32.mrf.mxu0 }
 0x2f8   : > { %v6624_v26 = vld [vmem:[#allocation3 + $0xd8] sm:$0xff] }
 0x2f9   : > { %2578 = vst [vmem:[#allocation3 + $0xe1] sm:$0xff] %v7919_v51  ;;  %v2415_v37 = vadd.f32 %v2414_v16, %v2302_v54  ;;  %3672 = vmatmul.f32.gmra.mxu1 %v6624_v26  ;;  %3740 = vmatmul.f32.gmra.mxu2 %v7971_v60  ;;  %v2728_v16 = vld [vmem:[#allocation3 + $0x52] sm:$0xff] }
 0x2fa   : > { %3969 = vmatmul.f32.gmra.mxu0 %v6289_v58  ;;  %v6642_v58 = vpop.f32.mrf.mxu3 }
 0x2fb   : > { %v2478_v8 = vmul.f32 %v6156_v49, %v2415_v37  ;;  %v3526_v37 = vld [vmem:[%s7891_s4 + $0x220] sm:$0xff] }
 0x2fc   : > { %v2191_v53 = vpop.f32.mrf.mxu2  ;;  %3865 = vmatmul.f32.gmra.mxu3 %v2728_v16  ;;  %4065 = vmatpush.msrb.mxu1 %v3526_v37 }
 0x2fd   : > { %v6636_v31 = vadd.f32 %v6161_v25, %v2478_v8  ;;  %v2192_v13 = vadd.f32 %v2191_v53, %v2079_v11 }
 0x2fe   : > { %v6638_v42 = vpop.f32.mrf.mxu1 }
 0x2ff   : > { %v7918_v40 = vmax.f32 %v6636_v31, 0.0  ;;  %v2305_v21 = vadd.f32 %v6558_v3, %v2192_v13  ;;  %v2423_v54 = vpop.f32.mrf.mxu0  ;;  %v2082_v3 = vadd.f32 %v6170_v23, %v6036_v4  ;;  %v7973_v23 = vmax.f32 %v6240_v48, 0.0 }
 0x300   : > { %v6644_v60 = vld [vmem:[#allocation3 + $0xe0] sm:$0xff] }
 0x301   : > { %2579 = vst [vmem:[#allocation3 + $0xf1] sm:$0xff] %v7918_v40  ;;  %v2418_v0 = vadd.f32 %v2417_v17, %v2305_v21  ;;  %3675 = vmatmul.f32.gmra.mxu1 %v6644_v60  ;;  %3743 = vmatmul.f32.gmra.mxu2 %v7972_v2 }
 0x302   : > { %3972 = vmatmul.f32.gmra.mxu0 %v6311_v41  ;;  %v6665_v41 = vpop.f32.mrf.mxu3 }
 0x303   : > { %v2479_v11 = vmul.f32 %v6156_v49, %v2418_v0 }
 0x304   : > { %v2194_v8 = vpop.f32.mrf.mxu2  ;;  %3868 = vmatmul.f32.gmra.mxu3 %v2729_v39 }
 0x305   : > { %v6659_v17 = vadd.f32 %v6161_v25, %v2479_v11  ;;  %v2195_v53 = vadd.f32 %v2194_v8, %v2082_v3 }
 0x306   : > { %v6661_v13 = vpop.f32.mrf.mxu1 }
 0x307   : > { %v7917_v16 = vmax.f32 %v6659_v17, 0.0  ;;  %v2308_v21 = vadd.f32 %v6579_v14, %v2195_v53  ;;  %v2426_v2 = vpop.f32.mrf.mxu0  ;;  %v2085_v14 = vadd.f32 %v6193_v20, %v6044_v36  ;;  %v7974_v20 = vmax.f32 %v6262_v57, 0.0  ;;  %v2731_v57 = vld [vmem:[#allocation3 + $0x7a] sm:$0xff] }
 0x308   : > { %v6667_v37 = vld [vmem:[#allocation3 + $0xf0] sm:$0xff] }
 0x309   : > { %2580 = vst [vmem:[#allocation3 + $0xf9] sm:$0xff] %v7917_v16  ;;  %v2421_v4 = vadd.f32 %v2420_v6, %v2308_v21  ;;  %3678 = vmatmul.f32.gmra.mxu1 %v6667_v37  ;;  %3746 = vmatmul.f32.gmra.mxu2 %v7973_v23  ;;  %v2730_v6 = vld [vmem:[#allocation3 + $0x6a] sm:$0xff] }
 0x30a   : > { %3975 = vmatmul.f32.gmra.mxu0 %v6336_v45  ;;  %v6687_v23 = vpop.f32.mrf.mxu3 }
 0x30b   : > { %v2480_v0 = vmul.f32 %v6156_v49, %v2421_v4  ;;  %v3525_v4 = vld [vmem:[%s7891_s4 + $0x218] sm:$0xff] }
 0x30c   : > { %v2197_v3 = vpop.f32.mrf.mxu2  ;;  %3871 = vmatmul.f32.gmra.mxu3 %v2730_v6  ;;  %4066 = vmatpush.msrb.mxu1 %v3525_v4 }
 0x30d   : > { %v6679_v11 = vadd.f32 %v6161_v25, %v2480_v0  ;;  %v2198_v8 = vadd.f32 %v2197_v3, %v2085_v14 }
 0x30e   : > { %v6681_v53 = vpop.f32.mrf.mxu1 }
 0x30f   : > { %v7915_v39 = vmax.f32 %v6679_v11, 0.0  ;;  %v2311_v48 = vadd.f32 %v6597_v18, %v2198_v8  ;;  %v2429_v21 = vpop.f32.mrf.mxu0  ;;  %v2088_v18 = vadd.f32 %v6220_v55, %v6047_v62  ;;  %v7977_v55 = vld [vmem:[#allocation11_spill] sm:$0xff] }
 0x310   : > { %v6685_v45 = vld [vmem:[#allocation3 + $0xf8] sm:$0xff] }
 0x311   : > { %2581 = vst [vmem:[#allocation3 + $0x109] sm:$0xff] %v7915_v39  ;;  %v2424_v36 = vadd.f32 %v2423_v54, %v2311_v48  ;;  %3681 = vmatmul.f32.gmra.mxu1 %v6685_v45  ;;  %3749 = vmatmul.f32.gmra.mxu2 %v7974_v20 }
 0x312   : > { %3978 = vmatmul.f32.gmra.mxu0 %v6368_v44 }
 0x313   : > { %v2481_v14 = vmul.f32 %v6156_v49, %v2424_v36  ;;  %v6710_v4 = vpop.f32.mrf.mxu3  ;;  %v7975_v49 = vmax.f32 %v6284_v35, 0.0  ;;  %v6723_v36 = vld [vmem:[%s7889_s2] ss:$0 sm:$0xff] }
 0x314   : > { %v2200_v0 = vpop.f32.mrf.mxu2  ;;  %3874 = vmatmul.f32.gmra.mxu3 %v2731_v57 }
 0x315   : > { %v6702_v54 = vadd.f32 %v6161_v25, %v2481_v14  ;;  %v2201_v3 = vadd.f32 %v2200_v0, %v2088_v18  ;;  %v7976_v25 = vld [vmem:[#allocation14_spill] sm:$0xff] }
 0x316   : > { %v6704_v8 = vpop.f32.mrf.mxu1 }
 0x317   : > { %v7914_v6 = vmax.f32 %v6702_v54, 0.0  ;;  %v2314_v48 = vadd.f32 %v6620_v46, %v2201_v3  ;;  %v2432_v20 = vpop.f32.mrf.mxu0  ;;  %v2091_v46 = vadd.f32 %v7977_v55, %v7976_v25  ;;  %v2732_v3 = vld [vmem:[#allocation3 + $0x82] sm:$0xff] }
 0x318   : > { %v6708_v44 = vld [vmem:[#allocation3 + $0x108] sm:$0xff] }
 0x319   : > { %2582 = vst [vmem:[#allocation3 + $0x111] sm:$0xff] %v7914_v6  ;;  %v2427_v62 = vadd.f32 %v2426_v2, %v2314_v48  ;;  %3684 = vmatmul.f32.gmra.mxu1 %v6708_v44  ;;  %3752 = vmatmul.f32.gmra.mxu2 %v7975_v49  ;;  %v6729_v2 = vld [vmem:[%s7890_s3] ss:$0 sm:$0xff] }
 0x31a   : > { %3981 = vmatmul.f32.gmra.mxu0 %v6417_v10 }
 0x31b   : > { %v2482_v18 = vmul.f32 %v6723_v36, %v2427_v62  ;;  %v6740_v25 = vpop.f32.mrf.mxu3 }
 0x31c   : > { %v2203_v14 = vpop.f32.mrf.mxu2  ;;  %3877 = vmatmul.f32.gmra.mxu3 %v2732_v3 }
 0x31d   : > { %v6732_v35 = vadd.f32 %v6729_v2, %v2482_v18  ;;  %v2204_v10 = vadd.f32 %v2203_v14, %v2091_v46  ;;  %v7978_v46 = vld [vmem:[#allocation18_spill] sm:$0xff]  ;;  %v3524_v14 = vld [vmem:[%s7891_s4 + $0x210] sm:$0xff] }
 0x31e   : > { %v6734_v0 = vpop.f32.mrf.mxu1  ;;  %v7979_v18 = vmax.f32 %v7978_v46, 0.0  ;;  %4067 = vmatpush.msrb.mxu1 %v3524_v14  ;;  %v2733_v46 = vld [vmem:[#allocation3 + $0x92] sm:$0xff] }
 0x31f   : > { %v7916_v57 = vmax.f32 %v6732_v35, 0.0  ;;  %v2317_v48 = vadd.f32 %v6642_v58, %v2204_v10  ;;  %v2435_v49 = vpop.f32.mrf.mxu0  ;;  %v7980_v58 = vld [vmem:[#allocation15_spill] sm:$0xff]  ;;  %v7981_v10 = vld [vmem:[#allocation12_spill] sm:$0xff] }
 0x320   : > { %v6738_v62 = vld [vmem:[#allocation3 + $0x110] sm:$0xff]  ;;  %v2094_v3 = vadd.f32 %v7981_v10, %v7980_v58  ;;  %v7984_v58 = vld [vmem:[#allocation16_spill] sm:$0xff] }
 0x321   : > { %2583 = vst [vmem:[#allocation3 + $0x121] sm:$0xff] %v7916_v57  ;;  %v2430_v55 = vadd.f32 %v2429_v21, %v2317_v48  ;;  %3687 = vmatmul.f32.gmra.mxu1 %v6738_v62  ;;  %3755 = vmatmul.f32.gmra.mxu2 %v7979_v18  ;;  %v7985_v10 = vld [vmem:[#allocation17_spill] sm:$0xff] }
 0x322   : > { %3984 = vmatmul.f32.gmra.mxu0 %v6464_v9 }
 0x323   : > { %v2483_v6 = vmul.f32 %v6723_v36, %v2430_v55  ;;  %v6763_v14 = vpop.f32.mrf.mxu3 }
 0x324   : > { %v2206_v39 = vpop.f32.mrf.mxu2  ;;  %3880 = vmatmul.f32.gmra.mxu3 %v2733_v46 }
 0x325   : > { %v6755_v21 = vadd.f32 %v6729_v2, %v2483_v6  ;;  %v2207_v48 = vadd.f32 %v2206_v39, %v2094_v3  ;;  %v7982_v39 = vld [vmem:[#allocation19_spill] sm:$0xff] }
 0x326   : > { %v6757_v57 = vpop.f32.mrf.mxu1  ;;  %v7983_v6 = vmax.f32 %v7982_v39, 0.0 }
 0x327   : > { %v7921_v18 = vmax.f32 %v6755_v21, 0.0  ;;  %v2320_v16 = vadd.f32 %v6665_v41, %v2207_v48  ;;  %v2438_v40 = vpop.f32.mrf.mxu0  ;;  %v2097_v41 = vadd.f32 %v7985_v10, %v7984_v58  ;;  %v7986_v58 = vld [vmem:[#allocation13_spill] sm:$0xff] }
 0x328   : > { %v6761_v9 = vld [vmem:[#allocation3 + $0x120] sm:$0xff]  ;;  %v7987_v10 = vmax.f32 %v7986_v58, 0.0  ;;  %v2735_v58 = vld [vmem:[#allocation3 + $0xaa] sm:$0xff] }
 0x329   : > { %2584 = vst [vmem:[#allocation3 + $0x129] sm:$0xff] %v7921_v18  ;;  %v2433_v55 = vadd.f32 %v2432_v20, %v2320_v16  ;;  %3690 = vmatmul.f32.gmra.mxu1 %v6761_v9  ;;  %3758 = vmatmul.f32.gmra.mxu2 %v7983_v6  ;;  %v2734_v16 = vld [vmem:[#allocation3 + $0x9a] sm:$0xff] }
 0x32a   : > { %3987 = vmatmul.f32.gmra.mxu0 %v6506_v5 }
 0x32b   : > { %v2484_v3 = vmul.f32 %v6723_v36, %v2433_v55 }
 0x32c   : > { %v2209_v48 = vpop.f32.mrf.mxu2  ;;  %3883 = vmatmul.f32.gmra.mxu3 %v2734_v16 }
 0x32d   : > { %v6775_v46 = vadd.f32 %v6729_v2, %v2484_v3  ;;  %v2210_v51 = vadd.f32 %v2209_v48, %v2097_v41  ;;  %v6783_v18 = vpop.f32.mrf.mxu3  ;;  %v3523_v41 = vld [vmem:[%s7891_s4 + $0x208] sm:$0xff] }
 0x32e   : > { %v6777_v52 = vpop.f32.mrf.mxu1  ;;  %4068 = vmatpush.msrb.mxu1 %v3523_v41 }
 0x32f   : > { %v7922_v20 = vmax.f32 %v6775_v46, 0.0  ;;  %v2323_v39 = vadd.f32 %v6687_v23, %v2210_v51  ;;  %v2441_v6 = vpop.f32.mrf.mxu0  ;;  %v7988_v51 = vld [vmem:[#allocation5_spill] sm:$0xff]  ;;  %v7989_v23 = vld [vmem:[#allocation20_spill] sm:$0xff] }
 0x330   : > { %v6781_v5 = vld [vmem:[#allocation3 + $0x128] sm:$0xff]  ;;  %v2100_v3 = vadd.f32 %v7989_v23, %v7988_v51  ;;  %v7990_v51 = vmax.f32 %v6405_v61, 0.0  ;;  %v7991_v23 = vld [vmem:[#allocation6_spill] sm:$0xff] }
 0x331   : > { %2585 = vst [vmem:[#allocation3 + $0x139] sm:$0xff] %v7922_v20  ;;  %v2436_v55 = vadd.f32 %v2435_v49, %v2323_v39  ;;  %3693 = vmatmul.f32.gmra.mxu1 %v6781_v5  ;;  %3761 = vmatmul.f32.gmra.mxu2 %v7987_v10 }
 0x332   : > { %3990 = vmatmul.f32.gmra.mxu0 %v6524_v38 }
 0x333   : > { %v2485_v48 = vmul.f32 %v6723_v36, %v2436_v55 }
 0x334   : > { %v2212_v16 = vpop.f32.mrf.mxu2  ;;  %3886 = vmatmul.f32.gmra.mxu3 %v2735_v58 }
 0x335   : > { %v6798_v49 = vadd.f32 %v6729_v2, %v2485_v48  ;;  %v2213_v39 = vadd.f32 %v2212_v16, %v2100_v3  ;;  %v6806_v41 = vpop.f32.mrf.mxu3  ;;  %v7992_v3 = vld [vmem:[#allocation21_spill] sm:$0xff] }
 0x336   : > { %v6800_v20 = vpop.f32.mrf.mxu1 }
 0x337   : > { %v7926_v10 = vmax.f32 %v6798_v49, 0.0  ;;  %v2326_v24 = vadd.f32 %v6710_v4, %v2213_v39  ;;  %v2444_v7 = vpop.f32.mrf.mxu0  ;;  %v2103_v4 = vadd.f32 %v7992_v3, %v7991_v23  ;;  %v7995_v23 = vld [vmem:[#allocation23_spill] sm:$0xff] }
 0x338   : > { %v6804_v38 = vld [vmem:[#allocation3 + $0x138] sm:$0xff]  ;;  %v7996_v3 = vmax.f32 %v7995_v23, 0.0  ;;  %v2737_v23 = vld [vmem:[#allocation3 + $0xc2] sm:$0xff] }
 0x339   : > { %2586 = vst [vmem:[#allocation3 + $0x141] sm:$0xff] %v7926_v10  ;;  %v2439_v55 = vadd.f32 %v2438_v40, %v2326_v24  ;;  %3696 = vmatmul.f32.gmra.mxu1 %v6804_v38  ;;  %3764 = vmatmul.f32.gmra.mxu2 %v7990_v51  ;;  %v2736_v24 = vld [vmem:[#allocation3 + $0xb2] sm:$0xff] }
 0x33a   : > { %3993 = vmatmul.f32.gmra.mxu0 %v6543_v30 }
 0x33b   : > { %v2486_v48 = vmul.f32 %v6723_v36, %v2439_v55 }
 0x33c   : > { %v2215_v16 = vpop.f32.mrf.mxu2  ;;  %3889 = vmatmul.f32.gmra.mxu3 %v2736_v24 }
 0x33d   : > { %v6818_v39 = vadd.f32 %v6729_v2, %v2486_v48  ;;  %v2216_v58 = vadd.f32 %v2215_v16, %v2103_v4  ;;  %v6826_v10 = vpop.f32.mrf.mxu3  ;;  %v3522_v4 = vld [vmem:[%s7891_s4 + $0x200] sm:$0xff]  ;;  %v7998_v48 = vld [vmem:[#allocation22_spill] sm:$0xff] }
 0x33e   : > { %v6820_v12 = vpop.f32.mrf.mxu1  ;;  %4069 = vmatpush.msrb.mxu1 %v3522_v4  ;;  %v8000_v4 = vmax.f32 %v6500_v29, 0.0  ;;  %v3601_v29 = vld [vmem:[%s7891_s4 + $0x478] sm:$0xff] }
 0x33f   : > { %7993 = vst [vmem:[#allocation14_spill] sm:$0xff] %v6818_v39  ;;  %v7927_v40 = vmax.f32 %v6818_v39, 0.0  ;;  %v2329_v61 = vadd.f32 %v6740_v25, %v2216_v58  ;;  %v2447_v51 = vpop.f32.mrf.mxu0  ;;  %v7997_v25 = vld [vmem:[#allocation7_spill] sm:$0xff] }
 0x340   : > { %7994 = vst [vmem:[#allocation11_spill] sm:$0xff] %v6820_v12  ;;  %v6824_v30 = vld [vmem:[#allocation3 + $0x140] sm:$0xff]  ;;  %v2106_v16 = vadd.f32 %v7998_v48, %v7997_v25  ;;  %v3553_v25 = vld [vmem:[%s7891_s4 + $0x2f8] sm:$0xff]  ;;  %4506 = vmatpush.msra.mxu1 %v3601_v29 }
 0x341   : > { %2587 = vst [vmem:[#allocation3 + $0x151] sm:$0xff] %v7927_v40  ;;  %v2442_v55 = vadd.f32 %v2441_v6, %v2329_v61  ;;  %3699 = vmatmul.f32.gmra.mxu1 %v6824_v30  ;;  %3767 = vmatmul.f32.gmra.mxu2 %v7996_v3  ;;  %v3585_v48 = vld [vmem:[%s7891_s4 + $0x3f8] sm:$0xff] }
 0x342   : > { %3996 = vmatmul.f32.gmra.mxu0 %v6562_v59  ;;  %4167 = vmatpush.msra.mxu2 %v3553_v25 }
 0x343   : > { %v2487_v58 = vmul.f32 %v6723_v36, %v2442_v55  ;;  %4393 = vmatpush.msra.mxu0 %v3585_v48 }
 0x344   : > { %v2218_v24 = vpop.f32.mrf.mxu2  ;;  %3892 = vmatmul.f32.gmra.mxu3 %v2737_v23 }
 0x345   : > { %v6841_v6 = vadd.f32 %v6729_v2, %v2487_v58  ;;  %v2219_v61 = vadd.f32 %v2218_v24, %v2106_v16 }
 0x346   : > { %v6843_v40 = vpop.f32.mrf.mxu1 }
 0x347   : > { %7999 = vst [vmem:[#allocation18_spill] sm:$0xff] %v6841_v6  ;;  %v7929_v3 = vmax.f32 %v6841_v6, 0.0  ;;  %v2332_v39 = vadd.f32 %v6763_v14, %v2219_v61  ;;  %v2450_v12 = vpop.f32.mrf.mxu0  ;;  %v3569_v14 = vld [vmem:[%s7891_s4 + $0x378] sm:$0xff] }
 0x348   : > { %v6847_v59 = vld [vmem:[#allocation3 + $0x150] sm:$0xff]  ;;  %4280 = vmatpush.msra.mxu3 %v3569_v14 }
 0x349   : > { %2588 = vst [vmem:[#allocation3 + $0x159] sm:$0xff] %v7929_v3  ;;  %v2445_v55 = vadd.f32 %v2444_v7, %v2332_v39  ;;  %3702 = vmatmul.f32.gmra.mxu1 %v6847_v59  ;;  %3770 = vmatmul.f32.gmra.mxu2 %v8000_v4  ;;  %v6864_v7 = vpop.f32.mrf.mxu3  ;;  %v8001_v39 = vld [vmem:[#allocation8_spill] sm:$0xff] }
 0x34a   : > { %3999 = vmatmul.f32.gmra.mxu0 %v6583_v56  ;;  %v2109_v16 = vadd.f32 %v6502_v32, %v8001_v39  ;;  %v2738_v4 = vld [vmem:[#allocation3 + $0xca] sm:$0xff]  ;;  %v3552_v32 = vld [vmem:[%s7891_s4 + $0x2f0] sm:$0xff] }
 0x34b   : > { %v2488_v58 = vmul.f32 %v6723_v36, %v2445_v55  ;;  %v3568_v55 = vld [vmem:[%s7891_s4 + $0x370] sm:$0xff]  ;;  %4168 = vmatpush.msra.mxu2 %v3552_v32  ;;  %v8003_v39 = vld [vmem:[#allocation9_spill] sm:$0xff] }
 0x34c   : > { %v2221_v24 = vpop.f32.mrf.mxu2  ;;  %3895 = vmatmul.f32.gmra.mxu3 %v2738_v4 }
 0x34d   : > { %v6873_v61 = vadd.f32 %v6729_v2, %v2488_v58  ;;  %v2222_v56 = vadd.f32 %v2221_v24, %v2109_v16  ;;  %4281 = vmatpush.msra.mxu3 %v3568_v55  ;;  %v2112_v16 = vadd.f32 %v6522_v34, %v8003_v39  ;;  %v3584_v34 = vld [vmem:[%s7891_s4 + $0x3f0] sm:$0xff] }
 0x34e   : > { %v6875_v23 = vpop.f32.mrf.mxu1  ;;  %4394 = vmatpush.msra.mxu0 %v3584_v34 }
 0x34f   : > { %v2556_v25 = vmax.f32 %v6873_v61, 0.0  ;;  %v2335_v3 = vadd.f32 %v6783_v18, %v2222_v56  ;;  %v2453_v6 = vpop.f32.mrf.mxu0  ;;  %v8002_v18 = vmax.f32 %v6518_v15, 0.0 }
 0x350   : > { %v6885_v14 = vld [vmem:[#allocation3 + $0x158] sm:$0xff] }
 0x351   : > { %2589 = vst [vmem:[#allocation3 + $0x169] sm:$0xff] %v2556_v25  ;;  %v2448_v48 = vadd.f32 %v2447_v51, %v2335_v3  ;;  %3705 = vmatmul.f32.gmra.mxu1 %v6885_v14  ;;  %3773 = vmatmul.f32.gmra.mxu2 %v8002_v18  ;;  %v6893_v29 = vpop.f32.mrf.mxu3  ;;  %v2739_v3 = vld [vmem:[#allocation3 + $0xda] sm:$0xff]  ;;  %v8004_v18 = vmax.f32 %v6537_v27, 0.0 }
 0x352   : > { %4002 = vmatmul.f32.gmra.mxu0 %v6601_v33 }
 0x353   : > { %v2489_v58 = vmul.f32 %v6723_v36, %v2448_v48 }
 0x354   : > { %v2224_v24 = vpop.f32.mrf.mxu2  ;;  %3898 = vmatmul.f32.gmra.mxu3 %v2739_v3 }
 0x355   : > { %v6899_v56 = vadd.f32 %v6729_v2, %v2489_v58  ;;  %v2225_v4 = vadd.f32 %v2224_v24, %v2112_v16  ;;  %v8005_v16 = vld [vmem:[#allocation10_spill] sm:$0xff] }
 0x356   : > { %v6901_v51 = vpop.f32.mrf.mxu1  ;;  %v2115_v58 = vadd.f32 %v6549_v22, %v8005_v16  ;;  %v3567_v22 = vld [vmem:[%s7891_s4 + $0x368] sm:$0xff] }
 0x357   : > { %v7931_v15 = vmax.f32 %v6899_v56, 0.0  ;;  %v2338_v32 = vadd.f32 %v6806_v41, %v2225_v4  ;;  %v3958_v33 = vpop.f32.mrf.mxu0  ;;  %v3600_v41 = vld [vmem:[%s7891_s4 + $0x470] sm:$0xff]  ;;  %4282 = vmatpush.msra.mxu3 %v3567_v22  ;;  %v8028_v61 = vmax.f32 %v6899_v56, 0.0 }
 0x358   : > { %v6908_v55 = vld [vmem:[#allocation3 + $0x168] sm:$0xff]  ;;  %4507 = vmatpush.msra.mxu1 %v3600_v41 }
 0x359   : > { %2590 = vst [vmem:[#allocation3 + $0x171] sm:$0xff] %v7931_v15  ;;  %v2451_v48 = vadd.f32 %v2450_v12, %v2338_v32  ;;  %3708 = vmatmul.f32.gmra.mxu1 %v6908_v55  ;;  %3776 = vmatmul.f32.gmra.mxu2 %v8004_v18  ;;  %v6919_v39 = vpop.f32.mrf.mxu3  ;;  %v2740_v32 = vld [vmem:[#allocation3 + $0xe2] sm:$0xff] }
 0x35a   : > { %4005 = vmatmul.f32.gmra.mxu0 %v6624_v26  ;;  %v3551_v26 = vld [vmem:[%s7891_s4 + $0x2e8] sm:$0xff] }
 0x35b   : > { %v2490_v24 = vmul.f32 %v6723_v36, %v2451_v48  ;;  %4169 = vmatpush.msra.mxu2 %v3551_v26 }
 0x35c   : > { %v2227_v12 = vpop.f32.mrf.mxu2  ;;  %3901 = vmatmul.f32.gmra.mxu3 %v2740_v32  ;;  %v2741_v32 = vld [vmem:[#allocation3 + $0xf2] sm:$0xff] }
 0x35d   : > { %v2526_v4 = vadd.f32 %v6729_v2, %v2490_v24  ;;  %v2228_v3 = vadd.f32 %v2227_v12, %v2115_v58 }
 0x35e   : > { %v6925_v27 = vpop.f32.mrf.mxu1 }
 0x35f   : > { %v2558_v34 = vmax.f32 %v2526_v4, 0.0  ;;  %v2341_v18 = vadd.f32 %v6826_v10, %v2228_v3  ;;  %v3961_v15 = vpop.f32.mrf.mxu0  ;;  %v8006_v10 = vmax.f32 %v6556_v50, 0.0  ;;  %v3583_v50 = vld [vmem:[%s7891_s4 + $0x3e8] sm:$0xff] }
 0x360   : > { %v6934_v48 = vld [vmem:[#allocation3 + $0x170] sm:$0xff]  ;;  %4395 = vmatpush.msra.mxu0 %v3583_v50 }
 0x361   : > { %2591 = vst [vmem:[#allocation3 + $0x181] sm:$0xff] %v2558_v34  ;;  %v2454_v41 = vadd.f32 %v2453_v6, %v2341_v18  ;;  %3711 = vmatmul.f32.gmra.mxu1 %v6934_v48  ;;  %3779 = vmatmul.f32.gmra.mxu2 %v8006_v10  ;;  %v3854_v16 = vpop.f32.mrf.mxu3  ;;  %v2742_v10 = vld [vmem:[#allocation3 + $0xfa] sm:$0xff] }
 0x362   : > { %4008 = vmatmul.f32.gmra.mxu0 %v6644_v60  ;;  %v2849_v60 = vld [vmem:[#allocation3 + $0x19] sm:$0xff] }
 0x363   : > { %v2491_v58 = vmul.f32 %v6723_v36, %v2454_v41  ;;  %v8007_v36 = vmax.f32 %v6577_v1, 0.0 }
 0x364   : > { %v3732_v24 = vpop.f32.mrf.mxu2  ;;  %3904 = vmatmul.f32.gmra.mxu3 %v2741_v32 }
 0x365   : > { %v2527_v12 = vadd.f32 %v6729_v2, %v2491_v58  ;;  %v3733_v4 = vadd.f32 %v3732_v24, %v6570_v47  ;;  %v3599_v47 = vld [vmem:[%s7891_s4 + $0x468] sm:$0xff]  ;;  %v3550_v24 = vld [vmem:[%s7891_s4 + $0x2e0] sm:$0xff] }
 0x366   : > { %v6943_v3 = vpop.f32.mrf.mxu1  ;;  %4508 = vmatpush.msra.mxu1 %v3599_v47  ;;  %4170 = vmatpush.msra.mxu2 %v3550_v24  ;;  %v3549_v24 = vld [vmem:[%s7891_s4 + $0x2d8] sm:$0xff] }
 0x367   : > { %v2559_v34 = vmax.f32 %v2527_v12, 0.0  ;;  %v3846_v6 = vadd.f32 %v6864_v7, %v3733_v4  ;;  %v3964_v18 = vpop.f32.mrf.mxu0 }
 0x368   : > { %4171 = vmatpush.msra.mxu2 %v3549_v24 }
 0x369   : > { %2592 = vst [vmem:[#allocation3 + $0x189] sm:$0xff] %v2559_v34  ;;  %3782 = vmatmul.f32.gmra.mxu2 %v8007_v36  ;;  %4070 = vmatmul.f32.vlgmr.msrb.gmra.mxu1 %v2849_v60  ;;  %v6954_v2 = vadd.f32 %v3958_v33, %v3846_v6  ;;  %v3857_v7 = vpop.f32.mrf.mxu3  ;;  %v2850_v33 = vld [vmem:[#allocation3 + $0x21] sm:$0xff]  ;;  %v2743_v6 = vld [vmem:[#allocation3 + $0x10a] sm:$0xff] }
 0x36a   : > { %4011 = vmatmul.f32.gmra.mxu0 %v6667_v37  ;;  %v3566_v37 = vld [vmem:[%s7891_s4 + $0x360] sm:$0xff] }
 0x36b   : > { %4283 = vmatpush.msra.mxu3 %v3566_v37  ;;  %v6979_v36 = vld [vmem:[#allocation3 + $0x31] sm:$0xff] }
 0x36c   : > { %v3735_v26 = vpop.f32.mrf.mxu2  ;;  %3907 = vmatmul.f32.gmra.mxu3 %v2742_v10  ;;  %v2744_v10 = vld [vmem:[#allocation3 + $0x112] sm:$0xff] }
 0x36d   : > { %v3736_v22 = vadd.f32 %v3735_v26, %v6592_v63  ;;  %v8008_v63 = vmax.f32 %v6595_v19, 0.0  ;;  %v3582_v19 = vld [vmem:[%s7891_s4 + $0x3e0] sm:$0xff] }
 0x36e   : > { %v6958_v41 = vpop.f32.mrf.mxu1  ;;  %4396 = vmatpush.msra.mxu0 %v3582_v19  ;;  %v7013_v19 = vld [vmem:[#allocation3 + $0x49] sm:$0xff] }
 0x36f   : > { %v3849_v1 = vadd.f32 %v6893_v29, %v3736_v22  ;;  %v3967_v58 = vpop.f32.mrf.mxu0 }
 0x371   : > { %3785 = vmatmul.f32.gmra.mxu2 %v8008_v63  ;;  %4073 = vmatmul.f32.gmra.mxu1 %v2850_v33  ;;  %v6969_v12 = vadd.f32 %v3961_v15, %v3849_v1  ;;  %v3860_v29 = vpop.f32.mrf.mxu3 }
 0x372   : > { %4014 = vmatmul.f32.gmra.mxu0 %v6685_v45  ;;  %v8009_v45 = vmax.f32 %v6616_v28, 0.0 }
 0x374   : > { %v3738_v4 = vpop.f32.mrf.mxu2  ;;  %3910 = vmatmul.f32.gmra.mxu3 %v2743_v6 }
 0x375   : > { %v3739_v32 = vadd.f32 %v3738_v4, %v6618_v43  ;;  %v3598_v43 = vld [vmem:[%s7891_s4 + $0x460] sm:$0xff] }
 0x376   : > { %v6973_v34 = vpop.f32.mrf.mxu1  ;;  %4509 = vmatpush.msra.mxu1 %v3598_v43 }
 0x377   : > { %v3852_v50 = vadd.f32 %v6919_v39, %v3739_v32  ;;  %v3970_v60 = vpop.f32.mrf.mxu0  ;;  %v2745_v32 = vld [vmem:[#allocation3 + $0x122] sm:$0xff] }
 0x379   : > { %3788 = vmatmul.f32.gmra.mxu2 %v8009_v45  ;;  %4076 = vmatmul.f32.gmra.mxu1 %v6979_v36  ;;  %v6987_v15 = vadd.f32 %v3964_v18, %v3852_v50  ;;  %v3863_v39 = vpop.f32.mrf.mxu3  ;;  %v3565_v18 = vld [vmem:[%s7891_s4 + $0x358] sm:$0xff] }
 0x37a   : > { %4017 = vmatmul.f32.gmra.mxu0 %v6708_v44  ;;  %v6999_v44 = vld [vmem:[#allocation3 + $0x39] sm:$0xff]  ;;  %4284 = vmatpush.msra.mxu3 %v3565_v18 }
 0x37c   : > { %v3741_v47 = vpop.f32.mrf.mxu2  ;;  %3913 = vmatmul.f32.gmra.mxu3 %v2744_v10 }
 0x37d   : > { %v3742_v26 = vadd.f32 %v3741_v47, %v6638_v42  ;;  %v8010_v42 = vmax.f32 %v6636_v31, 0.0  ;;  %v3581_v31 = vld [vmem:[%s7891_s4 + $0x3d8] sm:$0xff] }
 0x37e   : > { %v6991_v22 = vpop.f32.mrf.mxu1  ;;  %4397 = vmatpush.msra.mxu0 %v3581_v31  ;;  %v7047_v31 = vld [vmem:[#allocation3 + $0x61] sm:$0xff] }
 0x37f   : > { %v3855_v28 = vadd.f32 %v3854_v16, %v3742_v26  ;;  %v3973_v1 = vpop.f32.mrf.mxu0  ;;  %v2746_v26 = vld [vmem:[#allocation3 + $0x12a] sm:$0xff] }
 0x381   : > { %3791 = vmatmul.f32.gmra.mxu2 %v8010_v42  ;;  %4079 = vmatmul.f32.gmra.mxu1 %v6999_v44  ;;  %v7004_v16 = vadd.f32 %v3967_v58, %v3855_v28  ;;  %v3866_v37 = vpop.f32.mrf.mxu3  ;;  %v8011_v58 = vmax.f32 %v6659_v17, 0.0  ;;  %v3548_v28 = vld [vmem:[%s7891_s4 + $0x2d0] sm:$0xff] }
 0x382   : > { %4020 = vmatmul.f32.gmra.mxu0 %v6738_v62  ;;  %4172 = vmatpush.msra.mxu2 %v3548_v28 }
 0x384   : > { %v3744_v33 = vpop.f32.mrf.mxu2  ;;  %3916 = vmatmul.f32.gmra.mxu3 %v2745_v32 }
 0x385   : > { %v3745_v63 = vadd.f32 %v3744_v33, %v6661_v13  ;;  %v3597_v13 = vld [vmem:[%s7891_s4 + $0x458] sm:$0xff] }
 0x386   : > { %v7008_v4 = vpop.f32.mrf.mxu1  ;;  %4510 = vmatpush.msra.mxu1 %v3597_v13 }
 0x387   : > { %v3858_v6 = vadd.f32 %v3857_v7, %v3745_v63  ;;  %v3976_v50 = vpop.f32.mrf.mxu0  ;;  %v2747_v63 = vld [vmem:[#allocation3 + $0x13a] sm:$0xff] }
 0x389   : > { %3794 = vmatmul.f32.gmra.mxu2 %v8011_v58  ;;  %4082 = vmatmul.f32.gmra.mxu1 %v7013_v19  ;;  %v7021_v62 = vadd.f32 %v3970_v60, %v3858_v6  ;;  %v3869_v7 = vpop.f32.mrf.mxu3  ;;  %v3564_v60 = vld [vmem:[%s7891_s4 + $0x350] sm:$0xff] }
 0x38a   : > { %4023 = vmatmul.f32.gmra.mxu0 %v6761_v9  ;;  %v7033_v9 = vld [vmem:[#allocation3 + $0x51] sm:$0xff]  ;;  %4285 = vmatpush.msra.mxu3 %v3564_v60 }
 0x38c   : > { %v3747_v45 = vpop.f32.mrf.mxu2  ;;  %3919 = vmatmul.f32.gmra.mxu3 %v2746_v26 }
 0x38d   : > { %v3748_v43 = vadd.f32 %v3747_v45, %v6681_v53  ;;  %v8012_v53 = vmax.f32 %v6679_v11, 0.0  ;;  %v3580_v11 = vld [vmem:[%s7891_s4 + $0x3d0] sm:$0xff] }
 0x38e   : > { %v7025_v47 = vpop.f32.mrf.mxu1  ;;  %4398 = vmatpush.msra.mxu0 %v3580_v11  ;;  %v7085_v11 = vld [vmem:[#allocation3 + $0x79] sm:$0xff] }
 0x38f   : > { %v3861_v17 = vadd.f32 %v3860_v29, %v3748_v43  ;;  %v3979_v10 = vpop.f32.mrf.mxu0 }
 0x391   : > { %3797 = vmatmul.f32.gmra.mxu2 %v8012_v53  ;;  %4085 = vmatmul.f32.gmra.mxu1 %v7033_v9  ;;  %v7038_v29 = vadd.f32 %v3973_v1, %v3861_v17  ;;  %v3872_v24 = vpop.f32.mrf.mxu3  ;;  %v8013_v1 = vmax.f32 %v6702_v54, 0.0  ;;  %v2748_v54 = vld [vmem:[#allocation3 + $0x142] sm:$0xff]  ;;  %v3547_v17 = vld [vmem:[%s7891_s4 + $0x2c8] sm:$0xff] }
 0x392   : > { %4026 = vmatmul.f32.gmra.mxu0 %v6781_v5  ;;  %4173 = vmatpush.msra.mxu2 %v3547_v17  ;;  %v3545_v17 = vld [vmem:[%s7891_s4 + $0x2b8] sm:$0xff] }
 0x394   : > { %v3750_v18 = vpop.f32.mrf.mxu2  ;;  %3922 = vmatmul.f32.gmra.mxu3 %v2747_v63 }
 0x395   : > { %v3751_v42 = vadd.f32 %v3750_v18, %v6704_v8  ;;  %v3596_v8 = vld [vmem:[%s7891_s4 + $0x450] sm:$0xff] }
 0x396   : > { %v7042_v33 = vpop.f32.mrf.mxu1  ;;  %4511 = vmatpush.msra.mxu1 %v3596_v8 }
 0x397   : > { %v3864_v32 = vadd.f32 %v3863_v39, %v3751_v42  ;;  %v3982_v6 = vpop.f32.mrf.mxu0  ;;  %v2749_v42 = vld [vmem:[#allocation3 + $0x152] sm:$0xff] }
 0x399   : > { %3800 = vmatmul.f32.gmra.mxu2 %v8013_v1  ;;  %4088 = vmatmul.f32.gmra.mxu1 %v7047_v31  ;;  %v7055_v5 = vadd.f32 %v3976_v50, %v3864_v32  ;;  %v7058_v39 = vpop.f32.mrf.mxu3  ;;  %v7069_v50 = vld [vmem:[#allocation3 + $0x69] sm:$0xff] }
 0x39a   : > { %4029 = vmatmul.f32.gmra.mxu0 %v6804_v38  ;;  %v3563_v38 = vld [vmem:[%s7891_s4 + $0x348] sm:$0xff] }
 0x39b   : > { %4286 = vmatpush.msra.mxu3 %v3563_v38  ;;  %v3561_v38 = vld [vmem:[%s7891_s4 + $0x338] sm:$0xff] }
 0x39c   : > { %v3753_v58 = vpop.f32.mrf.mxu2  ;;  %3925 = vmatmul.f32.gmra.mxu3 %v2748_v54 }
 0x39d   : > { %v3754_v13 = vadd.f32 %v3753_v58, %v6734_v0  ;;  %v8014_v0 = vmax.f32 %v6732_v35, 0.0  ;;  %v3579_v35 = vld [vmem:[%s7891_s4 + $0x3c8] sm:$0xff] }
 0x39e   : > { %v7061_v45 = vpop.f32.mrf.mxu1  ;;  %4399 = vmatpush.msra.mxu0 %v3579_v35  ;;  %v2751_v35 = vld [vmem:[#allocation3 + $0x16a] sm:$0xff] }
 0x39f   : > { %v3867_v43 = vadd.f32 %v3866_v37, %v3754_v13  ;;  %v3985_v26 = vpop.f32.mrf.mxu0 }
 0x3a1   : > { %3803 = vmatmul.f32.gmra.mxu2 %v8014_v0  ;;  %4091 = vmatmul.f32.gmra.mxu1 %v7069_v50  ;;  %v7074_v37 = vadd.f32 %v3979_v10, %v3867_v43  ;;  %v7077_v28 = vpop.f32.mrf.mxu3  ;;  %v7109_v43 = vld [vmem:[#allocation3 + $0x81] sm:$0xff] }
 0x3a2   : > { %4032 = vmatmul.f32.gmra.mxu0 %v6824_v30  ;;  %v8015_v30 = vmax.f32 %v6755_v21, 0.0  ;;  %v2750_v21 = vld [vmem:[#allocation3 + $0x15a] sm:$0xff] }
 0x3a4   : > { %v3756_v60 = vpop.f32.mrf.mxu2  ;;  %3928 = vmatmul.f32.gmra.mxu3 %v2749_v42 }
 0x3a5   : > { %v3757_v53 = vadd.f32 %v3756_v60, %v6757_v57  ;;  %v3595_v57 = vld [vmem:[%s7891_s4 + $0x448] sm:$0xff] }
 0x3a6   : > { %v7080_v18 = vpop.f32.mrf.mxu1  ;;  %4512 = vmatpush.msra.mxu1 %v3595_v57  ;;  %v3544_v57 = vld [vmem:[%s7891_s4 + $0x2b0] sm:$0xff] }
 0x3a7   : > { %v3870_v63 = vadd.f32 %v3869_v7, %v3757_v53  ;;  %v3988_v32 = vpop.f32.mrf.mxu0 }
 0x3a9   : > { %3806 = vmatmul.f32.gmra.mxu2 %v8015_v30  ;;  %4094 = vmatmul.f32.gmra.mxu1 %v7085_v11  ;;  %v7093_v10 = vadd.f32 %v3982_v6, %v3870_v63  ;;  %v7096_v7 = vpop.f32.mrf.mxu3  ;;  %v3546_v6 = vld [vmem:[%s7891_s4 + $0x2c0] sm:$0xff] }
 0x3aa   : > { %4035 = vmatmul.f32.gmra.mxu0 %v6847_v59  ;;  %v3562_v59 = vld [vmem:[%s7891_s4 + $0x340] sm:$0xff]  ;;  %4174 = vmatpush.msra.mxu2 %v3546_v6 }
 0x3ab   : > { %4287 = vmatpush.msra.mxu3 %v3562_v59  ;;  %v7135_v30 = vld [vmem:[#allocation3 + $0x91] sm:$0xff] }
 0x3ac   : > { %v3759_v1 = vpop.f32.mrf.mxu2  ;;  %3931 = vmatmul.f32.gmra.mxu3 %v2750_v21  ;;  %4175 = vmatpush.msra.mxu2 %v3545_v17  ;;  %v8018_v21 = vmax.f32 %v6798_v49, 0.0  ;;  %v3558_v49 = vld [vmem:[%s7891_s4 + $0x320] sm:$0xff] }
 0x3ad   : > { %v3760_v8 = vadd.f32 %v3759_v1, %v6777_v52  ;;  %v3578_v52 = vld [vmem:[%s7891_s4 + $0x3c0] sm:$0xff]  ;;  %4288 = vmatpush.msra.mxu3 %v3561_v38  ;;  %v3560_v1 = vld [vmem:[%s7891_s4 + $0x330] sm:$0xff] }
 0x3ae   : > { %v7099_v58 = vpop.f32.mrf.mxu1  ;;  %4400 = vmatpush.msra.mxu0 %v3578_v52  ;;  %4176 = vmatpush.msra.mxu2 %v3544_v57  ;;  %v3575_v52 = vld [vmem:[%s7891_s4 + $0x3a8] sm:$0xff]  ;;  %v3574_v17 = vld [vmem:[%s7891_s4 + $0x3a0] sm:$0xff]  ;;  %v8020_v38 = vld [vmem:[#allocation11_spill] sm:$0xff] }
 0x3af   : > { %v3873_v13 = vadd.f32 %v3872_v24, %v3760_v8  ;;  %v7101_v54 = vpop.f32.mrf.mxu0  ;;  %v8016_v24 = vmax.f32 %v6775_v46, 0.0  ;;  %v3577_v46 = vld [vmem:[%s7891_s4 + $0x3b8] sm:$0xff]  ;;  %4289 = vmatpush.msra.mxu3 %v3560_v1  ;;  %v3559_v8 = vld [vmem:[%s7891_s4 + $0x328] sm:$0xff]  ;;  %v3540_v1 = vld [vmem:[%s7891_s4 + $0x290] sm:$0xff] }
 0x3b0   : > { %4401 = vmatpush.msra.mxu0 %v3577_v46 }
 0x3b1   : > { %3809 = vmatmul.f32.gmra.mxu2 %v8016_v24  ;;  %4097 = vmatmul.f32.gmra.mxu1 %v7109_v43  ;;  %v7123_v0 = vadd.f32 %v3985_v26, %v3873_v13  ;;  %v7126_v60 = vpop.f32.mrf.mxu3  ;;  %v3542_v13 = vld [vmem:[%s7891_s4 + $0x2a0] sm:$0xff] }
 0x3b2   : > { %4038 = vmatmul.f32.gmra.mxu0 %v6885_v14  ;;  %v3594_v24 = vld [vmem:[%s7891_s4 + $0x440] sm:$0xff]  ;;  %4290 = vmatpush.msra.mxu3 %v3559_v8  ;;  %v3573_v8 = vld [vmem:[%s7891_s4 + $0x398] sm:$0xff] }
 0x3b3   : > { %8017 = vst [vmem:[#allocation15_spill] sm:$0xff] %v7123_v0  ;;  %4513 = vmatpush.msra.mxu1 %v3594_v24 }
 0x3b4   : > { %v3762_v53 = vpop.f32.mrf.mxu2  ;;  %3934 = vmatmul.f32.gmra.mxu3 %v2751_v35  ;;  %v2752_v35 = vld [vmem:[#allocation3 + $0x172] sm:$0xff] }
 0x3b5   : > { %v3763_v42 = vadd.f32 %v3762_v53, %v6800_v20  ;;  %v3576_v20 = vld [vmem:[%s7891_s4 + $0x3b0] sm:$0xff]  ;;  %4291 = vmatpush.msra.mxu3 %v3558_v49  ;;  %v3557_v53 = vld [vmem:[%s7891_s4 + $0x318] sm:$0xff] }
 0x3b6   : > { %v7132_v63 = vpop.f32.mrf.mxu1  ;;  %4402 = vmatpush.msra.mxu0 %v3576_v20  ;;  %v3556_v20 = vld [vmem:[%s7891_s4 + $0x310] sm:$0xff] }
 0x3b7   : > { %v3876_v26 = vadd.f32 %v7058_v39, %v3763_v42  ;;  %v7137_v14 = vpop.f32.mrf.mxu0  ;;  %v3543_v39 = vld [vmem:[%s7891_s4 + $0x2a8] sm:$0xff]  ;;  %4292 = vmatpush.msra.mxu3 %v3557_v53  ;;  %v2978_v53 = vld [vmem:[#allocation3 + $0x30] sm:$0xff] }
 0x3b8   : > { %4177 = vmatpush.msra.mxu2 %v3543_v39  ;;  %4403 = vmatpush.msra.mxu0 %v3575_v52  ;;  %v7193_v39 = vld [vmem:[#allocation3 + $0x99] sm:$0xff] }
 0x3b9   : > { %3812 = vmatmul.f32.gmra.mxu2 %v8018_v21  ;;  %4100 = vmatmul.f32.gmra.mxu1 %v7135_v30  ;;  %v7160_v6 = vadd.f32 %v3988_v32, %v3876_v26  ;;  %v7163_v59 = vpop.f32.mrf.mxu3  ;;  %v8021_v21 = vld [vmem:[#allocation14_spill] sm:$0xff] }
 0x3ba   : > { %4041 = vmatmul.f32.gmra.mxu0 %v6908_v55  ;;  %v3541_v55 = vld [vmem:[%s7891_s4 + $0x298] sm:$0xff]  ;;  %4178 = vmatpush.msra.mxu2 %v3542_v13  ;;  %v8022_v13 = vmax.f32 %v8021_v21, 0.0  ;;  %v3555_v52 = vld [vmem:[%s7891_s4 + $0x308] sm:$0xff] }
 0x3bb   : > { %8019 = vst [vmem:[#allocation12_spill] sm:$0xff] %v7160_v6  ;;  %4404 = vmatpush.msra.mxu0 %v3574_v17  ;;  %4293 = vmatpush.msra.mxu3 %v3556_v20  ;;  %v3570_v20 = vld [vmem:[%s7891_s4 + $0x380] sm:$0xff]  ;;  %v3593_v21 = vld [vmem:[%s7891_s4 + $0x438] sm:$0xff] }
 0x3bc   : > { %v3765_v32 = vpop.f32.mrf.mxu2  ;;  %4179 = vmatpush.msra.mxu2 %v3541_v55  ;;  %3937 = vmatmul.f32.gmra.mxu3 %v2752_v35  ;;  %v3572_v55 = vld [vmem:[%s7891_s4 + $0x390] sm:$0xff]  ;;  %v7404_v6 = vld [vmem:[#allocation3 + $0x92] sm:$0xff] }
 0x3bd   : > { %v3766_v46 = vadd.f32 %v3765_v32, %v8020_v38  ;;  %v3538_v32 = vld [vmem:[%s7891_s4 + $0x280] sm:$0xff]  ;;  %4405 = vmatpush.msra.mxu0 %v3573_v8  ;;  %4294 = vmatpush.msra.mxu3 %v3555_v52  ;;  %v8024_v8 = vld [vmem:[#allocation18_spill] sm:$0xff] }
 0x3be   : > { %v7184_v42 = vpop.f32.mrf.mxu1  ;;  %4180 = vmatpush.msra.mxu2 %v3540_v1  ;;  %v7229_v1 = vld [vmem:[#allocation3 + $0xa9] sm:$0xff]  ;;  %4514 = vmatpush.msra.mxu1 %v3593_v21  ;;  %v7258_v21 = vld [vmem:[#allocation3 + $0xc1] sm:$0xff] }
 0x3bf   : > { %v3879_v26 = vadd.f32 %v7077_v28, %v3766_v46  ;;  %v3997_v57 = vpop.f32.mrf.mxu0  ;;  %v3539_v28 = vld [vmem:[%s7891_s4 + $0x288] sm:$0xff]  ;;  %4406 = vmatpush.msra.mxu0 %v3572_v55 }
 0x3c0   : > { %4181 = vmatpush.msra.mxu2 %v3539_v28  ;;  %v8025_v28 = vmax.f32 %v8024_v8, 0.0 }
 0x3c1   : > { %3815 = vmatmul.f32.gmra.mxu2 %v8022_v13  ;;  %4103 = vmatmul.f32.gmra.mxu1 %v7193_v39  ;;  %v7208_v49 = vadd.f32 %v7101_v54, %v3879_v26  ;;  %v7211_v24 = vpop.f32.mrf.mxu3  ;;  %v3554_v54 = vld [vmem:[%s7891_s4 + $0x300] sm:$0xff] }
 0x3c2   : > { %4044 = vmatmul.f32.gmra.mxu0 %v6934_v48  ;;  %v3571_v48 = vld [vmem:[%s7891_s4 + $0x388] sm:$0xff]  ;;  %4182 = vmatpush.msra.mxu2 %v3538_v32 }
 0x3c3   : > { %8023 = vst [vmem:[#allocation19_spill] sm:$0xff] %v7208_v49  ;;  %4295 = vmatpush.msra.mxu3 %v3554_v54  ;;  %4407 = vmatpush.msra.mxu0 %v3571_v48  ;;  %v2979_v54 = vld [vmem:[#allocation3 + $0x38] sm:$0xff] }
 0x3c4   : > { %v3768_v17 = vpop.f32.mrf.mxu2  ;;  %4296 = vmatmul.f32.vlgmr.msra.gmra.mxu3 %v2978_v53  ;;  %v7377_v49 = vld [vmem:[#allocation3 + $0x7a] sm:$0xff] }
 0x3c5   : > { %v3769_v38 = vadd.f32 %v3768_v17, %v6843_v40  ;;  %v2815_v40 = vld [vmem:[#allocation3 + $0x180] sm:$0xff]  ;;  %4408 = vmatpush.msra.mxu0 %v3570_v20 }
 0x3c6   : > { %v7226_v46 = vpop.f32.mrf.mxu1 }
 0x3c7   : > { %v3882_v35 = vadd.f32 %v7096_v7, %v3769_v38  ;;  %v4000_v26 = vpop.f32.mrf.mxu0  ;;  %v7247_v38 = vld [vmem:[#allocation3 + $0xb1] sm:$0xff] }
 0x3c9   : > { %3818 = vmatmul.f32.gmra.mxu2 %v8025_v28  ;;  %4106 = vmatmul.f32.gmra.mxu1 %v7229_v1  ;;  %v7241_v7 = vadd.f32 %v7137_v14, %v3882_v35  ;;  %v3893_v13 = vpop.f32.mrf.mxu3  ;;  %v2816_v14 = vld [vmem:[#allocation3 + $0x188] sm:$0xff] }
 0x3ca   : > { %4047 = vmatmul.f32.gmra.mxu0 %v2815_v40 }
 0x3cb   : > { %8026 = vst [vmem:[#allocation16_spill] sm:$0xff] %v7241_v7  ;;  %v7375_v7 = vld [vmem:[#allocation3 + $0x129] sm:$0xff] }
 0x3cc   : > { %v3771_v52 = vpop.f32.mrf.mxu2  ;;  %4299 = vmatmul.f32.gmra.mxu3 %v2979_v54  ;;  %v2981_v54 = vld [vmem:[#allocation3 + $0x50] sm:$0xff] }
 0x3cd   : > { %v3772_v55 = vadd.f32 %v3771_v52, %v6875_v23 }
 0x3ce   : > { %v7244_v32 = vpop.f32.mrf.mxu1 }
 0x3cf   : > { %v3885_v17 = vadd.f32 %v7126_v60, %v3772_v55  ;;  %v4003_v48 = vpop.f32.mrf.mxu0  ;;  %v2980_v60 = vld [vmem:[#allocation3 + $0x48] sm:$0xff] }
 0x3d1   : > { %3821 = vmatmul.f32.gmra.mxu2 %v2556_v25  ;;  %4109 = vmatmul.f32.gmra.mxu1 %v7247_v38  ;;  %v7252_v53 = vadd.f32 %v3997_v57, %v3885_v17  ;;  %v3896_v35 = vpop.f32.mrf.mxu3  ;;  %v3592_v25 = vld [vmem:[%s7891_s4 + $0x430] sm:$0xff] }
 0x3d2   : > { %4050 = vmatmul.f32.gmra.mxu0 %v2816_v14  ;;  %4515 = vmatpush.msra.mxu1 %v3592_v25  ;;  %v7273_v14 = vld [vmem:[#allocation3 + $0xc9] sm:$0xff]  ;;  %v7282_v25 = vld [vmem:[#allocation3 + $0xd9] sm:$0xff] }
 0x3d3   : > { %8027 = vst [vmem:[#allocation17_spill] sm:$0xff] %v7252_v53  ;;  %v7350_v53 = vld [vmem:[#allocation3 + $0x62] sm:$0xff] }
 0x3d4   : > { %v3774_v23 = vpop.f32.mrf.mxu2  ;;  %4302 = vmatmul.f32.gmra.mxu3 %v2980_v60 }
 0x3d5   : > { %v3775_v20 = vadd.f32 %v3774_v23, %v6901_v51  ;;  %v2913_v23 = vld [vmem:[#allocation3 + $0x1a] sm:$0xff] }
 0x3d6   : > { %v7255_v8 = vpop.f32.mrf.mxu1 }
 0x3d7   : > { %v3888_v28 = vadd.f32 %v7163_v59, %v3775_v20  ;;  %v4006_v40 = vpop.f32.mrf.mxu0 }
 0x3d9   : > { %3824 = vmatmul.f32.gmra.mxu2 %v8028_v61  ;;  %4112 = vmatmul.f32.gmra.mxu1 %v7258_v21  ;;  %v7266_v57 = vadd.f32 %v4000_v26, %v3888_v28  ;;  %v3899_v51 = vpop.f32.mrf.mxu3  ;;  %v2982_v28 = vld [vmem:[#allocation3 + $0x60] sm:$0xff] }
 0x3da   : > { %4409 = vmatmul.f32.vlgmr.msra.gmra.mxu0 %v6979_v36 }
 0x3db   : > { %8029 = vst [vmem:[#allocation13_spill] sm:$0xff] %v7266_v57  ;;  %v7348_v57 = vld [vmem:[#allocation3 + $0x111] sm:$0xff] }
 0x3dc   : > { %v3777_v59 = vpop.f32.mrf.mxu2  ;;  %4305 = vmatmul.f32.gmra.mxu3 %v2981_v54 }
 0x3dd   : > { %v3778_v52 = vadd.f32 %v3777_v59, %v6925_v27  ;;  %v2914_v59 = vld [vmem:[#allocation3 + $0x22] sm:$0xff] }
 0x3de   : > { %v7270_v55 = vpop.f32.mrf.mxu1 }
 0x3df   : > { %v3891_v56 = vadd.f32 %v7211_v24, %v3778_v52  ;;  %v4009_v17 = vpop.f32.mrf.mxu0 }
 0x3e1   : > { %4115 = vmatmul.f32.gmra.mxu1 %v7273_v14  ;;  %4183 = vmatmul.f32.vlgmr.msra.gmra.mxu2 %v2913_v23  ;;  %v7276_v26 = vadd.f32 %v4003_v48, %v3891_v56  ;;  %v3902_v36 = vpop.f32.mrf.mxu3  ;;  %v2983_v56 = vld [vmem:[#allocation3 + $0x68] sm:$0xff] }
 0x3e2   : > { %4412 = vmatmul.f32.gmra.mxu0 %v6999_v44  ;;  %v3591_v44 = vld [vmem:[%s7891_s4 + $0x428] sm:$0xff] }
 0x3e3   : > { %8030 = vst [vmem:[#allocation5_spill] sm:$0xff] %v7276_v26  ;;  %4516 = vmatpush.msra.mxu1 %v3591_v44  ;;  %v7323_v26 = vld [vmem:[#allocation3 + $0x4a] sm:$0xff] }
 0x3e4   : > { %v3780_v20 = vpop.f32.mrf.mxu2  ;;  %4308 = vmatmul.f32.gmra.mxu3 %v2982_v28  ;;  %v7296_v28 = vld [vmem:[#allocation3 + $0x32] sm:$0xff] }
 0x3e5   : > { %v3781_v27 = vadd.f32 %v3780_v20, %v6943_v3 }
 0x3e6   : > { %v7280_v60 = vpop.f32.mrf.mxu1 }
 0x3e7   : > { %v3894_v24 = vadd.f32 %v3893_v13, %v3781_v27  ;;  %v4012_v61 = vpop.f32.mrf.mxu0  ;;  %v7294_v27 = vld [vmem:[#allocation3 + $0xe1] sm:$0xff] }
 0x3e9   : > { %4118 = vmatmul.f32.gmra.mxu1 %v7282_v25  ;;  %4186 = vmatmul.f32.gmra.mxu2 %v2914_v59  ;;  %v7288_v48 = vadd.f32 %v4006_v40, %v3894_v24  ;;  %v3905_v3 = vpop.f32.mrf.mxu3 }
 0x3ea   : > { %4415 = vmatmul.f32.gmra.mxu0 %v7013_v19 }
 0x3eb   : > { %8031 = vst [vmem:[#allocation20_spill] sm:$0xff] %v7288_v48  ;;  %v7321_v48 = vld [vmem:[#allocation3 + $0xf9] sm:$0xff] }
 0x3ec   : > { %v3783_v52 = vpop.f32.mrf.mxu2  ;;  %4311 = vmatmul.f32.gmra.mxu3 %v2983_v56  ;;  %v7308_v56 = vld [vmem:[#allocation3 + $0x3a] sm:$0xff] }
 0x3ed   : > { %v3784_v13 = vadd.f32 %v3783_v52, %v6958_v41 }
 0x3ee   : > { %v7292_v54 = vpop.f32.mrf.mxu1 }
 0x3ef   : > { %v3897_v23 = vadd.f32 %v3896_v35, %v3784_v13  ;;  %v4015_v20 = vpop.f32.mrf.mxu0  ;;  %v2984_v35 = vld [vmem:[#allocation3 + $0x78] sm:$0xff] }
 0x3f0   : > { %v7306_v13 = vld [vmem:[#allocation3 + $0xf1] sm:$0xff] }
 0x3f1   : > { %4121 = vmatmul.f32.gmra.mxu1 %v7294_v27  ;;  %4189 = vmatmul.f32.gmra.mxu2 %v7296_v28  ;;  %v7300_v19 = vadd.f32 %v4009_v17, %v3897_v23  ;;  %v3908_v40 = vpop.f32.mrf.mxu3 }
 0x3f2   : > { %4418 = vmatmul.f32.gmra.mxu0 %v7033_v9  ;;  %v3590_v9 = vld [vmem:[%s7891_s4 + $0x420] sm:$0xff] }
 0x3f3   : > { %8032 = vst [vmem:[#allocation6_spill] sm:$0xff] %v7300_v19  ;;  %4517 = vmatpush.msra.mxu1 %v3590_v9 }
 0x3f4   : > { %v3786_v41 = vpop.f32.mrf.mxu2  ;;  %4314 = vmatmul.f32.gmra.mxu3 %v2984_v35 }
 0x3f5   : > { %v3787_v24 = vadd.f32 %v3786_v41, %v6973_v34 }
 0x3f6   : > { %v7304_v59 = vpop.f32.mrf.mxu1 }
 0x3f7   : > { %v3900_v44 = vadd.f32 %v3899_v51, %v3787_v24  ;;  %v4018_v52 = vpop.f32.mrf.mxu0  ;;  %v2985_v24 = vld [vmem:[#allocation3 + $0x80] sm:$0xff] }
 0x3f9   : > { %4124 = vmatmul.f32.gmra.mxu1 %v7306_v13  ;;  %4192 = vmatmul.f32.gmra.mxu2 %v7308_v56  ;;  %v7315_v17 = vadd.f32 %v4012_v61, %v3900_v44  ;;  %v3911_v34 = vpop.f32.mrf.mxu3 }
 0x3fa   : > { %4421 = vmatmul.f32.gmra.mxu0 %v7047_v31 }
 0x3fb   : > { %8033 = vst [vmem:[#allocation21_spill] sm:$0xff] %v7315_v17  ;;  %v7335_v17 = vld [vmem:[#allocation3 + $0x52] sm:$0xff] }
 0x3fc   : > { %v3789_v51 = vpop.f32.mrf.mxu2  ;;  %4317 = vmatmul.f32.gmra.mxu3 %v2985_v24  ;;  %v7333_v24 = vld [vmem:[#allocation3 + $0x109] sm:$0xff] }
 0x3fd   : > { %v3790_v23 = vadd.f32 %v3789_v51, %v6991_v22 }
 0x3fe   : > { %v7319_v41 = vpop.f32.mrf.mxu1 }
 0x3ff   : > { %v3903_v35 = vadd.f32 %v3902_v36, %v3790_v23  ;;  %v4021_v19 = vpop.f32.mrf.mxu0  ;;  %v2986_v36 = vld [vmem:[#allocation3 + $0x90] sm:$0xff] }
 0x401   : > { %4127 = vmatmul.f32.gmra.mxu1 %v7321_v48  ;;  %4195 = vmatmul.f32.gmra.mxu2 %v7323_v26  ;;  %v7327_v31 = vadd.f32 %v4015_v20, %v3903_v35  ;;  %v3914_v61 = vpop.f32.mrf.mxu3 }
 0x402   : > { %4424 = vmatmul.f32.gmra.mxu0 %v7069_v50  ;;  %v3589_v50 = vld [vmem:[%s7891_s4 + $0x418] sm:$0xff] }
 0x403   : > { %8034 = vst [vmem:[#allocation23_spill] sm:$0xff] %v7327_v31  ;;  %4518 = vmatpush.msra.mxu1 %v3589_v50 }
 0x404   : > { %v3792_v22 = vpop.f32.mrf.mxu2  ;;  %4320 = vmatmul.f32.gmra.mxu3 %v2986_v36 }
 0x405   : > { %v3793_v44 = vadd.f32 %v3792_v22, %v7008_v4 }
 0x406   : > { %v7331_v9 = vpop.f32.mrf.mxu1 }
 0x407   : > { %v3906_v51 = vadd.f32 %v3905_v3, %v3793_v44  ;;  %v4024_v23 = vpop.f32.mrf.mxu0  ;;  %v2987_v44 = vld [vmem:[#allocation3 + $0x98] sm:$0xff] }
 0x409   : > { %4130 = vmatmul.f32.gmra.mxu1 %v7333_v24  ;;  %4198 = vmatmul.f32.gmra.mxu2 %v7335_v17  ;;  %v7342_v20 = vadd.f32 %v4018_v52, %v3906_v51  ;;  %v3917_v4 = vpop.f32.mrf.mxu3 }
 0x40a   : > { %4427 = vmatmul.f32.gmra.mxu0 %v7085_v11 }
 0x40b   : > { %8035 = vst [vmem:[#allocation7_spill] sm:$0xff] %v7342_v20  ;;  %v7362_v20 = vld [vmem:[#allocation3 + $0x6a] sm:$0xff] }
 0x40c   : > { %v3795_v3 = vpop.f32.mrf.mxu2  ;;  %4323 = vmatmul.f32.gmra.mxu3 %v2987_v44  ;;  %v7360_v44 = vld [vmem:[#allocation3 + $0x121] sm:$0xff] }
 0x40d   : > { %v3796_v35 = vadd.f32 %v3795_v3, %v7025_v47 }
 0x40e   : > { %v7346_v22 = vpop.f32.mrf.mxu1 }
 0x40f   : > { %v3909_v36 = vadd.f32 %v3908_v40, %v3796_v35  ;;  %v4027_v31 = vpop.f32.mrf.mxu0  ;;  %v2988_v40 = vld [vmem:[#allocation3 + $0xa8] sm:$0xff] }
 0x411   : > { %4133 = vmatmul.f32.gmra.mxu1 %v7348_v57  ;;  %4201 = vmatmul.f32.gmra.mxu2 %v7350_v53  ;;  %v7354_v11 = vadd.f32 %v4021_v19, %v3909_v36  ;;  %v3920_v52 = vpop.f32.mrf.mxu3 }
 0x412   : > { %4430 = vmatmul.f32.gmra.mxu0 %v7109_v43  ;;  %v3588_v43 = vld [vmem:[%s7891_s4 + $0x410] sm:$0xff] }
 0x413   : > { %8036 = vst [vmem:[#allocation22_spill] sm:$0xff] %v7354_v11  ;;  %4519 = vmatpush.msra.mxu1 %v3588_v43  ;;  %v2990_v43 = vld [vmem:[#allocation3 + $0xc0] sm:$0xff] }
 0x414   : > { %v3798_v47 = vpop.f32.mrf.mxu2  ;;  %4326 = vmatmul.f32.gmra.mxu3 %v2988_v40 }
 0x415   : > { %v3799_v51 = vadd.f32 %v3798_v47, %v7042_v33 }
 0x416   : > { %v7358_v50 = vpop.f32.mrf.mxu1 }
 0x417   : > { %v3912_v3 = vadd.f32 %v3911_v34, %v3799_v51  ;;  %v4030_v35 = vpop.f32.mrf.mxu0  ;;  %v2989_v51 = vld [vmem:[#allocation3 + $0xb0] sm:$0xff] }
 0x419   : > { %4136 = vmatmul.f32.gmra.mxu1 %v7360_v44  ;;  %4204 = vmatmul.f32.gmra.mxu2 %v7362_v20  ;;  %v7369_v19 = vadd.f32 %v4024_v23, %v3912_v3  ;;  %v3923_v34 = vpop.f32.mrf.mxu3 }
 0x41a   : > { %4433 = vmatmul.f32.gmra.mxu0 %v7135_v30 }
 0x41b   : > { %8037 = vst [vmem:[#allocation8_spill] sm:$0xff] %v7369_v19  ;;  %v7389_v19 = vld [vmem:[#allocation3 + $0x82] sm:$0xff] }
 0x41c   : > { %v3801_v33 = vpop.f32.mrf.mxu2  ;;  %4329 = vmatmul.f32.gmra.mxu3 %v2989_v51  ;;  %v7387_v51 = vld [vmem:[#allocation3 + $0x139] sm:$0xff] }
 0x41d   : > { %v3802_v36 = vadd.f32 %v3801_v33, %v7061_v45 }
 0x41e   : > { %v7373_v47 = vpop.f32.mrf.mxu1 }
 0x41f   : > { %v3915_v40 = vadd.f32 %v3914_v61, %v3802_v36  ;;  %v4033_v11 = vpop.f32.mrf.mxu0 }
 0x421   : > { %4139 = vmatmul.f32.gmra.mxu1 %v7375_v7  ;;  %4207 = vmatmul.f32.gmra.mxu2 %v7377_v49  ;;  %v7381_v30 = vadd.f32 %v4027_v31, %v3915_v40  ;;  %v3926_v61 = vpop.f32.mrf.mxu3 }
 0x422   : > { %4436 = vmatmul.f32.gmra.mxu0 %v7193_v39  ;;  %v3587_v39 = vld [vmem:[%s7891_s4 + $0x408] sm:$0xff] }
 0x423   : > { %8038 = vst [vmem:[#allocation9_spill] sm:$0xff] %v7381_v30  ;;  %4520 = vmatpush.msra.mxu1 %v3587_v39  ;;  %v7402_v30 = vld [vmem:[#allocation3 + $0x141] sm:$0xff] }
 0x424   : > { %v3804_v23 = vpop.f32.mrf.mxu2  ;;  %4332 = vmatmul.f32.gmra.mxu3 %v2990_v43 }
 0x425   : > { %v3805_v45 = vadd.f32 %v3804_v23, %v7080_v18  ;;  %v2991_v23 = vld [vmem:[#allocation3 + $0xc8] sm:$0xff] }
 0x426   : > { %v7385_v3 = vpop.f32.mrf.mxu1 }
 0x427   : > { %v3918_v33 = vadd.f32 %v3917_v4, %v3805_v45  ;;  %v4036_v36 = vpop.f32.mrf.mxu0 }
 0x429   : > { %4142 = vmatmul.f32.gmra.mxu1 %v7387_v51  ;;  %4210 = vmatmul.f32.gmra.mxu2 %v7389_v19  ;;  %v7396_v18 = vadd.f32 %v4030_v35, %v3918_v33  ;;  %v3929_v0 = vpop.f32.mrf.mxu3 }
 0x42a   : > { %4439 = vmatmul.f32.gmra.mxu0 %v7229_v1 }
 0x42b   : > { %8039 = vst [vmem:[#allocation10_spill] sm:$0xff] %v7396_v18  ;;  %v7429_v18 = vld [vmem:[#allocation3 + $0x159] sm:$0xff] }
 0x42c   : > { %v3807_v31 = vpop.f32.mrf.mxu2  ;;  %4335 = vmatmul.f32.gmra.mxu3 %v2991_v23  ;;  %v7416_v23 = vld [vmem:[#allocation3 + $0x9a] sm:$0xff] }
 0x42d   : > { %v3808_v4 = vadd.f32 %v3807_v31, %v7099_v58 }
 0x42e   : > { %v7400_v40 = vpop.f32.mrf.mxu1 }
 0x42f   : > { %v3921_v45 = vadd.f32 %v3920_v52, %v3808_v4  ;;  %v4039_v43 = vpop.f32.mrf.mxu0  ;;  %v2992_v52 = vld [vmem:[#allocation3 + $0xd8] sm:$0xff] }
 0x430   : > { %v7414_v4 = vld [vmem:[#allocation3 + $0x151] sm:$0xff] }
 0x431   : > { %4145 = vmatmul.f32.gmra.mxu1 %v7402_v30  ;;  %4213 = vmatmul.f32.gmra.mxu2 %v7404_v6  ;;  %v7408_v1 = vadd.f32 %v4033_v11, %v3921_v45 }
 0x432   : > { %4442 = vmatmul.f32.gmra.mxu0 %v7247_v38  ;;  %v3586_v38 = vld [vmem:[%s7891_s4 + $0x400] sm:$0xff] }
 0x433   : > { %8040 = vst [vmem:[#allocation11_spill] sm:$0xff] %v7408_v1  ;;  %4521 = vmatpush.msra.mxu1 %v3586_v38 }
 0x434   : > { %v3810_v58 = vpop.f32.mrf.mxu2  ;;  %4338 = vmatmul.f32.gmra.mxu3 %v2992_v52 }
 0x435   : > { %v3811_v35 = vadd.f32 %v3810_v58, %v7132_v63  ;;  %v3932_v63 = vpop.f32.mrf.mxu3 }
 0x436   : > { %v7412_v33 = vpop.f32.mrf.mxu1 }
 0x437   : > { %8041 = vst [vmem:[#allocation14_spill] sm:$0xff] %v7412_v33  ;;  %v3924_v39 = vadd.f32 %v3923_v34, %v3811_v35  ;;  %v4042_v31 = vpop.f32.mrf.mxu0  ;;  %v2993_v35 = vld [vmem:[#allocation3 + $0xe0] sm:$0xff]  ;;  %v7431_v33 = vld [vmem:[#allocation3 + $0xaa] sm:$0xff] }
 0x439   : > { %4148 = vmatmul.f32.gmra.mxu1 %v7414_v4  ;;  %4216 = vmatmul.f32.gmra.mxu2 %v7416_v23  ;;  %v7423_v11 = vadd.f32 %v4036_v36, %v3924_v39 }
 0x43a   : > { %4445 = vmatmul.f32.gmra.mxu0 %v7258_v21 }
 0x43b   : > { %8042 = vst [vmem:[#allocation18_spill] sm:$0xff] %v7423_v11  ;;  %v7443_v11 = vld [vmem:[#allocation3 + $0xb2] sm:$0xff] }
 0x43c   : > { %v3813_v34 = vpop.f32.mrf.mxu2  ;;  %4341 = vmatmul.f32.gmra.mxu3 %v2993_v35  ;;  %v7441_v35 = vld [vmem:[#allocation3 + $0x169] sm:$0xff] }
 0x43d   : > { %v3814_v45 = vadd.f32 %v3813_v34, %v7184_v42  ;;  %v3935_v42 = vpop.f32.mrf.mxu3 }
 0x43e   : > { %v7427_v58 = vpop.f32.mrf.mxu1 }
 0x43f   : > { %v3927_v52 = vadd.f32 %v3926_v61, %v3814_v45  ;;  %v4045_v1 = vpop.f32.mrf.mxu0  ;;  %v2994_v61 = vld [vmem:[#allocation3 + $0xf0] sm:$0xff] }
 0x441   : > { %4151 = vmatmul.f32.gmra.mxu1 %v7429_v18  ;;  %4219 = vmatmul.f32.gmra.mxu2 %v7431_v33  ;;  %v7435_v21 = vadd.f32 %v4039_v43, %v3927_v52 }
 0x442   : > { %4448 = vmatmul.f32.gmra.mxu0 %v7273_v14 }
 0x443   : > { %8043 = vst [vmem:[#allocation24_spill] sm:$0xff] %v7435_v21  ;;  %v7455_v21 = vld [vmem:[#allocation3 + $0xc2] sm:$0xff] }
 0x444   : > { %v3816_v36 = vpop.f32.mrf.mxu2  ;;  %4344 = vmatmul.f32.gmra.mxu3 %v2994_v61  ;;  %v7453_v61 = vld [vmem:[#allocation3 + $0x171] sm:$0xff] }
 0x445   : > { %v3817_v39 = vadd.f32 %v3816_v36, %v7226_v46  ;;  %v2995_v36 = vld [vmem:[#allocation3 + $0xf8] sm:$0xff] }
 0x446   : > { %v7439_v38 = vpop.f32.mrf.mxu1 }
 0x447   : > { %8044 = vst [vmem:[#allocation25_spill] sm:$0xff] %v7439_v38  ;;  %v3930_v34 = vadd.f32 %v3929_v0, %v3817_v39  ;;  %v4048_v45 = vpop.f32.mrf.mxu0  ;;  %v3938_v0 = vpop.f32.mrf.mxu3 }
 0x449   : > { %4154 = vmatmul.f32.gmra.mxu1 %v7441_v35  ;;  %4222 = vmatmul.f32.gmra.mxu2 %v7443_v11  ;;  %v7447_v43 = vadd.f32 %v4042_v31, %v3930_v34 }
 0x44a   : > { %4451 = vmatmul.f32.gmra.mxu0 %v7282_v25 }
 0x44b   : > { %8045 = vst [vmem:[#allocation26_spill] sm:$0xff] %v7447_v43 }
 0x44c   : > { %v3819_v14 = vpop.f32.mrf.mxu2  ;;  %4347 = vmatmul.f32.gmra.mxu3 %v2995_v36  ;;  %v7467_v36 = vld [vmem:[#allocation3 + $0xca] sm:$0xff] }
 0x44d   : > { %v3820_v46 = vadd.f32 %v3819_v14, %v7244_v32 }
 0x44e   : > { %v7451_v52 = vpop.f32.mrf.mxu1 }
 0x44f   : > { %v3933_v39 = vadd.f32 %v3932_v63, %v3820_v46  ;;  %v4051_v38 = vpop.f32.mrf.mxu0  ;;  %v2996_v63 = vld [vmem:[#allocation3 + $0x108] sm:$0xff]  ;;  %v4297_v43 = vpop.f32.mrf.mxu3 }
 0x450   : > { %v7465_v46 = vld [vmem:[#allocation3 + $0x181] sm:$0xff] }
 0x451   : > { %4157 = vmatmul.f32.gmra.mxu1 %v7453_v61  ;;  %4225 = vmatmul.f32.gmra.mxu2 %v7455_v21  ;;  %v7459_v31 = vadd.f32 %v4045_v1, %v3933_v39 }
 0x452   : > { %4454 = vmatmul.f32.gmra.mxu0 %v7294_v27 }
 0x453   : > { %8046 = vst [vmem:[#allocation27_spill] sm:$0xff] %v7459_v31  ;;  %v7479_v31 = vld [vmem:[#allocation3 + $0xda] sm:$0xff] }
 0x454   : > { %v3822_v32 = vpop.f32.mrf.mxu2  ;;  %4350 = vmatmul.f32.gmra.mxu3 %v2996_v63  ;;  %v7477_v63 = vld [vmem:[#allocation3 + $0x189] sm:$0xff] }
 0x455   : > { %v3823_v25 = vadd.f32 %v3822_v32, %v7255_v8 }
 0x456   : > { %v7463_v34 = vpop.f32.mrf.mxu1 }
 0x457   : > { %v3936_v14 = vadd.f32 %v3935_v42, %v3823_v25  ;;  %v4410_v27 = vpop.f32.mrf.mxu0  ;;  %v2997_v42 = vld [vmem:[#allocation3 + $0x110] sm:$0xff] }
 0x459   : > { %4160 = vmatmul.f32.gmra.mxu1 %v7465_v46  ;;  %4228 = vmatmul.f32.gmra.mxu2 %v7467_v36  ;;  %v7471_v1 = vadd.f32 %v4048_v45, %v3936_v14 }
 0x45a   : > { %4457 = vmatmul.f32.gmra.mxu0 %v7306_v13  ;;  %v4300_v13 = vpop.f32.mrf.mxu3 }
 0x45b   : > { %8047 = vst [vmem:[#allocation28_spill] sm:$0xff] %v7471_v1 }
 0x45c   : > { %v3825_v8 = vpop.f32.mrf.mxu2  ;;  %4353 = vmatmul.f32.gmra.mxu3 %v2997_v42  ;;  %v2998_v42 = vld [vmem:[#allocation3 + $0x120] sm:$0xff] }
 0x45d   : > { %v3826_v39 = vadd.f32 %v3825_v8, %v7270_v55  ;;  %v4072_v55 = vadd.f32 %v7280_v60, %v6954_v2  ;;  %v4075_v2 = vadd.f32 %v7292_v54, %v6969_v12  ;;  %v4078_v12 = vadd.f32 %v7304_v59, %v6987_v15 }
 0x45e   : > { %v7475_v32 = vpop.f32.mrf.mxu1  ;;  %v4081_v15 = vadd.f32 %v7319_v41, %v7004_v16  ;;  %v4084_v16 = vadd.f32 %v7331_v9, %v7021_v62  ;;  %v4087_v62 = vadd.f32 %v7346_v22, %v7038_v29  ;;  %v4090_v29 = vadd.f32 %v7358_v50, %v7055_v5 }
 0x45f   : > { %8048 = vst [vmem:[#allocation29_spill] sm:$0xff] %v7475_v32  ;;  %v3939_v25 = vadd.f32 %v3938_v0, %v3826_v39  ;;  %v4413_v8 = vpop.f32.mrf.mxu0  ;;  %v7490_v32 = vld [vmem:[#allocation3 + $0xe2] sm:$0xff]  ;;  %v4093_v5 = vadd.f32 %v7373_v47, %v7074_v37 }
 0x460   : > { %v3006_v47 = vld [vmem:[#allocation3 + $0x180] sm:$0xff] }
 0x461   : > { %4163 = vmatmul.f32.gmra.mxu1 %v7477_v63  ;;  %4231 = vmatmul.f32.gmra.mxu2 %v7479_v31  ;;  %v7483_v45 = vadd.f32 %v4051_v38, %v3939_v25 }
 0x462   : > { %4460 = vmatmul.f32.gmra.mxu0 %v7321_v48  ;;  %v4303_v48 = vpop.f32.mrf.mxu3 }
 0x464   : > { %v4184_v14 = vpop.f32.mrf.mxu2  ;;  %4356 = vmatmul.f32.gmra.mxu3 %v2998_v42  ;;  %v7501_v42 = vld [vmem:[#allocation3 + $0xf2] sm:$0xff] }
 0x465   : > { %v4185_v0 = vadd.f32 %v4184_v14, %v4072_v55  ;;  %v2999_v14 = vld [vmem:[#allocation3 + $0x128] sm:$0xff] }
 0x466   : > { %v7488_v39 = vpop.f32.mrf.mxu1 }
 0x467   : > { %v4298_v1 = vadd.f32 %v4297_v43, %v4185_v0  ;;  %v4416_v43 = vpop.f32.mrf.mxu0 }
 0x469   : > { %4234 = vmatmul.f32.gmra.mxu2 %v7490_v32  ;;  %4522 = vmatmul.f32.vlgmr.msra.gmra.mxu1 %v7296_v28  ;;  %v7494_v38 = vadd.f32 %v4410_v27, %v4298_v1 }
 0x46a   : > { %4463 = vmatmul.f32.gmra.mxu0 %v7333_v24  ;;  %v4306_v27 = vpop.f32.mrf.mxu3 }
 0x46c   : > { %v4187_v60 = vpop.f32.mrf.mxu2  ;;  %4359 = vmatmul.f32.gmra.mxu3 %v2999_v14 }
 0x46d   : > { %v4188_v25 = vadd.f32 %v4187_v60, %v4075_v2 }
 0x46e   : > { %v7499_v55 = vpop.f32.mrf.mxu1 }
 0x46f   : > { %v4301_v0 = vadd.f32 %v4300_v13, %v4188_v25  ;;  %v3000_v13 = vld [vmem:[#allocation3 + $0x138] sm:$0xff]  ;;  %v4419_v60 = vpop.f32.mrf.mxu0 }
 0x470   : > { %v7512_v25 = vld [vmem:[#allocation3 + $0xfa] sm:$0xff] }
 0x471   : > { %4237 = vmatmul.f32.gmra.mxu2 %v7501_v42  ;;  %4525 = vmatmul.f32.gmra.mxu1 %v7308_v56  ;;  %v7505_v28 = vadd.f32 %v4413_v8, %v4301_v0  ;;  %v7523_v0 = vld [vmem:[#allocation3 + $0x10a] sm:$0xff] }
 0x472   : > { %4466 = vmatmul.f32.gmra.mxu0 %v7348_v57 }
 0x474   : > { %v4190_v54 = vpop.f32.mrf.mxu2  ;;  %4362 = vmatmul.f32.gmra.mxu3 %v3000_v13  ;;  %v7534_v13 = vld [vmem:[#allocation3 + $0x112] sm:$0xff] }
 0x475   : > { %v4191_v24 = vadd.f32 %v4190_v54, %v4078_v12  ;;  %v4309_v12 = vpop.f32.mrf.mxu3 }
 0x476   : > { %v7510_v1 = vpop.f32.mrf.mxu1 }
 0x477   : > { %v4304_v2 = vadd.f32 %v4303_v48, %v4191_v24  ;;  %v3001_v48 = vld [vmem:[#allocation3 + $0x140] sm:$0xff]  ;;  %v3002_v24 = vld [vmem:[#allocation3 + $0x150] sm:$0xff] }
 0x479   : > { %4240 = vmatmul.f32.gmra.mxu2 %v7512_v25  ;;  %4528 = vmatmul.f32.gmra.mxu1 %v7323_v26  ;;  %v7516_v56 = vadd.f32 %v4416_v43, %v4304_v2 }
 0x47a   : > { %4469 = vmatmul.f32.gmra.mxu0 %v7360_v44  ;;  %v4422_v44 = vpop.f32.mrf.mxu0 }
 0x47c   : > { %v4193_v57 = vpop.f32.mrf.mxu2  ;;  %4365 = vmatmul.f32.gmra.mxu3 %v3001_v48  ;;  %v7545_v48 = vld [vmem:[#allocation3 + $0x122] sm:$0xff] }
 0x47d   : > { %v4194_v59 = vadd.f32 %v4193_v57, %v4081_v15  ;;  %v4312_v2 = vpop.f32.mrf.mxu3  ;;  %v3003_v57 = vld [vmem:[#allocation3 + $0x158] sm:$0xff] }
 0x47e   : > { %v7521_v8 = vpop.f32.mrf.mxu1 }
 0x47f   : > { %v4307_v14 = vadd.f32 %v4306_v27, %v4194_v59 }
 0x481   : > { %4243 = vmatmul.f32.gmra.mxu2 %v7523_v0  ;;  %4531 = vmatmul.f32.gmra.mxu1 %v7335_v17  ;;  %v7527_v26 = vadd.f32 %v4419_v60, %v4307_v14 }
 0x482   : > { %4472 = vmatmul.f32.gmra.mxu0 %v7375_v7  ;;  %v4425_v7 = vpop.f32.mrf.mxu0 }
 0x484   : > { %v4196_v41 = vpop.f32.mrf.mxu2  ;;  %4368 = vmatmul.f32.gmra.mxu3 %v3002_v24 }
 0x485   : > { %v4197_v43 = vadd.f32 %v4196_v41, %v4084_v16  ;;  %v3004_v16 = vld [vmem:[#allocation3 + $0x168] sm:$0xff] }
 0x486   : > { %v7532_v54 = vpop.f32.mrf.mxu1 }
 0x487   : > { %v4310_v27 = vadd.f32 %v4309_v12, %v4197_v43  ;;  %v7556_v43 = vld [vmem:[#allocation3 + $0x12a] sm:$0xff] }
 0x489   : > { %4246 = vmatmul.f32.gmra.mxu2 %v7534_v13  ;;  %4534 = vmatmul.f32.gmra.mxu1 %v7350_v53  ;;  %v7538_v17 = vadd.f32 %v4422_v44, %v4310_v27 }
 0x48a   : > { %4475 = vmatmul.f32.gmra.mxu0 %v7387_v51  ;;  %v4315_v51 = vpop.f32.mrf.mxu3  ;;  %v4428_v12 = vpop.f32.mrf.mxu0 }
 0x48c   : > { %v4199_v9 = vpop.f32.mrf.mxu2  ;;  %4371 = vmatmul.f32.gmra.mxu3 %v3003_v57  ;;  %v3007_v57 = vld [vmem:[#allocation3 + $0x188] sm:$0xff] }
 0x48d   : > { %v4200_v60 = vadd.f32 %v4199_v9, %v4087_v62  ;;  %v7567_v9 = vld [vmem:[#allocation3 + $0x13a] sm:$0xff] }
 0x48e   : > { %v7543_v15 = vpop.f32.mrf.mxu1 }
 0x48f   : > { %v4313_v59 = vadd.f32 %v4312_v2, %v4200_v60  ;;  %v3005_v2 = vld [vmem:[#allocation3 + $0x170] sm:$0xff] }
 0x491   : > { %4249 = vmatmul.f32.gmra.mxu2 %v7545_v48  ;;  %4537 = vmatmul.f32.gmra.mxu1 %v7362_v20  ;;  %v7549_v53 = vadd.f32 %v4425_v7, %v4313_v59 }
 0x492   : > { %4478 = vmatmul.f32.gmra.mxu0 %v7402_v30  ;;  %v4318_v24 = vpop.f32.mrf.mxu3  ;;  %v4431_v7 = vpop.f32.mrf.mxu0 }
 0x494   : > { %v4202_v22 = vpop.f32.mrf.mxu2  ;;  %4374 = vmatmul.f32.gmra.mxu3 %v3004_v16 }
 0x495   : > { %v4203_v14 = vadd.f32 %v4202_v22, %v4090_v29  ;;  %v7590_v29 = vld [vmem:[#allocation3 + $0x15a] sm:$0xff]  ;;  %v7597_v22 = vld [vmem:[#allocation3 + $0x16a] sm:$0xff] }
 0x496   : > { %v7554_v44 = vpop.f32.mrf.mxu1 }
 0x497   : > { %v4316_v41 = vadd.f32 %v4315_v51, %v4203_v14  ;;  %v7604_v51 = vld [vmem:[#allocation3 + $0x172] sm:$0xff]  ;;  %v7610_v14 = vld [vmem:[#allocation3 + $0x182] sm:$0xff] }
 0x499   : > { %4252 = vmatmul.f32.gmra.mxu2 %v7556_v43  ;;  %4540 = vmatmul.f32.gmra.mxu1 %v7377_v49  ;;  %v7560_v20 = vadd.f32 %v4428_v12, %v4316_v41  ;;  %v7626_v12 = vld [vmem:[%s7892_s5] ss:$0 sm:$0xff] }
 0x49a   : > { %4481 = vmatmul.f32.gmra.mxu0 %v7414_v4  ;;  %v7576_v4 = vld [vmem:[#allocation3 + $0x142] sm:$0xff]  ;;  %v7632_v41 = vld [vmem:[%s7893_s6] ss:$0 sm:$0xff] }
 0x49c   : > { %v4205_v50 = vpop.f32.mrf.mxu2  ;;  %4377 = vmatmul.f32.gmra.mxu3 %v3005_v2 }
 0x49d   : > { %v4206_v30 = vadd.f32 %v4205_v50, %v4093_v5  ;;  %v4904_v50 = vld [vmem:[#allocation2 + $0x19] sm:$0xff] }
 0x49e   : > { %v7565_v27 = vpop.f32.mrf.mxu1 }
 0x49f   : > { %v4319_v62 = vadd.f32 %v4318_v24, %v4206_v30 }
 0x4a1   : > { %4255 = vmatmul.f32.gmra.mxu2 %v7567_v9  ;;  %4543 = vmatmul.f32.gmra.mxu1 %v7389_v19  ;;  %v7571_v49 = vadd.f32 %v4431_v7, %v4319_v62  ;;  %v7583_v19 = vld [vmem:[#allocation3 + $0x152] sm:$0xff]  ;;  %v7650_v62 = vpop.f32.mrf.mxu3 }
 0x4a2   : > { %4484 = vmatmul.f32.gmra.mxu0 %v7429_v18  ;;  %v3008_v18 = vld [vmem:[#allocation3 + $0x198] sm:$0xff] }
 0x4a4   : > { %4380 = vmatmul.f32.gmra.mxu3 %v3006_v47  ;;  %v7653_v47 = vpop.f32.mrf.mxu0 }
 0x4a6   : > { %v7574_v37 = vpop.f32.mrf.mxu1 }
 0x4a9   : > { %4258 = vmatmul.f32.gmra.mxu2 %v7576_v4  ;;  %4546 = vmatmul.f32.gmra.mxu1 %v7404_v6 }
 0x4aa   : > { %4487 = vmatmul.f32.gmra.mxu0 %v7441_v35  ;;  %v4903_v35 = vld [vmem:[#allocation2 + $0x8] sm:$0xff] }
 0x4ac   : > { %4383 = vmatmul.f32.gmra.mxu3 %v3007_v57  ;;  %v4905_v57 = vld [vmem:[#allocation2 + $0x21] sm:$0xff] }
 0x4ae   : > { %v7581_v60 = vpop.f32.mrf.mxu1 }
 0x4b1   : > { %4261 = vmatmul.f32.gmra.mxu2 %v7583_v19  ;;  %4549 = vmatmul.f32.gmra.mxu1 %v7416_v23 }
 0x4b2   : > { %4490 = vmatmul.f32.gmra.mxu0 %v7453_v61  ;;  %v3072_v61 = vld [vmem:[#allocation3 + $0x199] sm:$0xff] }
 0x4b4   : > { %4386 = vmatmul.f32.gmra.mxu3 %v3008_v18 }
 0x4b6   : > { %v7588_v59 = vpop.f32.mrf.mxu1 }
 0x4b9   : > { %4264 = vmatmul.f32.gmra.mxu2 %v7590_v29  ;;  %4552 = vmatmul.f32.gmra.mxu1 %v7431_v33 }
 0x4ba   : > { %4493 = vmatmul.f32.gmra.mxu0 %v7465_v46  ;;  %v3073_v46 = vld [vmem:[#allocation3 + $0x1a1] sm:$0xff] }
 0x4bc   : > { %4389 = vmatmul.f32.gmra.mxu3 %v4903_v35 }
 0x4be   : > { %v7595_v6 = vpop.f32.mrf.mxu1 }
 0x4c1   : > { %4267 = vmatmul.f32.gmra.mxu2 %v7597_v22  ;;  %4555 = vmatmul.f32.gmra.mxu1 %v7443_v11 }
 0x4c2   : > { %4496 = vmatmul.f32.gmra.mxu0 %v7477_v63  ;;  %v7616_v63 = vld [vmem:[#allocation3 + $0x18a] sm:$0xff] }
 0x4c6   : > { %v7602_v23 = vpop.f32.mrf.mxu1 }
 0x4c9   : > { %4270 = vmatmul.f32.gmra.mxu2 %v7604_v51  ;;  %4558 = vmatmul.f32.gmra.mxu1 %v7455_v21 }
 0x4ca   : > { %4499 = vmatmul.f32.gmra.mxu0 %v3072_v61 }
 0x4ce   : > { %v7608_v33 = vpop.f32.mrf.mxu1 }
 0x4d1   : > { %4273 = vmatmul.f32.gmra.mxu2 %v7610_v14  ;;  %4561 = vmatmul.f32.gmra.mxu1 %v7467_v36 }
 0x4d2   : > { %4502 = vmatmul.f32.gmra.mxu0 %v3073_v46 }
 0x4d6   : > { %v7614_v11 = vpop.f32.mrf.mxu1 }
 0x4d9   : > { %4276 = vmatmul.f32.gmra.mxu2 %v7616_v63  ;;  %4564 = vmatmul.f32.gmra.mxu1 %v7479_v31 }
 0x4de   : > { %v7620_v21 = vpop.f32.mrf.mxu1 }
 0x4e1   : > { %4567 = vmatmul.f32.gmra.mxu1 %v7490_v32  ;;  %v7637_v32 = vpop.f32.mrf.mxu2 }
 0x4e6   : > { %v4523_v36 = vpop.f32.mrf.mxu1 }
 0x4e7   : > { %v4524_v16 = vadd.f32 %v4523_v36, %v7494_v38 }
 0x4e9   : > { %v4623_v5 = vmul.f32 %v7626_v12, %v4524_v16  ;;  %4570 = vmatmul.f32.gmra.mxu1 %v7501_v42  ;;  %v7655_v35 = vpop.f32.mrf.mxu2  ;;  %v7662_v16 = vpop.f32.mrf.mxu3 }
 0x4eb   : > { %v4659_v31 = vadd.f32 %v7632_v41, %v4623_v5  ;;  %v4906_v5 = vld [vmem:[#allocation2 + $0x31] sm:$0xff] }
 0x4ed   : > { %v4691_v30 = vadd.f32 %v4904_v50, %v4659_v31 }
 0x4ee   : > { %v4526_v38 = vpop.f32.mrf.mxu1 }
 0x4ef   : > { %v4723_v24 = vmax.f32 %v4691_v30, 0.0  ;;  %v4527_v2 = vadd.f32 %v4526_v38, %v7505_v28  ;;  %v7664_v30 = vpop.f32.mrf.mxu0 }
 0x4f1   : > { %4755 = vst [vmem:[%s7644_s29] sm:$0xff] %v4723_v24  ;;  %v4624_v42 = vmul.f32 %v7626_v12, %v4527_v2  ;;  %4573 = vmatmul.f32.gmra.mxu1 %v7512_v25  ;;  %v7667_v2 = vpop.f32.mrf.mxu2 }
 0x4f3   : > { %v4660_v7 = vadd.f32 %v7632_v41, %v4624_v42  ;;  %v4907_v42 = vld [vmem:[#allocation2 + $0x39] sm:$0xff] }
 0x4f5   : > { %v4692_v18 = vadd.f32 %v4905_v57, %v4660_v7  ;;  %v7673_v57 = vpop.f32.mrf.mxu3 }
 0x4f6   : > { %v4529_v61 = vpop.f32.mrf.mxu1 }
 0x4f7   : > { %v4724_v46 = vmax.f32 %v4692_v18, 0.0  ;;  %v4530_v28 = vadd.f32 %v4529_v61, %v7516_v56 }
 0x4f9   : > { %4756 = vst [vmem:[%s7644_s29 + $0x8] sm:$0xff] %v4724_v46  ;;  %v4625_v36 = vmul.f32 %v7626_v12, %v4530_v28  ;;  %4576 = vmatmul.f32.gmra.mxu1 %v7523_v0  ;;  %v7676_v28 = vpop.f32.mrf.mxu0 }
 0x4fb   : > { %v4661_v25 = vadd.f32 %v7632_v41, %v4625_v36  ;;  %v7681_v36 = vpop.f32.mrf.mxu2 }
 0x4fd   : > { %v4693_v31 = vadd.f32 %v4906_v5, %v4661_v25  ;;  %v4908_v25 = vld [vmem:[#allocation2 + $0x49] sm:$0xff] }
 0x4fe   : > { %v4532_v50 = vpop.f32.mrf.mxu1 }
 0x4ff   : > { %v4725_v38 = vmax.f32 %v4693_v31, 0.0  ;;  %v4533_v24 = vadd.f32 %v4532_v50, %v7527_v26 }
 0x501   : > { %4757 = vst [vmem:[%s7644_s29 + $0x10] sm:$0xff] %v4725_v38  ;;  %v4626_v56 = vmul.f32 %v7626_v12, %v4533_v24  ;;  %4579 = vmatmul.f32.gmra.mxu1 %v7534_v13  ;;  %v7685_v24 = vpop.f32.mrf.mxu3 }
 0x503   : > { %v4662_v0 = vadd.f32 %v7632_v41, %v4626_v56  ;;  %v7690_v56 = vpop.f32.mrf.mxu0 }
 0x505   : > { %v4694_v7 = vadd.f32 %v4907_v42, %v4662_v0  ;;  %v7693_v0 = vpop.f32.mrf.mxu2  ;;  %v4909_v42 = vld [vmem:[#allocation2 + $0x51] sm:$0xff] }
 0x506   : > { %v4535_v18 = vpop.f32.mrf.mxu1 }
 0x507   : > { %v4726_v61 = vmax.f32 %v4694_v7, 0.0  ;;  %v4536_v46 = vadd.f32 %v4535_v18, %v7538_v17 }
 0x509   : > { %4758 = vst [vmem:[%s7644_s29 + $0x18] sm:$0xff] %v4726_v61  ;;  %v4627_v26 = vmul.f32 %v7626_v12, %v4536_v46  ;;  %4582 = vmatmul.f32.gmra.mxu1 %v7545_v48 }
 0x50b   : > { %v4663_v13 = vadd.f32 %v7632_v41, %v4627_v26  ;;  %v7699_v26 = vpop.f32.mrf.mxu3 }
 0x50d   : > { %v4695_v5 = vadd.f32 %v4908_v25, %v4663_v13 }
 0x50e   : > { %v4538_v31 = vpop.f32.mrf.mxu1 }
 0x50f   : > { %v4727_v50 = vmax.f32 %v4695_v5, 0.0  ;;  %v4539_v38 = vadd.f32 %v4538_v31, %v7549_v53  ;;  %v7705_v5 = vpop.f32.mrf.mxu0  ;;  %v4910_v31 = vld [vmem:[#allocation2 + $0x61] sm:$0xff] }
 0x511   : > { %4759 = vst [vmem:[%s7644_s29 + $0x20] sm:$0xff] %v4727_v50  ;;  %v4628_v17 = vmul.f32 %v7626_v12, %v4539_v38  ;;  %4585 = vmatmul.f32.gmra.mxu1 %v7556_v43  ;;  %v4096_v43 = vadd.f32 %v7385_v3, %v7093_v10  ;;  %v8049_v3 = vld [vmem:[#allocation15_spill] sm:$0xff] }
 0x513   : > { %v4664_v48 = vadd.f32 %v7632_v41, %v4628_v17  ;;  %v4209_v25 = vadd.f32 %v7637_v32, %v4096_v43  ;;  %v4099_v32 = vadd.f32 %v7400_v40, %v8049_v3 }
 0x515   : > { %v4696_v7 = vadd.f32 %v4909_v42, %v4664_v48 }
 0x516   : > { %v4541_v18 = vpop.f32.mrf.mxu1 }
 0x517   : > { %v4728_v61 = vmax.f32 %v4696_v7, 0.0  ;;  %v4542_v46 = vadd.f32 %v4541_v18, %v7560_v20  ;;  %v7707_v20 = vpop.f32.mrf.mxu2  ;;  %v7717_v7 = vpop.f32.mrf.mxu3  ;;  %v4212_v18 = vadd.f32 %v7655_v35, %v4099_v32  ;;  %v8050_v35 = vld [vmem:[#allocation12_spill] sm:$0xff] }
 0x519   : > { %4760 = vst [vmem:[%s7644_s29 + $0x28] sm:$0xff] %v4728_v61  ;;  %v4629_v53 = vmul.f32 %v7626_v12, %v4542_v46  ;;  %4588 = vmatmul.f32.gmra.mxu1 %v7567_v9  ;;  %v4322_v9 = vadd.f32 %v7650_v62, %v4209_v25  ;;  %v4911_v61 = vld [vmem:[#allocation2 + $0x69] sm:$0xff] }
 0x51b   : > { %v4665_v13 = vadd.f32 %v7632_v41, %v4629_v53  ;;  %v7721_v53 = vpop.f32.mrf.mxu0 }
 0x51d   : > { %v4697_v50 = vadd.f32 %v4910_v31, %v4665_v13  ;;  %v8051_v31 = vld [vmem:[#allocation14_spill] sm:$0xff] }
 0x51e   : > { %v4544_v38 = vpop.f32.mrf.mxu1 }
 0x51f   : > { %v4729_v17 = vmax.f32 %v4697_v50, 0.0  ;;  %v4545_v48 = vadd.f32 %v4544_v38, %v7571_v49  ;;  %v4435_v49 = vadd.f32 %v7653_v47, %v4322_v9  ;;  %v7723_v25 = vpop.f32.mrf.mxu2  ;;  %v4102_v50 = vadd.f32 %v8051_v31, %v8050_v35 }
 0x521   : > { %4761 = vst [vmem:[%s7644_s29 + $0x30] sm:$0xff] %v4729_v17  ;;  %v4630_v10 = vmul.f32 %v7626_v12, %v4545_v48  ;;  %4591 = vmatmul.f32.gmra.mxu1 %v7576_v4  ;;  %v4325_v4 = vadd.f32 %v7662_v16, %v4212_v18  ;;  %v4215_v38 = vadd.f32 %v7667_v2, %v4102_v50  ;;  %v4912_v17 = vld [vmem:[#allocation2 + $0x79] sm:$0xff] }
 0x522   : > { %v8054_v50 = vld [vmem:[#allocation25_spill] sm:$0xff] }
 0x523   : > { %v4666_v42 = vadd.f32 %v7632_v41, %v4630_v10  ;;  %v4438_v9 = vadd.f32 %v7664_v30, %v4325_v4  ;;  %v7734_v10 = vpop.f32.mrf.mxu3  ;;  %v7737_v18 = vpop.f32.mrf.mxu0 }
 0x525   : > { %v4698_v46 = vadd.f32 %v4911_v61, %v4666_v42  ;;  %v4328_v42 = vadd.f32 %v7673_v57, %v4215_v38  ;;  %v8052_v61 = vld [vmem:[#allocation19_spill] sm:$0xff] }
 0x526   : > { %v4547_v62 = vpop.f32.mrf.mxu1  ;;  %v4105_v30 = vadd.f32 %v7427_v58, %v8052_v61  ;;  %v8053_v58 = vld [vmem:[#allocation16_spill] sm:$0xff]  ;;  %v8055_v61 = vld [vmem:[#allocation17_spill] sm:$0xff] }
 0x527   : > { %v4730_v43 = vmax.f32 %v4698_v46, 0.0  ;;  %v4548_v13 = vadd.f32 %v4547_v62, %v4435_v49  ;;  %v7742_v2 = vpop.f32.mrf.mxu2  ;;  %v4913_v62 = vld [vmem:[#allocation2 + $0x81] sm:$0xff]  ;;  %v4441_v57 = vadd.f32 %v7676_v28, %v4328_v42 }
 0x528   : > { %v4218_v49 = vadd.f32 %v7681_v36, %v4105_v30  ;;  %v4108_v36 = vadd.f32 %v8054_v50, %v8053_v58  ;;  %v4111_v30 = vadd.f32 %v7451_v52, %v8055_v61  ;;  %v4916_v58 = vld [vmem:[#allocation2 + $0xa9] sm:$0xff] }
 0x529   : > { %4762 = vst [vmem:[%s7644_s29 + $0x38] sm:$0xff] %v4730_v43  ;;  %v4631_v40 = vmul.f32 %v7626_v12, %v4548_v13  ;;  %4594 = vmatmul.f32.gmra.mxu1 %v7583_v19 }
 0x52b   : > { %v4667_v47 = vadd.f32 %v7632_v41, %v4631_v40  ;;  %v7749_v35 = vpop.f32.mrf.mxu3 }
 0x52d   : > { %v4699_v48 = vadd.f32 %v4912_v17, %v4667_v47  ;;  %v7757_v47 = vpop.f32.mrf.mxu0  ;;  %v4221_v17 = vadd.f32 %v7693_v0, %v4108_v36 }
 0x52e   : > { %v4550_v16 = vpop.f32.mrf.mxu1 }
 0x52f   : > { %v4731_v3 = vmax.f32 %v4699_v48, 0.0  ;;  %v4551_v32 = vadd.f32 %v4550_v16, %v4438_v9  ;;  %v7760_v38 = vpop.f32.mrf.mxu2  ;;  %v4914_v48 = vld [vmem:[#allocation2 + $0x91] sm:$0xff] }
 0x531   : > { %4763 = vst [vmem:[%s7644_s29 + $0x40] sm:$0xff] %v4731_v3  ;;  %v4632_v19 = vmul.f32 %v7626_v12, %v4551_v32  ;;  %4597 = vmatmul.f32.gmra.mxu1 %v7590_v29  ;;  %v4331_v29 = vadd.f32 %v7685_v24, %v4218_v49  ;;  %v4915_v49 = vld [vmem:[#allocation2 + $0x99] sm:$0xff] }
 0x533   : > { %v4668_v46 = vadd.f32 %v7632_v41, %v4632_v19  ;;  %v4444_v24 = vadd.f32 %v7690_v56, %v4331_v29  ;;  %v4345_v19 = vpop.f32.mrf.mxu3 }
 0x535   : > { %v4700_v43 = vadd.f32 %v4913_v62, %v4668_v46  ;;  %v4224_v46 = vadd.f32 %v7707_v20, %v4111_v30  ;;  %v7772_v56 = vpop.f32.mrf.mxu0 }
 0x536   : > { %v4553_v13 = vpop.f32.mrf.mxu1 }
 0x537   : > { %v4732_v4 = vmax.f32 %v4700_v43, 0.0  ;;  %v4554_v40 = vadd.f32 %v4553_v13, %v4441_v57  ;;  %v4235_v43 = vpop.f32.mrf.mxu2 }
 0x539   : > { %4764 = vst [vmem:[%s7644_s29 + $0x48] sm:$0xff] %v4732_v4  ;;  %v4633_v31 = vmul.f32 %v7626_v12, %v4554_v40  ;;  %4600 = vmatmul.f32.gmra.mxu1 %v7597_v22  ;;  %v4334_v22 = vadd.f32 %v7699_v26, %v4221_v17  ;;  %v8056_v40 = vld [vmem:[#allocation13_spill] sm:$0xff] }
 0x53a   : > { %v4114_v20 = vadd.f32 %v7463_v34, %v8056_v40 }
 0x53b   : > { %v4669_v28 = vadd.f32 %v7632_v41, %v4633_v31  ;;  %v4447_v26 = vadd.f32 %v7705_v5, %v4334_v22  ;;  %v4348_v31 = vpop.f32.mrf.mxu3 }
 0x53c   : > { %v4227_v5 = vadd.f32 %v7723_v25, %v4114_v20 }
 0x53d   : > { %v4701_v9 = vadd.f32 %v4914_v48, %v4669_v28 }
 0x53e   : > { %v4556_v16 = vpop.f32.mrf.mxu1 }
 0x53f   : > { %v4733_v3 = vmax.f32 %v4701_v9, 0.0  ;;  %v4557_v32 = vadd.f32 %v4556_v16, %v4444_v24  ;;  %v4238_v9 = vpop.f32.mrf.mxu2  ;;  %v4340_v24 = vadd.f32 %v7734_v10, %v4227_v5  ;;  %v8058_v16 = vld [vmem:[#allocation29_spill] sm:$0xff]  ;;  %v3136_v10 = vld [vmem:[#allocation3 + $0x19a] sm:$0xff] }
 0x541   : > { %4765 = vst [vmem:[%s7644_s29 + $0x50] sm:$0xff] %v4733_v3  ;;  %v4634_v42 = vmul.f32 %v7626_v12, %v4557_v32  ;;  %4603 = vmatmul.f32.gmra.mxu1 %v7604_v51  ;;  %v4337_v51 = vadd.f32 %v7717_v7, %v4224_v46  ;;  %v4461_v7 = vpop.f32.mrf.mxu0  ;;  %v4917_v32 = vld [vmem:[#allocation2 + $0xb1] sm:$0xff] }
 0x543   : > { %v4670_v0 = vadd.f32 %v7632_v41, %v4634_v42  ;;  %v4450_v36 = vadd.f32 %v7721_v53, %v4337_v51  ;;  %v4453_v42 = vadd.f32 %v7737_v18, %v4340_v24  ;;  %v4351_v61 = vpop.f32.mrf.mxu3 }
 0x545   : > { %v4702_v62 = vadd.f32 %v4915_v49, %v4670_v0 }
 0x546   : > { %v4559_v57 = vpop.f32.mrf.mxu1 }
 0x547   : > { %v4734_v13 = vmax.f32 %v4702_v62, 0.0  ;;  %v4560_v4 = vadd.f32 %v4559_v57, %v4447_v26  ;;  %v4241_v26 = vpop.f32.mrf.mxu2  ;;  %v8059_v57 = vld [vmem:[#allocation20_spill] sm:$0xff] }
 0x549   : > { %4766 = vst [vmem:[%s7644_s29 + $0x58] sm:$0xff] %v4734_v13  ;;  %v4635_v52 = vmul.f32 %v7626_v12, %v4560_v4  ;;  %4606 = vmatmul.f32.gmra.mxu1 %v7610_v14  ;;  %v8057_v14 = vld [vmem:[#allocation5_spill] sm:$0xff]  ;;  %v4464_v62 = vpop.f32.mrf.mxu0 }
 0x54a   : > { %v4117_v25 = vadd.f32 %v8058_v16, %v8057_v14  ;;  %v4918_v4 = vld [vmem:[#allocation2 + $0xc1] sm:$0xff] }
 0x54b   : > { %v4671_v29 = vadd.f32 %v7632_v41, %v4635_v52  ;;  %v4354_v5 = vpop.f32.mrf.mxu3 }
 0x54c   : > { %v4230_v53 = vadd.f32 %v7742_v2, %v4117_v25  ;;  %v4120_v2 = vadd.f32 %v7488_v39, %v8059_v57  ;;  %v8060_v39 = vld [vmem:[#allocation6_spill] sm:$0xff] }
 0x54d   : > { %v4703_v50 = vadd.f32 %v4916_v58, %v4671_v29 }
 0x54e   : > { %v4562_v28 = vpop.f32.mrf.mxu1  ;;  %v4343_v49 = vadd.f32 %v7749_v35, %v4230_v53  ;;  %v4233_v18 = vadd.f32 %v7760_v38, %v4120_v2  ;;  %v3137_v35 = vld [vmem:[#allocation3 + $0x1a2] sm:$0xff] }
 0x54f   : > { %v4735_v17 = vmax.f32 %v4703_v50, 0.0  ;;  %v4563_v48 = vadd.f32 %v4562_v28, %v4450_v36  ;;  %v4123_v36 = vadd.f32 %v7499_v55, %v8060_v39  ;;  %v8062_v2 = vld [vmem:[#allocation23_spill] sm:$0xff] }
 0x550   : > { %v4456_v52 = vadd.f32 %v7757_v47, %v4343_v49  ;;  %v4346_v58 = vadd.f32 %v4345_v19, %v4233_v18  ;;  %v4919_v47 = vld [vmem:[#allocation2 + $0xc9] sm:$0xff] }
 0x551   : > { %4767 = vst [vmem:[%s7644_s29 + $0x60] sm:$0xff] %v4735_v17  ;;  %v4636_v34 = vmul.f32 %v7626_v12, %v4563_v48  ;;  %4609 = vmatmul.f32.gmra.mxu1 %v7616_v63  ;;  %v4467_v28 = vpop.f32.mrf.mxu0  ;;  %v4244_v17 = vpop.f32.mrf.mxu2  ;;  %v4236_v48 = vadd.f32 %v4235_v43, %v4123_v36 }
 0x553   : > { %v4672_v3 = vadd.f32 %v7632_v41, %v4636_v34  ;;  %v4459_v34 = vadd.f32 %v7772_v56, %v4346_v58  ;;  %v4349_v25 = vadd.f32 %v4348_v31, %v4236_v48  ;;  %v4357_v53 = vpop.f32.mrf.mxu3 }
 0x555   : > { %v4704_v22 = vadd.f32 %v4917_v32, %v4672_v3  ;;  %v8061_v32 = vld [vmem:[#allocation21_spill] sm:$0xff] }
 0x556   : > { %v4565_v30 = vpop.f32.mrf.mxu1  ;;  %v4126_v55 = vadd.f32 %v7510_v1, %v8061_v32  ;;  %v4923_v32 = vld [vmem:[#allocation2 + $0xf9] sm:$0xff] }
 0x557   : > { %v4736_v0 = vmax.f32 %v4704_v22, 0.0  ;;  %v4566_v46 = vadd.f32 %v4565_v30, %v4453_v42  ;;  %v4920_v30 = vld [vmem:[#allocation2 + $0xd9] sm:$0xff] }
 0x558   : > { %v4239_v42 = vadd.f32 %v4238_v9, %v4126_v55 }
 0x559   : > { %4768 = vst [vmem:[%s7644_s29 + $0x68] sm:$0xff] %v4736_v0  ;;  %v4637_v63 = vmul.f32 %v7626_v12, %v4566_v46  ;;  %4612 = vmatmul.f32.gmra.mxu1 %v3136_v10  ;;  %v4470_v43 = vpop.f32.mrf.mxu0  ;;  %v4462_v0 = vadd.f32 %v4461_v7, %v4349_v25  ;;  %v4247_v56 = vpop.f32.mrf.mxu2  ;;  %v8064_v25 = vld [vmem:[#allocation22_spill] sm:$0xff] }
 0x55a   : > { %v4352_v31 = vadd.f32 %v4351_v61, %v4239_v42 }
 0x55b   : > { %v4673_v13 = vadd.f32 %v7632_v41, %v4637_v63  ;;  %v4360_v18 = vpop.f32.mrf.mxu3 }
 0x55d   : > { %v4705_v51 = vadd.f32 %v4918_v4, %v4673_v13  ;;  %v4129_v13 = vadd.f32 %v7521_v8, %v8062_v2  ;;  %v4921_v4 = vld [vmem:[#allocation2 + $0xe1] sm:$0xff] }
 0x55e   : > { %v4568_v40 = vpop.f32.mrf.mxu1 }
 0x55f   : > { %v4737_v20 = vmax.f32 %v4705_v51, 0.0  ;;  %v4569_v29 = vadd.f32 %v4568_v40, %v4456_v52  ;;  %v4242_v9 = vadd.f32 %v4241_v26, %v4129_v13  ;;  %v4465_v52 = vadd.f32 %v4464_v62, %v4352_v31  ;;  %v4922_v26 = vld [vmem:[#allocation2 + $0xf1] sm:$0xff] }
 0x561   : > { %4769 = vst [vmem:[%s7644_s29 + $0x70] sm:$0xff] %v4737_v20  ;;  %v4638_v50 = vmul.f32 %v7626_v12, %v4569_v29  ;;  %4615 = vmatmul.f32.gmra.mxu1 %v3137_v35  ;;  %v4473_v40 = vpop.f32.mrf.mxu0  ;;  %v4250_v29 = vpop.f32.mrf.mxu2  ;;  %v4355_v61 = vadd.f32 %v4354_v5, %v4242_v9 }
 0x563   : > { %v4674_v38 = vadd.f32 %v7632_v41, %v4638_v50  ;;  %v8063_v50 = vld [vmem:[#allocation7_spill] sm:$0xff]  ;;  %v4468_v48 = vadd.f32 %v4467_v28, %v4355_v61  ;;  %v4363_v62 = vpop.f32.mrf.mxu3 }
 0x564   : > { %v4132_v8 = vadd.f32 %v7532_v54, %v8063_v50  ;;  %v4135_v54 = vadd.f32 %v7543_v15, %v8064_v25 }
 0x565   : > { %v4706_v24 = vadd.f32 %v4919_v47, %v4674_v38 }
 0x566   : > { %v4571_v14 = vpop.f32.mrf.mxu1  ;;  %v4245_v36 = vadd.f32 %v4244_v17, %v4132_v8  ;;  %v4248_v17 = vadd.f32 %v4247_v56, %v4135_v54 }
 0x567   : > { %v4738_v16 = vmax.f32 %v4706_v24, 0.0  ;;  %v4572_v19 = vadd.f32 %v4571_v14, %v4459_v34 }
 0x568   : > { %v4358_v14 = vadd.f32 %v4357_v53, %v4245_v36  ;;  %v4361_v53 = vadd.f32 %v4360_v18, %v4248_v17 }
 0x569   : > { %4770 = vst [vmem:[%s7644_s29 + $0x78] sm:$0xff] %v4738_v16  ;;  %v4639_v3 = vmul.f32 %v7626_v12, %v4572_v19  ;;  %v4476_v16 = vpop.f32.mrf.mxu0  ;;  %v4253_v19 = vpop.f32.mrf.mxu2 }
 0x56a   : > { %v4471_v28 = vadd.f32 %v4470_v43, %v4358_v14  ;;  %v4474_v43 = vadd.f32 %v4473_v40, %v4361_v53 }
 0x56b   : > { %v4675_v22 = vadd.f32 %v7632_v41, %v4639_v3 }
 0x56d   : > { %v4707_v10 = vadd.f32 %v4920_v30, %v4675_v22 }
 0x56e   : > { %v4574_v46 = vpop.f32.mrf.mxu1 }
 0x56f   : > { %v4739_v49 = vmax.f32 %v4707_v10, 0.0  ;;  %v4575_v63 = vadd.f32 %v4574_v46, %v4462_v0  ;;  %v4366_v10 = vpop.f32.mrf.mxu3  ;;  %v8065_v46 = vld [vmem:[#allocation8_spill] sm:$0xff] }
 0x571   : > { %4771 = vst [vmem:[%s7644_s29 + $0x80] sm:$0xff] %v4739_v49  ;;  %v4640_v57 = vmul.f32 %v7626_v12, %v4575_v63  ;;  %v4138_v49 = vadd.f32 %v7554_v44, %v8065_v46  ;;  %v4479_v63 = vpop.f32.mrf.mxu0  ;;  %v4256_v31 = vpop.f32.mrf.mxu2 }
 0x573   : > { %v4676_v1 = vadd.f32 %v7632_v41, %v4640_v57  ;;  %v4251_v56 = vadd.f32 %v4250_v29, %v4138_v49  ;;  %v4924_v57 = vld [vmem:[#allocation2 + $0x109] sm:$0xff]  ;;  %v4925_v29 = vld [vmem:[#allocation2 + $0x111] sm:$0xff] }
 0x575   : > { %v4708_v51 = vadd.f32 %v4921_v4, %v4676_v1  ;;  %v4364_v4 = vadd.f32 %v4363_v62, %v4251_v56  ;;  %v8069_v56 = vld [vmem:[#allocation18_spill] sm:$0xff] }
 0x576   : > { %v4577_v7 = vpop.f32.mrf.mxu1 }
 0x577   : > { %v4740_v35 = vmax.f32 %v4708_v51, 0.0  ;;  %v4578_v20 = vadd.f32 %v4577_v7, %v4465_v52  ;;  %v4369_v51 = vpop.f32.mrf.mxu3  ;;  %v8066_v52 = vld [vmem:[#allocation9_spill] sm:$0xff] }
 0x578   : > { %v4141_v44 = vadd.f32 %v7565_v27, %v8066_v52 }
 0x579   : > { %4772 = vst [vmem:[%s7644_s29 + $0x88] sm:$0xff] %v4740_v35  ;;  %v4641_v58 = vmul.f32 %v7626_v12, %v4578_v20  ;;  %v4482_v20 = vpop.f32.mrf.mxu0  ;;  %v4259_v40 = vpop.f32.mrf.mxu2 }
 0x57a   : > { %v4254_v35 = vadd.f32 %v4253_v19, %v4141_v44 }
 0x57b   : > { %v4677_v39 = vadd.f32 %v7632_v41, %v4641_v58  ;;  %v4477_v58 = vadd.f32 %v4476_v16, %v4364_v4 }
 0x57c   : > { %v4367_v36 = vadd.f32 %v4366_v10, %v4254_v35 }
 0x57d   : > { %v4709_v38 = vadd.f32 %v4922_v26, %v4677_v39 }
 0x57e   : > { %v4580_v47 = vpop.f32.mrf.mxu1  ;;  %v4480_v14 = vadd.f32 %v4479_v63, %v4367_v36 }
 0x57f   : > { %v4741_v24 = vmax.f32 %v4709_v38, 0.0  ;;  %v4581_v34 = vadd.f32 %v4580_v47, %v4468_v48  ;;  %v8067_v38 = vld [vmem:[#allocation10_spill] sm:$0xff]  ;;  %v4372_v62 = vpop.f32.mrf.mxu3 }
 0x580   : > { %v4144_v48 = vadd.f32 %v7574_v37, %v8067_v38 }
 0x581   : > { %4773 = vst [vmem:[%s7644_s29 + $0x90] sm:$0xff] %v4741_v24  ;;  %v4642_v5 = vmul.f32 %v7626_v12, %v4581_v34  ;;  %v4926_v24 = vld [vmem:[#allocation2 + $0x121] sm:$0xff]  ;;  %v4262_v54 = vpop.f32.mrf.mxu2 }
 0x582   : > { %v4257_v47 = vadd.f32 %v4256_v31, %v4144_v48 }
 0x583   : > { %v4678_v3 = vadd.f32 %v7632_v41, %v4642_v5  ;;  %v4485_v5 = vpop.f32.mrf.mxu0 }
 0x585   : > { %v4710_v55 = vadd.f32 %v4923_v32, %v4678_v3  ;;  %v4370_v3 = vadd.f32 %v4369_v51, %v4257_v47  ;;  %v8068_v32 = vld [vmem:[#allocation11_spill] sm:$0xff] }
 0x586   : > { %v4583_v22 = vpop.f32.mrf.mxu1  ;;  %v4147_v37 = vadd.f32 %v7581_v60, %v8068_v32  ;;  %v4150_v60 = vadd.f32 %v7588_v59, %v8069_v56  ;;  %v8072_v32 = vld [vmem:[#allocation27_spill] sm:$0xff] }
 0x587   : > { %v4742_v42 = vmax.f32 %v4710_v55, 0.0  ;;  %v4584_v30 = vadd.f32 %v4583_v22, %v4471_v28  ;;  %v4927_v22 = vld [vmem:[#allocation2 + $0x129] sm:$0xff]  ;;  %v4375_v10 = vpop.f32.mrf.mxu3 }
 0x588   : > { %v4260_v28 = vadd.f32 %v4259_v40, %v4147_v37  ;;  %v4159_v37 = vadd.f32 %v7608_v33, %v8072_v32 }
 0x589   : > { %4774 = vst [vmem:[%s7644_s29 + $0x98] sm:$0xff] %v4742_v42  ;;  %v4643_v0 = vmul.f32 %v7626_v12, %v4584_v30  ;;  %v4483_v30 = vadd.f32 %v4482_v20, %v4370_v3  ;;  %v4265_v31 = vpop.f32.mrf.mxu2 }
 0x58a   : > { %v4373_v49 = vadd.f32 %v4372_v62, %v4260_v28 }
 0x58b   : > { %v4679_v15 = vadd.f32 %v7632_v41, %v4643_v0  ;;  %v4488_v63 = vpop.f32.mrf.mxu0 }
 0x58d   : > { %v4711_v2 = vadd.f32 %v4924_v57, %v4679_v15 }
 0x58e   : > { %v4586_v13 = vpop.f32.mrf.mxu1 }
 0x58f   : > { %v4743_v1 = vmax.f32 %v4711_v2, 0.0  ;;  %v4587_v9 = vadd.f32 %v4586_v13, %v4474_v43  ;;  %v4263_v2 = vadd.f32 %v4262_v54, %v4150_v60  ;;  %v4928_v43 = vld [vmem:[#allocation2 + $0x139] sm:$0xff]  ;;  %v4378_v51 = vpop.f32.mrf.mxu3 }
 0x591   : > { %4775 = vst [vmem:[%s7644_s29 + $0xa0] sm:$0xff] %v4743_v1  ;;  %v4644_v18 = vmul.f32 %v7626_v12, %v4587_v9  ;;  %v4486_v1 = vadd.f32 %v4485_v5, %v4373_v49  ;;  %v4376_v52 = vadd.f32 %v4375_v10, %v4263_v2  ;;  %v4932_v2 = vld [vmem:[#allocation2 + $0x169] sm:$0xff] }
 0x593   : > { %v4680_v7 = vadd.f32 %v7632_v41, %v4644_v18  ;;  %v4491_v20 = vpop.f32.mrf.mxu0 }
 0x595   : > { %v4712_v61 = vadd.f32 %v4925_v29, %v4680_v7  ;;  %v8070_v7 = vld [vmem:[#allocation24_spill] sm:$0xff]  ;;  %v4268_v29 = vpop.f32.mrf.mxu2 }
 0x596   : > { %v4589_v50 = vpop.f32.mrf.mxu1  ;;  %v4153_v35 = vadd.f32 %v7595_v6, %v8070_v7 }
 0x597   : > { %v4744_v8 = vmax.f32 %v4712_v61, 0.0  ;;  %v4590_v39 = vadd.f32 %v4589_v50, %v4477_v58  ;;  %v4929_v58 = vld [vmem:[#allocation2 + $0x141] sm:$0xff]  ;;  %v4489_v50 = vadd.f32 %v4488_v63, %v4376_v52  ;;  %v4381_v48 = vpop.f32.mrf.mxu3 }
 0x598   : > { %v4266_v61 = vadd.f32 %v4265_v31, %v4153_v35  ;;  %v8073_v31 = vld [vmem:[#allocation28_spill] sm:$0xff] }
 0x599   : > { %4776 = vst [vmem:[%s7644_s29 + $0xa8] sm:$0xff] %v4744_v8  ;;  %v4645_v26 = vmul.f32 %v7626_v12, %v4590_v39  ;;  %v4162_v33 = vadd.f32 %v7614_v11, %v8073_v31  ;;  %v4165_v11 = vadd.f32 %v7620_v21, %v7483_v45  ;;  %v4934_v21 = vld [vmem:[#allocation2 + $0x181] sm:$0xff] }
 0x59b   : > { %v4681_v27 = vadd.f32 %v7632_v41, %v4645_v26  ;;  %v4379_v26 = vadd.f32 %v4378_v51, %v4266_v61  ;;  %v4494_v47 = vpop.f32.mrf.mxu0 }
 0x59d   : > { %v4713_v34 = vadd.f32 %v4926_v24, %v4681_v27  ;;  %v8071_v27 = vld [vmem:[#allocation26_spill] sm:$0xff]  ;;  %v4271_v5 = vpop.f32.mrf.mxu2 }
 0x59e   : > { %v4592_v16 = vpop.f32.mrf.mxu1  ;;  %v4156_v6 = vadd.f32 %v7602_v23, %v8071_v27  ;;  %v4272_v28 = vadd.f32 %v4271_v5, %v4159_v37 }
 0x59f   : > { %v4745_v19 = vmax.f32 %v4713_v34, 0.0  ;;  %v4593_v25 = vadd.f32 %v4592_v16, %v4480_v14  ;;  %v4930_v34 = vld [vmem:[#allocation2 + $0x151] sm:$0xff]  ;;  %v4492_v16 = vadd.f32 %v4491_v20, %v4379_v26 }
 0x5a0   : > { %v4269_v24 = vadd.f32 %v4268_v29, %v4156_v6 }
 0x5a1   : > { %4777 = vst [vmem:[%s7644_s29 + $0xb0] sm:$0xff] %v4745_v19  ;;  %v4646_v17 = vmul.f32 %v7626_v12, %v4593_v25 }
 0x5a2   : > { %v4382_v3 = vadd.f32 %v4381_v48, %v4269_v24  ;;  %v4935_v24 = vld [vmem:[#allocation2 + $0x189] sm:$0xff] }
 0x5a3   : > { %v4682_v55 = vadd.f32 %v7632_v41, %v4646_v17 }
 0x5a5   : > { %v4714_v42 = vadd.f32 %v4927_v22, %v4682_v55  ;;  %v4384_v55 = vpop.f32.mrf.mxu3  ;;  %v4931_v22 = vld [vmem:[#allocation2 + $0x159] sm:$0xff]  ;;  %v4274_v49 = vpop.f32.mrf.mxu2 }
 0x5a6   : > { %v4595_v53 = vpop.f32.mrf.mxu1  ;;  %v4385_v63 = vadd.f32 %v4384_v55, %v4272_v28 }
 0x5a7   : > { %v4746_v0 = vmax.f32 %v4714_v42, 0.0  ;;  %v4596_v46 = vadd.f32 %v4595_v53, %v4483_v30  ;;  %v4495_v30 = vadd.f32 %v4494_v47, %v4382_v3 }
 0x5a9   : > { %4778 = vst [vmem:[%s7644_s29 + $0xb8] sm:$0xff] %v4746_v0  ;;  %v4647_v15 = vmul.f32 %v7626_v12, %v4596_v46  ;;  %v4497_v46 = vpop.f32.mrf.mxu0 }
 0x5ab   : > { %v4683_v57 = vadd.f32 %v7632_v41, %v4647_v15 }
 0x5ad   : > { %v4715_v13 = vadd.f32 %v4928_v43, %v4683_v57  ;;  %v4387_v60 = vpop.f32.mrf.mxu3  ;;  %v4275_v57 = vadd.f32 %v4274_v49, %v4162_v33 }
 0x5ae   : > { %v4598_v9 = vpop.f32.mrf.mxu1 }
 0x5af   : > { %v4747_v4 = vmax.f32 %v4715_v13, 0.0  ;;  %v4599_v18 = vadd.f32 %v4598_v9, %v4486_v1  ;;  %v4498_v13 = vadd.f32 %v4497_v46, %v4385_v63  ;;  %v4388_v51 = vadd.f32 %v4387_v60, %v4275_v57 }
 0x5b1   : > { %4779 = vst [vmem:[%s7644_s29 + $0xc0] sm:$0xff] %v4747_v4  ;;  %v4648_v44 = vmul.f32 %v7626_v12, %v4599_v18  ;;  %v4500_v18 = vpop.f32.mrf.mxu0 }
 0x5b2   : > { %v4501_v35 = vadd.f32 %v4500_v18, %v4388_v51 }
 0x5b3   : > { %v4684_v59 = vadd.f32 %v7632_v41, %v4648_v44  ;;  %v4277_v44 = vpop.f32.mrf.mxu2 }
 0x5b4   : > { %v4278_v20 = vadd.f32 %v4277_v44, %v4165_v11 }
 0x5b5   : > { %v4716_v40 = vadd.f32 %v4929_v58, %v4684_v59  ;;  %v4933_v59 = vld [vmem:[#allocation2 + $0x171] sm:$0xff]  ;;  %v4390_v61 = vpop.f32.mrf.mxu3 }
 0x5b6   : > { %v4601_v8 = vpop.f32.mrf.mxu1 }
 0x5b7   : > { %v4748_v39 = vmax.f32 %v4716_v40, 0.0  ;;  %v4602_v36 = vadd.f32 %v4601_v8, %v4489_v50  ;;  %v4391_v8 = vadd.f32 %v4390_v61, %v4278_v20 }
 0x5b9   : > { %4780 = vst [vmem:[%s7644_s29 + $0xc8] sm:$0xff] %v4748_v39  ;;  %v4649_v38 = vmul.f32 %v7626_v12, %v4602_v36  ;;  %v4503_v36 = vpop.f32.mrf.mxu0 }
 0x5ba   : > { %v4504_v45 = vadd.f32 %v4503_v36, %v4391_v8 }
 0x5bb   : > { %v4685_v62 = vadd.f32 %v7632_v41, %v4649_v38 }
 0x5bd   : > { %v4717_v14 = vadd.f32 %v4930_v34, %v4685_v62 }
 0x5be   : > { %v4604_v19 = vpop.f32.mrf.mxu1 }
 0x5bf   : > { %v4749_v25 = vmax.f32 %v4717_v14, 0.0  ;;  %v4605_v54 = vadd.f32 %v4604_v19, %v4492_v16 }
 0x5c1   : > { %4781 = vst [vmem:[%s7644_s29 + $0xd0] sm:$0xff] %v4749_v25  ;;  %v4650_v17 = vmul.f32 %v7626_v12, %v4605_v54 }
 0x5c3   : > { %v4686_v23 = vadd.f32 %v7632_v41, %v4650_v17 }
 0x5c5   : > { %v4718_v42 = vadd.f32 %v4931_v22, %v4686_v23 }
 0x5c6   : > { %v4607_v10 = vpop.f32.mrf.mxu1 }
 0x5c7   : > { %v4750_v53 = vmax.f32 %v4718_v42, 0.0  ;;  %v4608_v0 = vadd.f32 %v4607_v10, %v4495_v30 }
 0x5c9   : > { %4782 = vst [vmem:[%s7644_s29 + $0xd8] sm:$0xff] %v4750_v53  ;;  %v4651_v15 = vmul.f32 %v7626_v12, %v4608_v0 }
 0x5cb   : > { %v4687_v56 = vadd.f32 %v7632_v41, %v4651_v15 }
 0x5cd   : > { %v4719_v43 = vadd.f32 %v4932_v2, %v4687_v56 }
 0x5ce   : > { %v4610_v1 = vpop.f32.mrf.mxu1 }
 0x5cf   : > { %v4751_v9 = vmax.f32 %v4719_v43, 0.0  ;;  %v4611_v4 = vadd.f32 %v4610_v1, %v4498_v13 }
 0x5d1   : > { %4783 = vst [vmem:[%s7644_s29 + $0xe0] sm:$0xff] %v4751_v9  ;;  %v4652_v52 = vmul.f32 %v7626_v12, %v4611_v4 }
 0x5d3   : > { %v4688_v7 = vadd.f32 %v7632_v41, %v4652_v52 }
 0x5d5   : > { %v4720_v29 = vadd.f32 %v4933_v59, %v4688_v7 }
 0x5d6   : > { %v4613_v58 = vpop.f32.mrf.mxu1 }
 0x5d7   : > { %v4752_v40 = vmax.f32 %v4720_v29, 0.0  ;;  %v4614_v50 = vadd.f32 %v4613_v58, %v4501_v35 }
 0x5d9   : > { %4784 = vst [vmem:[%s7644_s29 + $0xe8] sm:$0xff] %v4752_v40  ;;  %v4653_v39 = vmul.f32 %v7626_v12, %v4614_v50 }
 0x5db   : > { %v4689_v26 = vadd.f32 %v7632_v41, %v4653_v39 }
 0x5dd   : > { %v4721_v38 = vadd.f32 %v4934_v21, %v4689_v26 }
 0x5de   : > { %v4616_v48 = vpop.f32.mrf.mxu1 }
 0x5df   : > { %v4753_v27 = vmax.f32 %v4721_v38, 0.0  ;;  %v4617_v6 = vadd.f32 %v4616_v48, %v4504_v45 }
 0x5e1   : > { %4785 = vst [vmem:[%s7644_s29 + $0xf0] sm:$0xff] %v4753_v27  ;;  %v4654_v62 = vmul.f32 %v7626_v12, %v4617_v6 }
 0x5e3   : > { %v4690_v47 = vadd.f32 %v7632_v41, %v4654_v62 }
 0x5e5   : > { %v4722_v34 = vadd.f32 %v4935_v24, %v4690_v47 }
 0x5e7   : > { %v4754_v14 = vmax.f32 %v4722_v34, 0.0 }
 0x5e9   : > { %4786 = vst [vmem:[%s7644_s29 + $0xf8] sm:$0xff] %v4754_v14 }
 0x5ea PF: > { %s17_s24 = sadd.s32 1, %s4942_s24  }
 0x5eb   : > { %p14_p4 = scmp.ge.s32.totalorder %s17_s24, 4  }
 0x5ed   :  { %16 = sbr.rel (!%p14_p4) target bundleno = 1 (0x1), region = 84 }

</bundles_post_ra>
